<compile_context>
chip_gen: v6e
topology: v6e:2x2x1
jax: 0.10.0
libtpu: 0.0.40
codegen_flags: <defaults>
</compile_context>

<pallas_src>
import jax
import jax.numpy as jnp
from jax import lax
from jax.experimental import pallas as pl
from jax.experimental.pallas import tpu as pltpu


def _eegnet_kernel(patch_ref, wcomb_ref, b2_ref, pool6_ref, w3_ref, b3_ref,
                   q_ref, bfc_ref, out_ref, elu2_ref, p2pad_ref, acc3_ref):
    f32 = jnp.float32
    NB = out_ref.shape[1]             # examples processed this grid step
    C = acc3_ref.shape[0]             # 64 channels
    W2P = pool6_ref.shape[0]          # 384 : padded depthwise-conv output width
    W3P = pool6_ref.shape[1]          # 128 : padded per-example block after AvgPool(1,6)
    KW3 = w3_ref.shape[0]             # 13  : separableConv kernel width

    patch = patch_ref[0]              # (72, NB*W2P) stride-2 im2col patch (built in wrapper)

    # ---- firstConv+BN1+depthwiseConv+BN2 (all linear in eval) fused into one MXU matmul.
    z2 = jnp.dot(wcomb_ref[...], patch, preferred_element_type=f32) + b2_ref[...]
    # ELU(alpha=1); exp(x)-1 kept on the verified Mosaic lowering (diff far below tolerance).
    elu2_ref[...] = jnp.where(z2 > 0, z2, jnp.exp(z2) - 1.0)

    # ---- AvgPool(1,6) per example as a matmul; pool6 also lays the result into a 128-wide
    # per-example block with 6 zero columns on each side (the separableConv zero padding).
    p2pad_ref[:, NB * W3P:] = jnp.zeros((C, W3P), f32)   # spill-over block for shifted reads
    for n in range(NB):
        p2pad_ref[:, n * W3P:(n + 1) * W3P] = jnp.dot(
            elu2_ref[:, n * W2P:(n + 1) * W2P], pool6_ref[...],
            preferred_element_type=f32)

    # ---- separableConv: 13 taps accumulated into a VMEM scratch accumulator.  The global
    # shifted slices stay inside each example's 128-lane block for every column that the
    # classifier consumes (u + t <= 73 < 128); the zeroed tail block keeps the rest finite.
    acc3_ref[...] = b3_ref[...] + jnp.dot(
        w3_ref[0], p2pad_ref[:, 0:NB * W3P], preferred_element_type=f32)
    for t in range(1, KW3):
        acc3_ref[...] += jnp.dot(
            w3_ref[t], p2pad_ref[:, t:t + NB * W3P], preferred_element_type=f32)
    act3 = acc3_ref[...]
    act3 = jnp.where(act3 > 0, act3, jnp.exp(act3) - 1.0)   # ELU

    # ---- AvgPool(1,5) + channel-major flatten + Linear(768,2) folded into Q; one Frobenius
    # product per (example, logit) and a single output-block store.
    logits = []
    for n in range(NB):
        blk = act3[:, n * W3P:(n + 1) * W3P]                 # (64, 128)
        prod = blk[None, :, :] * q_ref[...]                  # (2, 64, 128)
        logits.append(jnp.sum(jnp.sum(prod, axis=2), axis=1).reshape(1, 2))
    out_ref[...] = (jnp.concatenate(logits, axis=0) + bfc_ref[...]).reshape(1, NB, 2)


def eegnet_forward(x, params, nb=None):
    B, T = x.shape[0], x.shape[-1]
    KW1, KW2 = 31, 5
    NTAP = KW1 + KW2 - 1               # 35 input taps feeding one depthwise output column
    W2 = (T - 5) // 2 + 1              # 373 : depthwise-conv output width (stride 2)
    W3 = W2 // 6                       # 62
    W5 = W3 // 5                       # 12
    assert 64 * W5 == 768, "temporal length inconsistent with Linear(768, 2)"
    W2P = ((W2 + 127) // 128) * 128    # 384
    W3P = 128
    KP = 72                            # 2 rows * 35 taps, padded up to a sublane multiple

    if nb is None:
        nb = max(1, min(8, B // 2))    # keep >=2 grid steps when B >= 2 (megacore / 2 TCs)
    G = (B + nb - 1) // nb
    Bp = G * nb

    eps = 1e-5
    f32 = jnp.float32

    def bn_fold(g, b, m, v):
        s = g / jnp.sqrt(v + eps)
        return s, b - m * s

    bn1s, bn1b = bn_fold(params['g1'], params['b1'], params['m1'], params['v1'])
    bn2s, bn2b = bn_fold(params['g2'], params['b2'], params['m2'], params['v2'])
    bn3s, bn3b = bn_fold(params['g3'], params['b3'], params['m3'], params['v3'])

    # ---- compose firstConv*BN1 with the densified grouped depthwiseConv*BN2 (eval: linear).
    W1f = params['w1'] * bn1s[:, None]                       # (32, 31)
    co = jnp.arange(64)
    grp = co // 4
    w2d = jnp.zeros((64, 32, 2, KW2), f32)                   # (co, ci, kh, kw)
    w2d = w2d.at[co, 2 * grp].set(params['w2'][:, 0])
    w2d = w2d.at[co, 2 * grp + 1].set(params['w2'][:, 1])
    w2d = w2d * bn2s[:, None, None, None]                    # fold BN2 scale
    wcomb = jnp.zeros((64, 2, NTAP), f32)                    # (co, kh, m) with m = kw + k
    for kw in range(KW2):
        contrib = jnp.einsum('oih,ik->ohk', w2d[:, :, :, kw], W1f)   # (64, 2, 31)
        wcomb = wcomb.at[:, :, kw:kw + KW1].add(contrib)
    wcomb = wcomb.reshape(64, 2 * NTAP)
    wcomb = jnp.pad(wcomb, ((0, 0), (0, KP - 2 * NTAP)))     # (64, 72)
    bias2 = (bn2b + jnp.einsum('oihk,i->o', w2d, bn1b)).reshape(64, 1)

    # separableConv weights with BN3 scale folded in; bias separate.
    w3t = jnp.transpose(params['w3'][:, :, 0, :], (2, 0, 1)) * bn3s[None, :, None]  # (13,64,64)
    bias3 = bn3b.reshape(64, 1)

    # AvgPool(1,6) as a matmul; also inserts 6 zero columns each side (separableConv padding)
    # and ignores the depthwise lane-padding columns (rows >= 372 stay zero).
    rows = jnp.arange(W3 * 6)
    pool6 = jnp.zeros((W2P, W3P), f32).at[rows, 6 + rows // 6].set(1.0 / 6.0)

    # AvgPool(1,5) + channel-major flatten + Linear(768, 2) folded into Q (zero elsewhere).
    wfc3 = params['wfc'].reshape(64, W5, 2)
    uu = jnp.arange(W5 * 5)
    q = jnp.zeros((2, 64, W3P), f32).at[:, :, :W5 * 5].set(
        jnp.transpose(wfc3[:, uu // 5, :], (2, 0, 1)) / 5.0)
    bfc = params['bfc'].reshape(1, 2)

    # ---- stride-2 im2col patch, built wrapper-side and laid out lane-aligned.
    xpad = jnp.pad(x[:, 0], ((0, 0), (0, 0), (15, 15)))      # (B, 2, T+30)
    taps = [xpad[:, :, m:m + 2 * W2 - 1:2] for m in range(NTAP)]     # 35 x (B, 2, W2)
    pat = jnp.stack(taps, axis=2).reshape(B, 2 * NTAP, W2)   # rows: kh*35 + m
    pat = jnp.pad(pat, ((0, Bp - B), (0, KP - 2 * NTAP), (0, W2P - W2)))
    # per grid step, lanes = (example-in-block, time): examples stacked along the lane axis.
    pat = pat.reshape(G, nb, KP, W2P).transpose(0, 2, 1, 3).reshape(G, KP, nb * W2P)

    def full_spec(a):
        nd = a.ndim
        return pl.BlockSpec(a.shape, lambda g, nd=nd: (0,) * nd)

    out = pl.pallas_call(
        _eegnet_kernel,
        out_shape=jax.ShapeDtypeStruct((G, nb, 2), f32),
        grid=(G,),
        in_specs=[
            pl.BlockSpec((1, KP, nb * W2P), lambda g: (g, 0, 0)),   # im2col patch
            full_spec(wcomb), full_spec(bias2),
            full_spec(pool6),
            full_spec(w3t), full_spec(bias3),
            full_spec(q), full_spec(bfc),
        ],
        out_specs=pl.BlockSpec((1, nb, 2), lambda g: (g, 0, 0)),
        scratch_shapes=[
            pltpu.VMEM((64, nb * W2P), f32),           # ELU(depthwise+BN2) activations
            pltpu.VMEM((64, (nb + 1) * W3P), f32),     # pooled + zero-padded separable input
            pltpu.VMEM((64, nb * W3P), f32),           # separableConv accumulator
        ],
        compiler_params=pltpu.CompilerParams(dimension_semantics=("parallel",)),
    )(pat, wcomb, bias2, pool6, w3t, bias3, q, bfc)
    return out.reshape(Bp, 2)[:B]


def reference_forward(x, p):
    """Pure-JAX (XLA) reference reproducing the PyTorch forward in eval mode."""
    eps = 1e-5
    hi = lax.Precision.HIGHEST

    def bn(h, g, b, m, v):
        return (h - m[None, :, None, None]) * (
            g[None, :, None, None] / jnp.sqrt(v[None, :, None, None] + eps)
        ) + b[None, :, None, None]

    elu = lambda h: jnp.where(h > 0, h, jnp.expm1(h))
    dn = ('NCHW', 'OIHW', 'NCHW')
    h = lax.conv_general_dilated(x, p['w1'].reshape(32, 1, 1, 31), (1, 1),
                                 ((0, 0), (15, 15)), dimension_numbers=dn, precision=hi)
    h = bn(h, p['g1'], p['b1'], p['m1'], p['v1'])
    h = lax.conv_general_dilated(h, p['w2'], (1, 2), ((0, 0), (0, 0)),
                                 dimension_numbers=dn, feature_group_count=16, precision=hi)
    h = elu(bn(h, p['g2'], p['b2'], p['m2'], p['v2']))
    B, W = h.shape[0], h.shape[-1]
    h = h[..., :(W // 6) * 6].reshape(B, 64, 1, W // 6, 6).mean(-1)
    h = lax.conv_general_dilated(h, p['w3'], (1, 1), ((0, 0), (6, 6)),
                                 dimension_numbers=dn, precision=hi)
    h = elu(bn(h, p['g3'], p['b3'], p['m3'], p['v3']))
    W = h.shape[-1]
    h = h[..., :(W // 5) * 5].reshape(B, 64, 1, W // 5, 5).mean(-1)
    flat = h.reshape(B, -1)
    return jnp.dot(flat, p['wfc'], precision=hi) + p['bfc']


if __name__ == "__main__":
    # Linear(768, 2) pins the temporal length: 64 * ((((T-5)//2+1)//6)//5) == 768 -> T = 750.
    B, T = 2, 750
    key = jax.random.PRNGKey(0)
    k = jax.random.split(key, 20)
    nrm = jax.random.normal
    uni = jax.random.uniform
    params = dict(
        w1=nrm(k[1], (32, 31), jnp.float32) / 31 ** 0.5,
        g1=1.0 + 0.1 * nrm(k[2], (32,), jnp.float32),
        b1=0.1 * nrm(k[3], (32,), jnp.float32),
        m1=0.1 * nrm(k[4], (32,), jnp.float32),
        v1=uni(k[5], (32,), jnp.float32, 0.5, 1.5),
        w2=nrm(k[6], (64, 2, 2, 5), jnp.float32) / 20 ** 0.5,
        g2=1.0 + 0.1 * nrm(k[7], (64,), jnp.float32),
        b2=0.1 * nrm(k[8], (64,), jnp.float32),
        m2=0.1 * nrm(k[9], (64,), jnp.float32),
        v2=uni(k[10], (64,), jnp.float32, 0.5, 1.5),
        w3=nrm(k[11], (64, 64, 1, 13), jnp.float32) / (64 * 13) ** 0.5,
        g3=1.0 + 0.1 * nrm(k[12], (64,), jnp.float32),
        b3=0.1 * nrm(k[13], (64,), jnp.float32),
        m3=0.1 * nrm(k[14], (64,), jnp.float32),
        v3=uni(k[15], (64,), jnp.float32, 0.5, 1.5),
        wfc=nrm(k[16], (768, 2), jnp.float32) / 768 ** 0.5,
        bfc=0.1 * nrm(k[17], (2,), jnp.float32),
    )
    x = nrm(k[0], (B, 1, 2, T), jnp.float32)

    out = jax.jit(eegnet_forward)(x, params)
    out = jax.block_until_ready(out)
    assert out.shape == (B, 2) and out.dtype == jnp.float32

    ref = reference_forward(x, params)
    err = float(jnp.max(jnp.abs(out - ref)))
    scale = float(jnp.max(jnp.abs(ref))) + 1e-6
    assert err <= 2e-2 * max(1.0, scale), f"mismatch: max|diff|={err}, ref scale={scale}"
    print("KERNEL_OK")
</pallas_src>

<mosaic_0001>
module attributes {stable_mosaic.version = 11 : i64} {
  func.func @_eegnet_kernel(%arg0: i32, %arg1: memref<1x72x384xf32, #tpu.memory_space<vmem>>, %arg2: memref<64x72xf32, #tpu.memory_space<vmem>>, %arg3: memref<64x1xf32, #tpu.memory_space<vmem>>, %arg4: memref<384x128xf32, #tpu.memory_space<vmem>>, %arg5: memref<13x64x64xf32, #tpu.memory_space<vmem>>, %arg6: memref<64x1xf32, #tpu.memory_space<vmem>>, %arg7: memref<2x64x128xf32, #tpu.memory_space<vmem>>, %arg8: memref<1x2xf32, #tpu.memory_space<vmem>>, %arg9: memref<1x1x2xf32, #tpu.memory_space<vmem>>, %arg10: memref<64x384xf32, #tpu.memory_space<vmem>>, %arg11: memref<64x256xf32, #tpu.memory_space<vmem>>, %arg12: memref<64x128xf32, #tpu.memory_space<vmem>>) attributes {dimension_semantics = [#tpu.dimension_semantics<parallel>], iteration_bounds = array<i64: 2>, scalar_prefetch = 0 : i64, scratch_operands = 3 : i64, tpu.core_type = #tpu.core_type<tc>, window_params = [{transform_indices = @transform_0, window_bounds = array<i64: 1, 72, 384>}, {pipeline_mode = #tpu.pipeline_mode<synchronous>, transform_indices = @transform_1, window_bounds = array<i64: 64, 72>}, {pipeline_mode = #tpu.pipeline_mode<synchronous>, transform_indices = @transform_2, window_bounds = array<i64: 64, 1>}, {pipeline_mode = #tpu.pipeline_mode<synchronous>, transform_indices = @transform_3, window_bounds = array<i64: 384, 128>}, {pipeline_mode = #tpu.pipeline_mode<synchronous>, transform_indices = @transform_4, window_bounds = array<i64: 13, 64, 64>}, {pipeline_mode = #tpu.pipeline_mode<synchronous>, transform_indices = @transform_5, window_bounds = array<i64: 64, 1>}, {pipeline_mode = #tpu.pipeline_mode<synchronous>, transform_indices = @transform_6, window_bounds = array<i64: 2, 64, 128>}, {pipeline_mode = #tpu.pipeline_mode<synchronous>, transform_indices = @transform_7, window_bounds = array<i64: 1, 2>}, {transform_indices = @transform_8, window_bounds = array<i64: 1, 1, 2>}]} {
    %c0 = arith.constant 0 : index
    %c0_0 = arith.constant 0 : index
    %c0_1 = arith.constant 0 : index
    %0 = vector.load %arg1[%c0, %c0_0, %c0_1] : memref<1x72x384xf32, #tpu.memory_space<vmem>>, vector<1x72x384xf32>
    %1 = vector.shape_cast %0 : vector<1x72x384xf32> to vector<72x384xf32>
    %c0_2 = arith.constant 0 : index
    %c0_3 = arith.constant 0 : index
    %2 = vector.load %arg2[%c0_2, %c0_3] : memref<64x72xf32, #tpu.memory_space<vmem>>, vector<64x72xf32>
    %cst = arith.constant dense<0.000000e+00> : vector<64x384xf32>
    %3 = tpu.matmul %2, %1, %cst {dimension_numbers = #tpu.dot_dimension_numbers<[1], [0], [0], [1], [0, 0, 1, 1], [], []>} : vector<64x72xf32>, vector<72x384xf32>, vector<64x384xf32> -> vector<64x384xf32>
    %c0_4 = arith.constant 0 : index
    %c0_5 = arith.constant 0 : index
    %4 = vector.load %arg3[%c0_4, %c0_5] : memref<64x1xf32, #tpu.memory_space<vmem>>, vector<64x1xf32>
    %5 = vector.broadcast %4 : vector<64x1xf32> to vector<64x384xf32>
    %6 = arith.addf %3, %5 : vector<64x384xf32>
    %cst_6 = arith.constant 0.000000e+00 : f32
    %7 = vector.broadcast %cst_6 : f32 to vector<64x384xf32>
    %8 = arith.cmpf ogt, %6, %7 : vector<64x384xf32>
    %9 = math.exp %6 : vector<64x384xf32>
    %cst_7 = arith.constant 1.000000e+00 : f32
    %10 = vector.broadcast %cst_7 : f32 to vector<64x384xf32>
    %11 = arith.subf %9, %10 : vector<64x384xf32>
    %12 = arith.select %8, %6, %11 : vector<64x384xi1>, vector<64x384xf32>
    %c0_8 = arith.constant 0 : index
    %c0_9 = arith.constant 0 : index
    %13 = vector.load %arg10[%c0_8, %c0_9] : memref<64x384xf32, #tpu.memory_space<vmem>>, vector<64x384xf32>
    tpu.vector_store %arg10[%c0_8, %c0_9], %12 {strides = array<i32>} : memref<64x384xf32, #tpu.memory_space<vmem>>, vector<64x384xf32>,
    %cst_10 = arith.constant 0.000000e+00 : f32
    %14 = vector.broadcast %cst_10 : f32 to vector<64x128xf32>
    %c0_11 = arith.constant 0 : index
    %c128 = arith.constant 128 : index
    %15 = vector.load %arg11[%c0_11, %c128] : memref<64x256xf32, #tpu.memory_space<vmem>>, vector<64x128xf32>
    tpu.vector_store %arg11[%c0_11, %c128], %14 {strides = array<i32>} : memref<64x256xf32, #tpu.memory_space<vmem>>, vector<64x128xf32>,
    %c0_12 = arith.constant 0 : index
    %c0_13 = arith.constant 0 : index
    %16 = vector.load %arg10[%c0_12, %c0_13] : memref<64x384xf32, #tpu.memory_space<vmem>>, vector<64x384xf32>
    %c0_14 = arith.constant 0 : index
    %c0_15 = arith.constant 0 : index
    %17 = vector.load %arg4[%c0_14, %c0_15] : memref<384x128xf32, #tpu.memory_space<vmem>>, vector<384x128xf32>
    %cst_16 = arith.constant dense<0.000000e+00> : vector<64x128xf32>
    %18 = tpu.matmul %16, %17, %cst_16 {dimension_numbers = #tpu.dot_dimension_numbers<[1], [0], [0], [1], [0, 0, 1, 1], [], []>} : vector<64x384xf32>, vector<384x128xf32>, vector<64x128xf32> -> vector<64x128xf32>
    %c0_17 = arith.constant 0 : index
    %c0_18 = arith.constant 0 : index
    %19 = vector.load %arg11[%c0_17, %c0_18] : memref<64x256xf32, #tpu.memory_space<vmem>>, vector<64x128xf32>
    tpu.vector_store %arg11[%c0_17, %c0_18], %18 {strides = array<i32>} : memref<64x256xf32, #tpu.memory_space<vmem>>, vector<64x128xf32>,
    %c0_19 = arith.constant 0 : index
    %c0_20 = arith.constant 0 : index
    %20 = vector.load %arg6[%c0_19, %c0_20] : memref<64x1xf32, #tpu.memory_space<vmem>>, vector<64x1xf32>
    %c0_21 = arith.constant 0 : index
    %c0_22 = arith.constant 0 : index
    %c0_23 = arith.constant 0 : index
    %21 = vector.load %arg5[%c0_21, %c0_22, %c0_23] : memref<13x64x64xf32, #tpu.memory_space<vmem>>, vector<1x64x64xf32>
    %22 = vector.shape_cast %21 : vector<1x64x64xf32> to vector<64x64xf32>
    %c0_24 = arith.constant 0 : index
    %c0_25 = arith.constant 0 : index
    %23 = vector.load %arg11[%c0_24, %c0_25] : memref<64x256xf32, #tpu.memory_space<vmem>>, vector<64x128xf32>
    %cst_26 = arith.constant dense<0.000000e+00> : vector<64x128xf32>
    %24 = tpu.matmul %22, %23, %cst_26 {dimension_numbers = #tpu.dot_dimension_numbers<[1], [0], [0], [1], [0, 0, 1, 1], [], []>} : vector<64x64xf32>, vector<64x128xf32>, vector<64x128xf32> -> vector<64x128xf32>
    %25 = vector.broadcast %20 : vector<64x1xf32> to vector<64x128xf32>
    %26 = arith.addf %25, %24 : vector<64x128xf32>
    %c0_27 = arith.constant 0 : index
    %c0_28 = arith.constant 0 : index
    %27 = vector.load %arg12[%c0_27, %c0_28] : memref<64x128xf32, #tpu.memory_space<vmem>>, vector<64x128xf32>
    tpu.vector_store %arg12[%c0_27, %c0_28], %26 {strides = array<i32>} : memref<64x128xf32, #tpu.memory_space<vmem>>, vector<64x128xf32>,
    %c0_29 = arith.constant 0 : index
    %c0_30 = arith.constant 0 : index
    %28 = vector.load %arg12[%c0_29, %c0_30] : memref<64x128xf32, #tpu.memory_space<vmem>>, vector<64x128xf32>
    %c1 = arith.constant 1 : index
    %c0_31 = arith.constant 0 : index
    %c0_32 = arith.constant 0 : index
    %29 = vector.load %arg5[%c1, %c0_31, %c0_32] : memref<13x64x64xf32, #tpu.memory_space<vmem>>, vector<1x64x64xf32>
    %30 = vector.shape_cast %29 : vector<1x64x64xf32> to vector<64x64xf32>
    %c0_33 = arith.constant 0 : index
    %c1_34 = arith.constant 1 : index
    %31 = vector.load %arg11[%c0_33, %c1_34] : memref<64x256xf32, #tpu.memory_space<vmem>>, vector<64x128xf32>
    %cst_35 = arith.constant dense<0.000000e+00> : vector<64x128xf32>
    %32 = tpu.matmul %30, %31, %cst_35 {dimension_numbers = #tpu.dot_dimension_numbers<[1], [0], [0], [1], [0, 0, 1, 1], [], []>} : vector<64x64xf32>, vector<64x128xf32>, vector<64x128xf32> -> vector<64x128xf32>
    %33 = arith.addf %28, %32 : vector<64x128xf32>
    %c0_36 = arith.constant 0 : index
    %c0_37 = arith.constant 0 : index
    %34 = vector.load %arg12[%c0_36, %c0_37] : memref<64x128xf32, #tpu.memory_space<vmem>>, vector<64x128xf32>
    tpu.vector_store %arg12[%c0_36, %c0_37], %33 {strides = array<i32>} : memref<64x128xf32, #tpu.memory_space<vmem>>, vector<64x128xf32>,
    %c0_38 = arith.constant 0 : index
    %c0_39 = arith.constant 0 : index
    %35 = vector.load %arg12[%c0_38, %c0_39] : memref<64x128xf32, #tpu.memory_space<vmem>>, vector<64x128xf32>
    %c2 = arith.constant 2 : index
    %c0_40 = arith.constant 0 : index
    %c0_41 = arith.constant 0 : index
    %36 = vector.load %arg5[%c2, %c0_40, %c0_41] : memref<13x64x64xf32, #tpu.memory_space<vmem>>, vector<1x64x64xf32>
    %37 = vector.shape_cast %36 : vector<1x64x64xf32> to vector<64x64xf32>
    %c0_42 = arith.constant 0 : index
    %c2_43 = arith.constant 2 : index
    %38 = vector.load %arg11[%c0_42, %c2_43] : memref<64x256xf32, #tpu.memory_space<vmem>>, vector<64x128xf32>
    %cst_44 = arith.constant dense<0.000000e+00> : vector<64x128xf32>
    %39 = tpu.matmul %37, %38, %cst_44 {dimension_numbers = #tpu.dot_dimension_numbers<[1], [0], [0], [1], [0, 0, 1, 1], [], []>} : vector<64x64xf32>, vector<64x128xf32>, vector<64x128xf32> -> vector<64x128xf32>
    %40 = arith.addf %35, %39 : vector<64x128xf32>
    %c0_45 = arith.constant 0 : index
    %c0_46 = arith.constant 0 : index
    %41 = vector.load %arg12[%c0_45, %c0_46] : memref<64x128xf32, #tpu.memory_space<vmem>>, vector<64x128xf32>
    tpu.vector_store %arg12[%c0_45, %c0_46], %40 {strides = array<i32>} : memref<64x128xf32, #tpu.memory_space<vmem>>, vector<64x128xf32>,
    %c0_47 = arith.constant 0 : index
    %c0_48 = arith.constant 0 : index
    %42 = vector.load %arg12[%c0_47, %c0_48] : memref<64x128xf32, #tpu.memory_space<vmem>>, vector<64x128xf32>
    %c3 = arith.constant 3 : index
    %c0_49 = arith.constant 0 : index
    %c0_50 = arith.constant 0 : index
    %43 = vector.load %arg5[%c3, %c0_49, %c0_50] : memref<13x64x64xf32, #tpu.memory_space<vmem>>, vector<1x64x64xf32>
    %44 = vector.shape_cast %43 : vector<1x64x64xf32> to vector<64x64xf32>
    %c0_51 = arith.constant 0 : index
    %c3_52 = arith.constant 3 : index
    %45 = vector.load %arg11[%c0_51, %c3_52] : memref<64x256xf32, #tpu.memory_space<vmem>>, vector<64x128xf32>
    %cst_53 = arith.constant dense<0.000000e+00> : vector<64x128xf32>
    %46 = tpu.matmul %44, %45, %cst_53 {dimension_numbers = #tpu.dot_dimension_numbers<[1], [0], [0], [1], [0, 0, 1, 1], [], []>} : vector<64x64xf32>, vector<64x128xf32>, vector<64x128xf32> -> vector<64x128xf32>
    %47 = arith.addf %42, %46 : vector<64x128xf32>
    %c0_54 = arith.constant 0 : index
    %c0_55 = arith.constant 0 : index
    %48 = vector.load %arg12[%c0_54, %c0_55] : memref<64x128xf32, #tpu.memory_space<vmem>>, vector<64x128xf32>
    tpu.vector_store %arg12[%c0_54, %c0_55], %47 {strides = array<i32>} : memref<64x128xf32, #tpu.memory_space<vmem>>, vector<64x128xf32>,
    %c0_56 = arith.constant 0 : index
    %c0_57 = arith.constant 0 : index
    %49 = vector.load %arg12[%c0_56, %c0_57] : memref<64x128xf32, #tpu.memory_space<vmem>>, vector<64x128xf32>
    %c4 = arith.constant 4 : index
    %c0_58 = arith.constant 0 : index
    %c0_59 = arith.constant 0 : index
    %50 = vector.load %arg5[%c4, %c0_58, %c0_59] : memref<13x64x64xf32, #tpu.memory_space<vmem>>, vector<1x64x64xf32>
    %51 = vector.shape_cast %50 : vector<1x64x64xf32> to vector<64x64xf32>
    %c0_60 = arith.constant 0 : index
    %c4_61 = arith.constant 4 : index
    %52 = vector.load %arg11[%c0_60, %c4_61] : memref<64x256xf32, #tpu.memory_space<vmem>>, vector<64x128xf32>
    %cst_62 = arith.constant dense<0.000000e+00> : vector<64x128xf32>
    %53 = tpu.matmul %51, %52, %cst_62 {dimension_numbers = #tpu.dot_dimension_numbers<[1], [0], [0], [1], [0, 0, 1, 1], [], []>} : vector<64x64xf32>, vector<64x128xf32>, vector<64x128xf32> -> vector<64x128xf32>
    %54 = arith.addf %49, %53 : vector<64x128xf32>
    %c0_63 = arith.constant 0 : index
    %c0_64 = arith.constant 0 : index
    %55 = vector.load %arg12[%c0_63, %c0_64] : memref<64x128xf32, #tpu.memory_space<vmem>>, vector<64x128xf32>
    tpu.vector_store %arg12[%c0_63, %c0_64], %54 {strides = array<i32>} : memref<64x128xf32, #tpu.memory_space<vmem>>, vector<64x128xf32>,
    %c0_65 = arith.constant 0 : index
    %c0_66 = arith.constant 0 : index
    %56 = vector.load %arg12[%c0_65, %c0_66] : memref<64x128xf32, #tpu.memory_space<vmem>>, vector<64x128xf32>
    %c5 = arith.constant 5 : index
    %c0_67 = arith.constant 0 : index
    %c0_68 = arith.constant 0 : index
    %57 = vector.load %arg5[%c5, %c0_67, %c0_68] : memref<13x64x64xf32, #tpu.memory_space<vmem>>, vector<1x64x64xf32>
    %58 = vector.shape_cast %57 : vector<1x64x64xf32> to vector<64x64xf32>
    %c0_69 = arith.constant 0 : index
    %c5_70 = arith.constant 5 : index
    %59 = vector.load %arg11[%c0_69, %c5_70] : memref<64x256xf32, #tpu.memory_space<vmem>>, vector<64x128xf32>
    %cst_71 = arith.constant dense<0.000000e+00> : vector<64x128xf32>
    %60 = tpu.matmul %58, %59, %cst_71 {dimension_numbers = #tpu.dot_dimension_numbers<[1], [0], [0], [1], [0, 0, 1, 1], [], []>} : vector<64x64xf32>, vector<64x128xf32>, vector<64x128xf32> -> vector<64x128xf32>
    %61 = arith.addf %56, %60 : vector<64x128xf32>
    %c0_72 = arith.constant 0 : index
    %c0_73 = arith.constant 0 : index
    %62 = vector.load %arg12[%c0_72, %c0_73] : memref<64x128xf32, #tpu.memory_space<vmem>>, vector<64x128xf32>
    tpu.vector_store %arg12[%c0_72, %c0_73], %61 {strides = array<i32>} : memref<64x128xf32, #tpu.memory_space<vmem>>, vector<64x128xf32>,
    %c0_74 = arith.constant 0 : index
    %c0_75 = arith.constant 0 : index
    %63 = vector.load %arg12[%c0_74, %c0_75] : memref<64x128xf32, #tpu.memory_space<vmem>>, vector<64x128xf32>
    %c6 = arith.constant 6 : index
    %c0_76 = arith.constant 0 : index
    %c0_77 = arith.constant 0 : index
    %64 = vector.load %arg5[%c6, %c0_76, %c0_77] : memref<13x64x64xf32, #tpu.memory_space<vmem>>, vector<1x64x64xf32>
    %65 = vector.shape_cast %64 : vector<1x64x64xf32> to vector<64x64xf32>
    %c0_78 = arith.constant 0 : index
    %c6_79 = arith.constant 6 : index
    %66 = vector.load %arg11[%c0_78, %c6_79] : memref<64x256xf32, #tpu.memory_space<vmem>>, vector<64x128xf32>
    %cst_80 = arith.constant dense<0.000000e+00> : vector<64x128xf32>
    %67 = tpu.matmul %65, %66, %cst_80 {dimension_numbers = #tpu.dot_dimension_numbers<[1], [0], [0], [1], [0, 0, 1, 1], [], []>} : vector<64x64xf32>, vector<64x128xf32>, vector<64x128xf32> -> vector<64x128xf32>
    %68 = arith.addf %63, %67 : vector<64x128xf32>
    %c0_81 = arith.constant 0 : index
    %c0_82 = arith.constant 0 : index
    %69 = vector.load %arg12[%c0_81, %c0_82] : memref<64x128xf32, #tpu.memory_space<vmem>>, vector<64x128xf32>
    tpu.vector_store %arg12[%c0_81, %c0_82], %68 {strides = array<i32>} : memref<64x128xf32, #tpu.memory_space<vmem>>, vector<64x128xf32>,
    %c0_83 = arith.constant 0 : index
    %c0_84 = arith.constant 0 : index
    %70 = vector.load %arg12[%c0_83, %c0_84] : memref<64x128xf32, #tpu.memory_space<vmem>>, vector<64x128xf32>
    %c7 = arith.constant 7 : index
    %c0_85 = arith.constant 0 : index
    %c0_86 = arith.constant 0 : index
    %71 = vector.load %arg5[%c7, %c0_85, %c0_86] : memref<13x64x64xf32, #tpu.memory_space<vmem>>, vector<1x64x64xf32>
    %72 = vector.shape_cast %71 : vector<1x64x64xf32> to vector<64x64xf32>
    %c0_87 = arith.constant 0 : index
    %c7_88 = arith.constant 7 : index
    %73 = vector.load %arg11[%c0_87, %c7_88] : memref<64x256xf32, #tpu.memory_space<vmem>>, vector<64x128xf32>
    %cst_89 = arith.constant dense<0.000000e+00> : vector<64x128xf32>
    %74 = tpu.matmul %72, %73, %cst_89 {dimension_numbers = #tpu.dot_dimension_numbers<[1], [0], [0], [1], [0, 0, 1, 1], [], []>} : vector<64x64xf32>, vector<64x128xf32>, vector<64x128xf32> -> vector<64x128xf32>
    %75 = arith.addf %70, %74 : vector<64x128xf32>
    %c0_90 = arith.constant 0 : index
    %c0_91 = arith.constant 0 : index
    %76 = vector.load %arg12[%c0_90, %c0_91] : memref<64x128xf32, #tpu.memory_space<vmem>>, vector<64x128xf32>
    tpu.vector_store %arg12[%c0_90, %c0_91], %75 {strides = array<i32>} : memref<64x128xf32, #tpu.memory_space<vmem>>, vector<64x128xf32>,
    %c0_92 = arith.constant 0 : index
    %c0_93 = arith.constant 0 : index
    %77 = vector.load %arg12[%c0_92, %c0_93] : memref<64x128xf32, #tpu.memory_space<vmem>>, vector<64x128xf32>
    %c8 = arith.constant 8 : index
    %c0_94 = arith.constant 0 : index
    %c0_95 = arith.constant 0 : index
    %78 = vector.load %arg5[%c8, %c0_94, %c0_95] : memref<13x64x64xf32, #tpu.memory_space<vmem>>, vector<1x64x64xf32>
    %79 = vector.shape_cast %78 : vector<1x64x64xf32> to vector<64x64xf32>
    %c0_96 = arith.constant 0 : index
    %c8_97 = arith.constant 8 : index
    %80 = vector.load %arg11[%c0_96, %c8_97] : memref<64x256xf32, #tpu.memory_space<vmem>>, vector<64x128xf32>
    %cst_98 = arith.constant dense<0.000000e+00> : vector<64x128xf32>
    %81 = tpu.matmul %79, %80, %cst_98 {dimension_numbers = #tpu.dot_dimension_numbers<[1], [0], [0], [1], [0, 0, 1, 1], [], []>} : vector<64x64xf32>, vector<64x128xf32>, vector<64x128xf32> -> vector<64x128xf32>
    %82 = arith.addf %77, %81 : vector<64x128xf32>
    %c0_99 = arith.constant 0 : index
    %c0_100 = arith.constant 0 : index
    %83 = vector.load %arg12[%c0_99, %c0_100] : memref<64x128xf32, #tpu.memory_space<vmem>>, vector<64x128xf32>
    tpu.vector_store %arg12[%c0_99, %c0_100], %82 {strides = array<i32>} : memref<64x128xf32, #tpu.memory_space<vmem>>, vector<64x128xf32>,
    %c0_101 = arith.constant 0 : index
    %c0_102 = arith.constant 0 : index
    %84 = vector.load %arg12[%c0_101, %c0_102] : memref<64x128xf32, #tpu.memory_space<vmem>>, vector<64x128xf32>
    %c9 = arith.constant 9 : index
    %c0_103 = arith.constant 0 : index
    %c0_104 = arith.constant 0 : index
    %85 = vector.load %arg5[%c9, %c0_103, %c0_104] : memref<13x64x64xf32, #tpu.memory_space<vmem>>, vector<1x64x64xf32>
    %86 = vector.shape_cast %85 : vector<1x64x64xf32> to vector<64x64xf32>
    %c0_105 = arith.constant 0 : index
    %c9_106 = arith.constant 9 : index
    %87 = vector.load %arg11[%c0_105, %c9_106] : memref<64x256xf32, #tpu.memory_space<vmem>>, vector<64x128xf32>
    %cst_107 = arith.constant dense<0.000000e+00> : vector<64x128xf32>
    %88 = tpu.matmul %86, %87, %cst_107 {dimension_numbers = #tpu.dot_dimension_numbers<[1], [0], [0], [1], [0, 0, 1, 1], [], []>} : vector<64x64xf32>, vector<64x128xf32>, vector<64x128xf32> -> vector<64x128xf32>
    %89 = arith.addf %84, %88 : vector<64x128xf32>
    %c0_108 = arith.constant 0 : index
    %c0_109 = arith.constant 0 : index
    %90 = vector.load %arg12[%c0_108, %c0_109] : memref<64x128xf32, #tpu.memory_space<vmem>>, vector<64x128xf32>
    tpu.vector_store %arg12[%c0_108, %c0_109], %89 {strides = array<i32>} : memref<64x128xf32, #tpu.memory_space<vmem>>, vector<64x128xf32>,
    %c0_110 = arith.constant 0 : index
    %c0_111 = arith.constant 0 : index
    %91 = vector.load %arg12[%c0_110, %c0_111] : memref<64x128xf32, #tpu.memory_space<vmem>>, vector<64x128xf32>
    %c10 = arith.constant 10 : index
    %c0_112 = arith.constant 0 : index
    %c0_113 = arith.constant 0 : index
    %92 = vector.load %arg5[%c10, %c0_112, %c0_113] : memref<13x64x64xf32, #tpu.memory_space<vmem>>, vector<1x64x64xf32>
    %93 = vector.shape_cast %92 : vector<1x64x64xf32> to vector<64x64xf32>
    %c0_114 = arith.constant 0 : index
    %c10_115 = arith.constant 10 : index
    %94 = vector.load %arg11[%c0_114, %c10_115] : memref<64x256xf32, #tpu.memory_space<vmem>>, vector<64x128xf32>
    %cst_116 = arith.constant dense<0.000000e+00> : vector<64x128xf32>
    %95 = tpu.matmul %93, %94, %cst_116 {dimension_numbers = #tpu.dot_dimension_numbers<[1], [0], [0], [1], [0, 0, 1, 1], [], []>} : vector<64x64xf32>, vector<64x128xf32>, vector<64x128xf32> -> vector<64x128xf32>
    %96 = arith.addf %91, %95 : vector<64x128xf32>
    %c0_117 = arith.constant 0 : index
    %c0_118 = arith.constant 0 : index
    %97 = vector.load %arg12[%c0_117, %c0_118] : memref<64x128xf32, #tpu.memory_space<vmem>>, vector<64x128xf32>
    tpu.vector_store %arg12[%c0_117, %c0_118], %96 {strides = array<i32>} : memref<64x128xf32, #tpu.memory_space<vmem>>, vector<64x128xf32>,
    %c0_119 = arith.constant 0 : index
    %c0_120 = arith.constant 0 : index
    %98 = vector.load %arg12[%c0_119, %c0_120] : memref<64x128xf32, #tpu.memory_space<vmem>>, vector<64x128xf32>
    %c11 = arith.constant 11 : index
    %c0_121 = arith.constant 0 : index
    %c0_122 = arith.constant 0 : index
    %99 = vector.load %arg5[%c11, %c0_121, %c0_122] : memref<13x64x64xf32, #tpu.memory_space<vmem>>, vector<1x64x64xf32>
    %100 = vector.shape_cast %99 : vector<1x64x64xf32> to vector<64x64xf32>
    %c0_123 = arith.constant 0 : index
    %c11_124 = arith.constant 11 : index
    %101 = vector.load %arg11[%c0_123, %c11_124] : memref<64x256xf32, #tpu.memory_space<vmem>>, vector<64x128xf32>
    %cst_125 = arith.constant dense<0.000000e+00> : vector<64x128xf32>
    %102 = tpu.matmul %100, %101, %cst_125 {dimension_numbers = #tpu.dot_dimension_numbers<[1], [0], [0], [1], [0, 0, 1, 1], [], []>} : vector<64x64xf32>, vector<64x128xf32>, vector<64x128xf32> -> vector<64x128xf32>
    %103 = arith.addf %98, %102 : vector<64x128xf32>
    %c0_126 = arith.constant 0 : index
    %c0_127 = arith.constant 0 : index
    %104 = vector.load %arg12[%c0_126, %c0_127] : memref<64x128xf32, #tpu.memory_space<vmem>>, vector<64x128xf32>
    tpu.vector_store %arg12[%c0_126, %c0_127], %103 {strides = array<i32>} : memref<64x128xf32, #tpu.memory_space<vmem>>, vector<64x128xf32>,
    %c0_128 = arith.constant 0 : index
    %c0_129 = arith.constant 0 : index
    %105 = vector.load %arg12[%c0_128, %c0_129] : memref<64x128xf32, #tpu.memory_space<vmem>>, vector<64x128xf32>
    %c12 = arith.constant 12 : index
    %c0_130 = arith.constant 0 : index
    %c0_131 = arith.constant 0 : index
    %106 = vector.load %arg5[%c12, %c0_130, %c0_131] : memref<13x64x64xf32, #tpu.memory_space<vmem>>, vector<1x64x64xf32>
    %107 = vector.shape_cast %106 : vector<1x64x64xf32> to vector<64x64xf32>
    %c0_132 = arith.constant 0 : index
    %c12_133 = arith.constant 12 : index
    %108 = vector.load %arg11[%c0_132, %c12_133] : memref<64x256xf32, #tpu.memory_space<vmem>>, vector<64x128xf32>
    %cst_134 = arith.constant dense<0.000000e+00> : vector<64x128xf32>
    %109 = tpu.matmul %107, %108, %cst_134 {dimension_numbers = #tpu.dot_dimension_numbers<[1], [0], [0], [1], [0, 0, 1, 1], [], []>} : vector<64x64xf32>, vector<64x128xf32>, vector<64x128xf32> -> vector<64x128xf32>
    %110 = arith.addf %105, %109 : vector<64x128xf32>
    %c0_135 = arith.constant 0 : index
    %c0_136 = arith.constant 0 : index
    %111 = vector.load %arg12[%c0_135, %c0_136] : memref<64x128xf32, #tpu.memory_space<vmem>>, vector<64x128xf32>
    tpu.vector_store %arg12[%c0_135, %c0_136], %110 {strides = array<i32>} : memref<64x128xf32, #tpu.memory_space<vmem>>, vector<64x128xf32>,
    %c0_137 = arith.constant 0 : index
    %c0_138 = arith.constant 0 : index
    %112 = vector.load %arg12[%c0_137, %c0_138] : memref<64x128xf32, #tpu.memory_space<vmem>>, vector<64x128xf32>
    %cst_139 = arith.constant 0.000000e+00 : f32
    %113 = vector.broadcast %cst_139 : f32 to vector<64x128xf32>
    %114 = arith.cmpf ogt, %112, %113 : vector<64x128xf32>
    %115 = math.exp %112 : vector<64x128xf32>
    %cst_140 = arith.constant 1.000000e+00 : f32
    %116 = vector.broadcast %cst_140 : f32 to vector<64x128xf32>
    %117 = arith.subf %115, %116 : vector<64x128xf32>
    %118 = arith.select %114, %112, %117 : vector<64x128xi1>, vector<64x128xf32>
    %119 = vector.shape_cast %118 : vector<64x128xf32> to vector<1x64x128xf32>
    %c0_141 = arith.constant 0 : index
    %c0_142 = arith.constant 0 : index
    %c0_143 = arith.constant 0 : index
    %120 = vector.load %arg7[%c0_141, %c0_142, %c0_143] : memref<2x64x128xf32, #tpu.memory_space<vmem>>, vector<2x64x128xf32>
    %121 = vector.broadcast %119 : vector<1x64x128xf32> to vector<2x64x128xf32>
    %122 = arith.mulf %121, %120 : vector<2x64x128xf32>
    %cst_144 = arith.constant dense<0.000000e+00> : vector<2x64xf32>
    %123 = vector.multi_reduction <add>, %122, %cst_144 [2] : vector<2x64x128xf32> to vector<2x64xf32>
    %cst_145 = arith.constant dense<0.000000e+00> : vector<2xf32>
    %124 = vector.multi_reduction <add>, %123, %cst_145 [1] : vector<2x64xf32> to vector<2xf32>
    %125 = vector.shape_cast %124 : vector<2xf32> to vector<1x2xf32>
    %c0_146 = arith.constant 0 : index
    %c0_147 = arith.constant 0 : index
    %126 = vector.load %arg8[%c0_146, %c0_147] : memref<1x2xf32, #tpu.memory_space<vmem>>, vector<1x2xf32>
    %127 = arith.addf %125, %126 : vector<1x2xf32>
    %128 = vector.shape_cast %127 : vector<1x2xf32> to vector<1x1x2xf32>
    %c0_148 = arith.constant 0 : index
    %c0_149 = arith.constant 0 : index
    %c0_150 = arith.constant 0 : index
    %129 = vector.load %arg9[%c0_148, %c0_149, %c0_150] : memref<1x1x2xf32, #tpu.memory_space<vmem>>, vector<1x1x2xf32>
    tpu.vector_store %arg9[%c0_148, %c0_149, %c0_150], %128 {strides = array<i32>} : memref<1x1x2xf32, #tpu.memory_space<vmem>>, vector<1x1x2xf32>,
    return
  }
  func.func @transform_0(%arg0: i32) -> (i32, i32, i32) {
    %c0_i32 = arith.constant 0 : i32
    %c0_i32_0 = arith.constant 0 : i32
    %c0_i32_1 = arith.constant 0 : i32
    return %arg0, %c0_i32, %c0_i32_0 : i32, i32, i32
  }
  func.func @transform_1(%arg0: i32) -> (i32, i32) {
    %c0_i32 = arith.constant 0 : i32
    %c0_i32_0 = arith.constant 0 : i32
    %c0_i32_1 = arith.constant 0 : i32
    return %c0_i32, %c0_i32_0 : i32, i32
  }
  func.func @transform_2(%arg0: i32) -> (i32, i32) {
    %c0_i32 = arith.constant 0 : i32
    %c0_i32_0 = arith.constant 0 : i32
    %c0_i32_1 = arith.constant 0 : i32
    return %c0_i32, %c0_i32_0 : i32, i32
  }
  func.func @transform_3(%arg0: i32) -> (i32, i32) {
    %c0_i32 = arith.constant 0 : i32
    %c0_i32_0 = arith.constant 0 : i32
    %c0_i32_1 = arith.constant 0 : i32
    return %c0_i32, %c0_i32_0 : i32, i32
  }
  func.func @transform_4(%arg0: i32) -> (i32, i32, i32) {
    %c0_i32 = arith.constant 0 : i32
    %c0_i32_0 = arith.constant 0 : i32
    %c0_i32_1 = arith.constant 0 : i32
    %c0_i32_2 = arith.constant 0 : i32
    return %c0_i32, %c0_i32_0, %c0_i32_1 : i32, i32, i32
  }
  func.func @transform_5(%arg0: i32) -> (i32, i32) {
    %c0_i32 = arith.constant 0 : i32
    %c0_i32_0 = arith.constant 0 : i32
    %c0_i32_1 = arith.constant 0 : i32
    return %c0_i32, %c0_i32_0 : i32, i32
  }
  func.func @transform_6(%arg0: i32) -> (i32, i32, i32) {
    %c0_i32 = arith.constant 0 : i32
    %c0_i32_0 = arith.constant 0 : i32
    %c0_i32_1 = arith.constant 0 : i32
    %c0_i32_2 = arith.constant 0 : i32
    return %c0_i32, %c0_i32_0, %c0_i32_1 : i32, i32, i32
  }
  func.func @transform_7(%arg0: i32) -> (i32, i32) {
    %c0_i32 = arith.constant 0 : i32
    %c0_i32_0 = arith.constant 0 : i32
    %c0_i32_1 = arith.constant 0 : i32
    return %c0_i32, %c0_i32_0 : i32, i32
  }
  func.func @transform_8(%arg0: i32) -> (i32, i32, i32) {
    %c0_i32 = arith.constant 0 : i32
    %c0_i32_0 = arith.constant 0 : i32
    %c0_i32_1 = arith.constant 0 : i32
    return %arg0, %c0_i32, %c0_i32_0 : i32, i32, i32
  }
}

</mosaic_0001>

<bundles_post_ra>
// kernel: eegnet_forward.1
= control target key start
LH: loop header
LB: loop body
LE: loop exit
PB: predicated region body
PF: predicated region fallthrough
CT: control target
= control target key end

     0   :  { %13 = vsyncpa [#allocation6], 0  ;;  %s7985_s0 = inlined_call_operand.vmem [shape: f32[2,72,384], index: 0, kind: input, shape index: {}]   ;;  %s7986_s1 = inlined_call_operand.vmem [shape: f32[64,72], index: 1, kind: input, shape index: {}]   ;;  %s7987_s2 = inlined_call_operand.vmem [shape: f32[64,1], index: 2, kind: input, shape index: {}]   ;;  %s7988_s3 = inlined_call_operand.vmem [shape: f32[384,128], index: 3, kind: input, shape index: {}]   ;;  %s7989_s4 = inlined_call_operand.vmem [shape: f32[13,64,64], index: 4, kind: input, shape index: {}]   ;;  %s7990_s5 = inlined_call_operand.vmem [shape: f32[64,1], index: 5, kind: input, shape index: {}]   ;;  %s7991_s6 = inlined_call_operand.vmem [shape: f32[2,64,128], index: 6, kind: input, shape index: {}]   ;;  %s7992_s7 = inlined_call_operand.vmem [shape: f32[1,2], index: 7, kind: input, shape index: {}]   ;;  %s7993_s8 = inlined_call_operand.hbm [shape: f32[2,1,2], index: 8, kind: output, shape index: {}]  }
   0x1   :  { %15 = vsyncpa [#allocation6 + $0x1], 0  ;;  %s5993_s27 = smov 0   ;;  %s5995_s28 = smov 0  }
   0x2   :  { %s5997_s29 = smov 0   ;;  %s5999_s30 = smov 0  }
   0x3 LB: > { %s6014_s9 = sadd.s32 4294967295, %s5931_s30   ;;  %s4516_s10 = sadd.s32 4294967294, %s5931_s30   ;;  %s5931_s30 = sphi %s5999_s30, %s8112_s30   ;;  %s5927_s29 = sphi %s5997_s29, %s8111_s29   ;;  %s5923_s28 = sphi %s5995_s28, %s8110_s28   ;;  %s5919_s27 = sphi %s5993_s27, %s8109_s27  }
   0x4   : > { %s6018_s11 = sadd.s32 1, %s5931_s30   ;;  %s201_s12 = sadd.s32 1, %s5927_s29 }
   0x5   : > { %s198_s13 = ssub.s32 %s5931_s30, %s6018_s11  ;;  %p211_p0 = scmp.ne.s32.totalorder %s5927_s29, %s5923_s28 }
   0x6   : > { %p199_p1 = scmp.eq.s32.totalorder %s198_s13, 0  ;;  %p212_p2 = scmp.eq.s32.totalorder %s6014_s9, 1 }
   0x7   : > { %p217_p3 = scmp.ne.s32.totalorder %s5923_s28, %s5919_s27  ;;  %p218_p4 = scmp.eq.s32.totalorder %s4516_s10, 1 }
   0x8   : > { %s6029_s14 = scalar_select %p199_p1, %s5927_s29, %s201_s12  }
   0x9   : > { %p6031_p5 = por %p212_p2, %p211_p0  ;;  %p6035_p6 = por %p218_p4, %p217_p3 }
   0xa   : > { %p4519_p7 = scmp.ge.s32.totalorder %s5931_s30, 1  ;;  %p265_p8 = scmp.lt.s32.totalorder %s5931_s30, 3 }
   0xc   : > { %p266_p9 = pnand %p4519_p7, %p265_p8 }
   0xe   : > { %269 = sbr.rel (%p266_p9) target bundleno = 1511 (0x5e7), region = 52 }
  0x13   : > { %p298_p10 = scmp.lt.s32.totalorder %s6014_s9, 1  ;;  %v6045_v0 = vld [vmem:[%s7986_s1] sm:$0xff]  ;;  %vm386_vm0 = vcmask 588800   ;;  %v8010_v1 = vmov 0.0   ;;  %v5934_v2 = vmov 0   ;;  %v339_v4 = vld [vmem:[%s7987_s2 + $0x8] sm:$0xff] }
  0x14   : > { %475 = vmatprep.mubr.f32.mxu0 %v8010_v1  ;;  %5096 = vmatprep.mubr.msk.f32.mxu1 %vm386_vm0, %v6045_v0  ;;  %v338_v3 = vld [vmem:[%s7987_s2] sm:$0xff]  ;;  %v340_v5 = vld [vmem:[%s7987_s2 + $0x10] sm:$0xff]  ;;  %v331_v33 = vld [vmem:[%s7986_s1 + $0x8] sm:$0xff]  ;;  %s5935_s20 = smov 126   ;;  %s5936_s21 = smov 127  }
  0x15   : > { %s299_s19 = scalar_select %p298_p10, %s6014_s9, 1  ;;  %5570 = vset.pattern.permute.xlu0 %v5934_v2  ;;  %5571 = vset.pattern.permute.xlu1 %v5934_v2  ;;  %v332_v34 = vld [vmem:[%s7986_s1 + $0x10] sm:$0xff]  ;;  %v342_v35 = vld [vmem:[%s7987_s2 + $0x20] sm:$0xff]  ;;  %v341_v36 = vld [vmem:[%s7987_s2 + $0x18] sm:$0xff] }
  0x16   : > { %348 = vperm.xlu0 %5570, %v338_v3   ;;  %358 = vperm.xlu1 %5571, %v340_v5   ;;  %v836_v37 = vld [vmem:[%s7988_s3 + $0xf8] sm:$0xff]  ;;  %v334_v40 = vld [vmem:[%s7986_s1 + $0x20] sm:$0xff]  ;;  %v344_v41 = vld [vmem:[%s7987_s2 + $0x30] sm:$0xff]  ;;  %s7996_s23 = smov 123   ;;  %s5939_s24 = smov 121  }
  0x17   : > { %s5516_s22 = smul.u32 216, %s299_s19  ;;  %v852_v38 = vld [vmem:[%s7988_s3 + $0x178] sm:$0xff]  ;;  %v343_v42 = vld [vmem:[%s7987_s2 + $0x28] sm:$0xff]  ;;  %v336_v45 = vld [vmem:[%s7986_s1 + $0x30] sm:$0xff]  ;;  %s5940_s25 = smov 124  }
  0x18   : > { %v333_v39 = vld [vmem:[%s7986_s1 + $0x18] sm:$0xff]  ;;  %v335_v44 = vld [vmem:[%s7986_s1 + $0x28] sm:$0xff]  ;;  %v835_v47 = vld [vmem:[%s7988_s3 + $0xf0] sm:$0xff]  ;;  %s5941_s26 = smov 122   ;;  %s8000_s10 = smov 120  }
  0x19   : > { %s6063_s13 = scalar_lea.vmem %s7985_s0, %s5516_s22  ;;  %v820_v43 = vld [vmem:[%s7988_s3 + $0x78] sm:$0xff]  ;;  %v851_v48 = vld [vmem:[%s7988_s3 + $0x170] sm:$0xff]  ;;  %v834_v51 = vld [vmem:[%s7988_s3 + $0xe8] sm:$0xff]  ;;  %s7998_s22 = smov 125  }
  0x1a   : > { %v328_v6 = vld [vmem:[%s6063_s13 + $0xc8] sm:$0xff]  ;;  %v329_v7 = vld [vmem:[%s6063_s13 + $0xd0] sm:$0xff]  ;;  %v327_v8 = vld [vmem:[%s6063_s13 + $0xc0] sm:$0xff]  ;;  %353 = vperm.xlu0 %5570, %v339_v4   ;;  %363 = vperm.xlu1 %5571, %v341_v36   ;;  %s7994_s12 = smov 118   ;;  %s8033_s18 = smov 123  }
  0x1b   : > { %425 = vmatprep.subr.mxu0 %v328_v6  ;;  %5078 = vmatprep.subr.mxu1 %v329_v7  ;;  %v325_v9 = vld [vmem:[%s6063_s13 + $0xb0] sm:$0xff]  ;;  %v326_v10 = vld [vmem:[%s6063_s13 + $0xb8] sm:$0xff]  ;;  %v324_v11 = vld [vmem:[%s6063_s13 + $0xa8] sm:$0xff]  ;;  %s8035_s19 = smov 118   ;;  %s296_s17 = sand.u32 1, %s5923_s28  }
  0x1c   : > { %426 = vmatpush1.msra.mxu0 %v327_v8  ;;  %5079 = vmatpush3.msra.mxu1 %v329_v7  ;;  %v322_v12 = vld [vmem:[%s6063_s13 + $0x98] sm:$0xff]  ;;  %v323_v13 = vld [vmem:[%s6063_s13 + $0xa0] sm:$0xff]  ;;  %v321_v14 = vld [vmem:[%s6063_s13 + $0x90] sm:$0xff] }
  0x1d   : > { %427 = vmatprep.subr.mxu0 %v325_v9  ;;  %5080 = vmatprep.subr.mxu1 %v326_v10  ;;  %v319_v15 = vld [vmem:[%s6063_s13 + $0x80] sm:$0xff]  ;;  %v320_v16 = vld [vmem:[%s6063_s13 + $0x88] sm:$0xff]  ;;  %v318_v17 = vld [vmem:[%s6063_s13 + $0x78] sm:$0xff] }
  0x1e   : > { %428 = vmatpush1.msra.mxu0 %v324_v11  ;;  %5081 = vmatpush3.msra.mxu1 %v326_v10  ;;  %v316_v18 = vld [vmem:[%s6063_s13 + $0x68] sm:$0xff]  ;;  %v317_v19 = vld [vmem:[%s6063_s13 + $0x70] sm:$0xff]  ;;  %v315_v20 = vld [vmem:[%s6063_s13 + $0x60] sm:$0xff] }
  0x1f   : > { %429 = vmatprep.subr.mxu0 %v322_v12  ;;  %5082 = vmatprep.subr.mxu1 %v323_v13  ;;  %v313_v21 = vld [vmem:[%s6063_s13 + $0x50] sm:$0xff]  ;;  %v314_v22 = vld [vmem:[%s6063_s13 + $0x58] sm:$0xff]  ;;  %v312_v23 = vld [vmem:[%s6063_s13 + $0x48] sm:$0xff] }
  0x20   : > { %430 = vmatpush1.msra.mxu0 %v321_v14  ;;  %5083 = vmatpush3.msra.mxu1 %v323_v13  ;;  %v310_v24 = vld [vmem:[%s6063_s13 + $0x38] sm:$0xff]  ;;  %v311_v25 = vld [vmem:[%s6063_s13 + $0x40] sm:$0xff]  ;;  %v309_v26 = vld [vmem:[%s6063_s13 + $0x30] sm:$0xff] }
  0x21   : > { %431 = vmatprep.subr.mxu0 %v319_v15  ;;  %5084 = vmatprep.subr.mxu1 %v320_v16  ;;  %v307_v27 = vld [vmem:[%s6063_s13 + $0x20] sm:$0xff]  ;;  %v308_v28 = vld [vmem:[%s6063_s13 + $0x28] sm:$0xff]  ;;  %v306_v29 = vld [vmem:[%s6063_s13 + $0x18] sm:$0xff] }
  0x22   : > { %432 = vmatpush1.msra.mxu0 %v318_v17  ;;  %5085 = vmatpush3.msra.mxu1 %v320_v16  ;;  %v304_v30 = vld [vmem:[%s6063_s13 + $0x8] sm:$0xff]  ;;  %v305_v31 = vld [vmem:[%s6063_s13 + $0x10] sm:$0xff]  ;;  %v303_v32 = vld [vmem:[%s6063_s13] sm:$0xff]  ;;  %s5944_s13 = smov 119  }
  0x23   : > { %433 = vmatprep.subr.mxu0 %v316_v18  ;;  %5086 = vmatprep.subr.mxu1 %v317_v19  ;;  %v345_v46 = vld [vmem:[%s7987_s2 + $0x38] sm:$0xff]  ;;  %v819_v49 = vld [vmem:[%s7988_s3 + $0x70] sm:$0xff]  ;;  %v850_v52 = vld [vmem:[%s7988_s3 + $0x168] sm:$0xff] }
  0x24   : > { %434 = vmatpush1.msra.mxu0 %v315_v20  ;;  %5087 = vmatpush3.msra.mxu1 %v317_v19  ;;  %v337_v50 = vld [vmem:[%s7986_s1 + $0x38] sm:$0xff]  ;;  %v818_v53 = vld [vmem:[%s7988_s3 + $0x68] sm:$0xff]  ;;  %v833_v54 = vld [vmem:[%s7988_s3 + $0xe0] sm:$0xff] }
  0x25   : > { %435 = vmatprep.subr.mxu0 %v313_v21  ;;  %5088 = vmatprep.subr.mxu1 %v314_v22  ;;  %v849_v55 = vld [vmem:[%s7988_s3 + $0x160] sm:$0xff]  ;;  %v832_v57 = vld [vmem:[%s7988_s3 + $0xd8] sm:$0xff]  ;;  %v831_v60 = vld [vmem:[%s7988_s3 + $0xd0] sm:$0xff] }
  0x26   : > { %436 = vmatpush1.msra.mxu0 %v312_v23  ;;  %5089 = vmatpush3.msra.mxu1 %v314_v22  ;;  %v817_v56 = vld [vmem:[%s7988_s3 + $0x60] sm:$0xff]  ;;  %v848_v58 = vld [vmem:[%s7988_s3 + $0x158] sm:$0xff]  ;;  %v847_v61 = vld [vmem:[%s7988_s3 + $0x150] sm:$0xff] }
  0x27   : > { %437 = vmatprep.subr.mxu0 %v310_v24  ;;  %5090 = vmatprep.subr.mxu1 %v311_v25  ;;  %v816_v59 = vld [vmem:[%s7988_s3 + $0x58] sm:$0xff]  ;;  %v815_v62 = vld [vmem:[%s7988_s3 + $0x50] sm:$0xff]  ;;  %v830_v63 = vld [vmem:[%s7988_s3 + $0xc8] sm:$0xff] }
  0x28   : > { %438 = vmatpush1.msra.mxu0 %v309_v26  ;;  %5091 = vmatpush3.msra.mxu1 %v311_v25  ;;  %v814_v2 = vld [vmem:[%s7988_s3 + $0x48] sm:$0xff]  ;;  %v829_v3 = vld [vmem:[%s7988_s3 + $0xc0] sm:$0xff]  ;;  %v828_v6 = vld [vmem:[%s7988_s3 + $0xb8] sm:$0xff] }
  0x29   : > { %439 = vmatprep.subr.mxu0 %v307_v27  ;;  %5092 = vmatprep.subr.mxu1 %v308_v28  ;;  %v845_v4 = vld [vmem:[%s7988_s3 + $0x140] sm:$0xff]  ;;  %v844_v7 = vld [vmem:[%s7988_s3 + $0x138] sm:$0xff]  ;;  %v827_v9 = vld [vmem:[%s7988_s3 + $0xb0] sm:$0xff] }
  0x2a   : > { %440 = vmatpush1.msra.mxu0 %v306_v29  ;;  %5093 = vmatpush3.msra.mxu1 %v308_v28  ;;  %v813_v5 = vld [vmem:[%s7988_s3 + $0x40] sm:$0xff]  ;;  %v812_v8 = vld [vmem:[%s7988_s3 + $0x38] sm:$0xff]  ;;  %v843_v10 = vld [vmem:[%s7988_s3 + $0x130] sm:$0xff] }
  0x2b   : > { %441 = vmatprep.subr.mxu0 %v304_v30  ;;  %5094 = vmatprep.subr.mxu1 %v305_v31  ;;  %v811_v11 = vld [vmem:[%s7988_s3 + $0x30] sm:$0xff]  ;;  %v826_v12 = vld [vmem:[%s7988_s3 + $0xa8] sm:$0xff]  ;;  %v825_v15 = vld [vmem:[%s7988_s3 + $0xa0] sm:$0xff] }
  0x2c   : > { %442 = vmatpush1.msra.mxu0 %v303_v32  ;;  %5095 = vmatpush3.msra.mxu1 %v305_v31  ;;  %v842_v13 = vld [vmem:[%s7988_s3 + $0x128] sm:$0xff]  ;;  %v841_v16 = vld [vmem:[%s7988_s3 + $0x120] sm:$0xff]  ;;  %v824_v18 = vld [vmem:[%s7988_s3 + $0x98] sm:$0xff] }
  0x2d   : > { %4521 = vmatmul.mubr.msk.f32.vlgmr.msra.gmra.mxu0 %vm386_vm0, %v6045_v0  ;;  %5097 = vmatmul.mubr.msk.f32.vlgmr.msra.gmra.mxu1 %vm386_vm0, %v331_v33  ;;  %v846_v0 = vld [vmem:[%s7988_s3 + $0x148] sm:$0xff]  ;;  %v809_v17 = vld [vmem:[%s7988_s3 + $0x20] sm:$0xff]  ;;  %v840_v19 = vld [vmem:[%s7988_s3 + $0x118] sm:$0xff] }
  0x2e   : > { %481 = vmatprep.mubr.f32.mxu0 %v8010_v1  ;;  %5099 = vmatprep.mubr.msk.f32.mxu1 %vm386_vm0, %v332_v34  ;;  %v810_v14 = vld [vmem:[%s7988_s3 + $0x28] sm:$0xff]  ;;  %v808_v20 = vld [vmem:[%s7988_s3 + $0x18] sm:$0xff]  ;;  %v823_v21 = vld [vmem:[%s7988_s3 + $0x90] sm:$0xff] }
  0x2f   : > { %368 = vperm.xlu0 %5570, %v342_v35   ;;  %4790 = vmatprep.subr.mxu0 %v836_v37  ;;  %v839_v22 = vld [vmem:[%s7988_s3 + $0x110] sm:$0xff]  ;;  %v822_v24 = vld [vmem:[%s7988_s3 + $0x88] sm:$0xff]  ;;  %v821_v27 = vld [vmem:[%s7988_s3 + $0x80] sm:$0xff] }
  0x30   : > { %5108 = vmatprep.subr.mxu1 %v852_v38  ;;  %373 = vperm.xlu1 %5571, %v343_v42   ;;  %v807_v23 = vld [vmem:[%s7988_s3 + $0x10] sm:$0xff]  ;;  %v838_v25 = vld [vmem:[%s7988_s3 + $0x108] sm:$0xff]  ;;  %v837_v28 = vld [vmem:[%s7988_s3 + $0x100] sm:$0xff] }
  0x31   : > { %4522 = vmatmul.mubr.msk.f32.gmra.mxu0 %vm386_vm0, %v331_v33  ;;  %5100 = vmatmul.mubr.msk.f32.gmra.mxu1 %vm386_vm0, %v333_v39  ;;  %v806_v26 = vld [vmem:[%s7988_s3 + $0x8] sm:$0xff]  ;;  %v805_v29 = vld [vmem:[%s7988_s3] sm:$0xff] }
  0x32   : > { %487 = vmatprep.mubr.f32.mxu0 %v8010_v1  ;;  %5102 = vmatprep.mubr.msk.f32.mxu1 %vm386_vm0, %v334_v40 }
  0x33   : > { %378 = vperm.xlu0 %5570, %v344_v41   ;;  %4791 = vmatpush3.msra.mxu0 %v820_v43 }
  0x34   : > { %5109 = vmatpush3.msra.mxu1 %v852_v38  ;;  %383 = vperm.xlu1 %5571, %v345_v46  }
  0x35   : > { %4523 = vmatmul.mubr.msk.f32.gmra.mxu0 %vm386_vm0, %v332_v34  ;;  %5103 = vmatmul.mubr.msk.f32.gmra.mxu1 %vm386_vm0, %v335_v44 }
  0x36   : > { %493 = vmatprep.mubr.f32.mxu0 %v8010_v1  ;;  %5105 = vmatprep.mubr.msk.f32.mxu1 %vm386_vm0, %v336_v45 }
  0x37   : > { %4792 = vmatprep.subr.mxu0 %v835_v47  ;;  %5110 = vmatprep.subr.mxu1 %v851_v48 }
  0x38   : > { %4793 = vmatpush3.msra.mxu0 %v819_v49  ;;  %5111 = vmatpush3.msra.mxu1 %v851_v48 }
  0x39   : > { %4524 = vmatmul.mubr.msk.f32.gmra.mxu0 %vm386_vm0, %v333_v39  ;;  %5106 = vmatmul.mubr.msk.f32.gmra.mxu1 %vm386_vm0, %v337_v50 }
  0x3a   : > { %499 = vmatprep.mubr.f32.mxu0 %v8010_v1  ;;  %4794 = vmatprep.subr.mxu0 %v834_v51 }
  0x3b   : > { %5112 = vmatprep.subr.mxu1 %v850_v52  ;;  %4795 = vmatpush3.msra.mxu0 %v818_v53 }
  0x3c   : > { %5113 = vmatpush3.msra.mxu1 %v850_v52  ;;  %4796 = vmatprep.subr.mxu0 %v833_v54 }
  0x3d   : > { %4525 = vmatmul.mubr.msk.f32.gmra.mxu0 %vm386_vm0, %v334_v40  ;;  %5114 = vmatprep.subr.mxu1 %v849_v55 }
  0x3e   : > { %505 = vmatprep.mubr.f32.mxu0 %v8010_v1  ;;  %5115 = vmatpush3.msra.mxu1 %v849_v55 }
  0x3f   : > { %4797 = vmatpush3.msra.mxu0 %v817_v56  ;;  %5116 = vmatprep.subr.mxu1 %v848_v58 }
  0x40   : > { %4798 = vmatprep.subr.mxu0 %v832_v57  ;;  %5117 = vmatpush3.msra.mxu1 %v848_v58 }
  0x41   : > { %4526 = vmatmul.mubr.msk.f32.gmra.mxu0 %vm386_vm0, %v335_v44  ;;  %5118 = vmatprep.subr.mxu1 %v847_v61 }
  0x42   : > { %511 = vmatprep.mubr.f32.mxu0 %v8010_v1  ;;  %4799 = vmatpush3.msra.mxu0 %v816_v59 }
  0x43   : > { %4800 = vmatprep.subr.mxu0 %v831_v60  ;;  %5119 = vmatpush3.msra.mxu1 %v847_v61 }
  0x44   : > { %4801 = vmatpush3.msra.mxu0 %v815_v62  ;;  %5120 = vmatprep.subr.mxu1 %v846_v0 }
  0x45   : > { %4527 = vmatmul.mubr.msk.f32.gmra.mxu0 %vm386_vm0, %v336_v45  ;;  %4802 = vmatprep.subr.mxu0 %v830_v63 }
  0x46   : > { %517 = vmatprep.mubr.f32.mxu0 %v8010_v1  ;;  %4803 = vmatpush3.msra.mxu0 %v814_v2 }
  0x47   : > { %5121 = vmatpush3.msra.mxu1 %v846_v0  ;;  %4804 = vmatprep.subr.mxu0 %v829_v3 }
  0x48   : > { %5122 = vmatprep.subr.mxu1 %v845_v4  ;;  %4805 = vmatpush3.msra.mxu0 %v813_v5 }
  0x49   : > { %4528 = vmatmul.mubr.msk.f32.gmra.mxu0 %vm386_vm0, %v337_v50  ;;  %5123 = vmatpush3.msra.mxu1 %v845_v4 }
  0x4a   : > { %4806 = vmatprep.subr.mxu0 %v828_v6  ;;  %5124 = vmatprep.subr.mxu1 %v844_v7 }
  0x4b   : > { %4807 = vmatpush3.msra.mxu0 %v812_v8  ;;  %5125 = vmatpush3.msra.mxu1 %v844_v7 }
  0x4c   : > { %4808 = vmatprep.subr.mxu0 %v827_v9  ;;  %5126 = vmatprep.subr.mxu1 %v843_v10 }
  0x4d   : > { %4809 = vmatpush3.msra.mxu0 %v811_v11  ;;  %5127 = vmatpush3.msra.mxu1 %v843_v10 }
  0x4e   : > { %4810 = vmatprep.subr.mxu0 %v826_v12  ;;  %5128 = vmatprep.subr.mxu1 %v842_v13 }
  0x4f   : > { %4811 = vmatpush3.msra.mxu0 %v810_v14  ;;  %5129 = vmatpush3.msra.mxu1 %v842_v13 }
  0x50   : > { %4812 = vmatprep.subr.mxu0 %v825_v15  ;;  %5130 = vmatprep.subr.mxu1 %v841_v16 }
  0x51   : > { %4813 = vmatpush3.msra.mxu0 %v809_v17  ;;  %5131 = vmatpush3.msra.mxu1 %v841_v16 }
  0x52   : > { %4814 = vmatprep.subr.mxu0 %v824_v18  ;;  %5132 = vmatprep.subr.mxu1 %v840_v19 }
  0x53   : > { %4815 = vmatpush3.msra.mxu0 %v808_v20  ;;  %5133 = vmatpush3.msra.mxu1 %v840_v19 }
  0x54   : > { %4816 = vmatprep.subr.mxu0 %v823_v21  ;;  %5134 = vmatprep.subr.mxu1 %v839_v22 }
  0x55   : > { %4817 = vmatpush3.msra.mxu0 %v807_v23  ;;  %5135 = vmatpush3.msra.mxu1 %v839_v22 }
  0x56   : > { %4818 = vmatprep.subr.mxu0 %v822_v24  ;;  %5136 = vmatprep.subr.mxu1 %v838_v25 }
  0x57   : > { %4819 = vmatpush3.msra.mxu0 %v806_v26  ;;  %5137 = vmatpush3.msra.mxu1 %v838_v25 }
  0x58   : > { %4820 = vmatprep.subr.mxu0 %v821_v27  ;;  %5138 = vmatprep.subr.mxu1 %v837_v28 }
  0x59   : > { %4821 = vmatpush3.msra.mxu0 %v805_v29  ;;  %5139 = vmatpush3.msra.mxu1 %v837_v28 }
  0x5a   : > { %5578 = vrot.lane.b32.xlu0 %v8010_v1, %s5935_s20  ;;  %5573 = vrot.lane.b32.xlu1 %v8010_v1, %s5936_s21 }
  0x5e   : > { %5583 = vrot.lane.b32.xlu0 %v8010_v1, %s5936_s21  ;;  %5613 = vrot.lane.b32.xlu1 %v8010_v1, %s7998_s22 }
  0x62   : > { %5588 = vrot.lane.b32.xlu0 %v8010_v1, %s5935_s20  ;;  %5653 = vrot.lane.b32.xlu1 %v8010_v1, %s7996_s23 }
  0x66   : > { %5593 = vrot.lane.b32.xlu0 %v8010_v1, %s5936_s21  ;;  %5693 = vrot.lane.b32.xlu1 %v8010_v1, %s5939_s24 }
  0x6a   : > { %5598 = vrot.lane.b32.xlu0 %v8010_v1, %s5935_s20  ;;  %5733 = vrot.lane.b32.xlu1 %v8010_v1, %s5944_s13 }
  0x6e   : > { %5603 = vrot.lane.b32.xlu0 %v8010_v1, %s5936_s21 }
  0x72   : > { %5608 = vrot.lane.b32.xlu0 %v8010_v1, %s5935_s20 }
  0x76   : > { %5618 = vrot.lane.b32.xlu0 %v8010_v1, %s5940_s25 }
  0x7a   : > { %5623 = vrot.lane.b32.xlu0 %v8010_v1, %s7998_s22 }
  0x7e   : > { %5628 = vrot.lane.b32.xlu0 %v8010_v1, %s5940_s25 }
  0x82   : > { %5633 = vrot.lane.b32.xlu0 %v8010_v1, %s7998_s22 }
  0x86   : > { %5638 = vrot.lane.b32.xlu0 %v8010_v1, %s5940_s25 }
  0x8a   : > { %5643 = vrot.lane.b32.xlu0 %v8010_v1, %s7998_s22 }
  0x8e   : > { %5648 = vrot.lane.b32.xlu0 %v8010_v1, %s5940_s25 }
  0x91   : > { %v349_v30 = vpop.permute.xlu0 %348  ;;  %v359_v31 = vpop.permute.xlu1 %358 }
  0x92   : > { %5658 = vrot.lane.b32.xlu0 %v8010_v1, %s5941_s26 }
  0x95   : > { %v354_v32 = vpop.permute.xlu0 %353  ;;  %v364_v37 = vpop.permute.xlu1 %363 }
  0x96   : > { %5663 = vrot.lane.b32.xlu0 %v8010_v1, %s7996_s23 }
  0x9a   : > { %5668 = vrot.lane.b32.xlu0 %v8010_v1, %s5941_s26 }
  0x9e   : > { %5673 = vrot.lane.b32.xlu0 %v8010_v1, %s7996_s23 }
  0xa2   : > { %5678 = vrot.lane.b32.xlu0 %v8010_v1, %s5941_s26 }
  0xa6   : > { %5683 = vrot.lane.b32.xlu0 %v8010_v1, %s7996_s23 }
  0xaa   : > { %v369_v52 = vpop.permute.xlu0 %368  ;;  %5688 = vrot.lane.b32.xlu0 %v8010_v1, %s5941_s26 }
  0xab   : > { %v6364_v56 = vpop.permute.xlu1 %373 }
  0xae   : > { %5698 = vrot.lane.b32.xlu0 %v8010_v1, %s8000_s10  ;;  %v6385_v9 = vpop.permute.xlu0 %378 }
  0xaf   : > { %v6381_v6 = vpop.permute.xlu1 %383 }
  0xb2   : > { %5703 = vrot.lane.b32.xlu0 %v8010_v1, %s5939_s24 }
  0xb6   : > { %5708 = vrot.lane.b32.xlu0 %v8010_v1, %s8000_s10 }
  0xba   : > { %5713 = vrot.lane.b32.xlu0 %v8010_v1, %s5939_s24 }
  0xbe   : > { %5718 = vrot.lane.b32.xlu0 %v8010_v1, %s8000_s10 }
  0xc2   : > { %5723 = vrot.lane.b32.xlu0 %v8010_v1, %s5939_s24 }
  0xc6   : > { %5728 = vrot.lane.b32.xlu0 %v8010_v1, %s8000_s10 }
  0xca   : > { %5738 = vrot.lane.b32.xlu0 %v8010_v1, %s7994_s12  ;;  %s8031_s12 = smov 125  }
  0xce   : > { %5743 = vrot.lane.b32.xlu0 %v8010_v1, %s5944_s13 }
  0xed   : > { %v477_v33 = vpop.f32.mrf.mxu0  ;;  %v5098_v34 = vpop.f32.mrf.mxu1 }
  0xee   : > { %v6341_v35 = vadd.f32 %v477_v33, %v349_v30  ;;  %v6343_v36 = vadd.f32 %v5098_v34, %v354_v32 }
  0xef   : > { %v479_v38 = vpop.f32.mrf.mxu0  ;;  %v590_v39 = vpop.f32.mrf.mxu1 }
  0xf0   : > { %v653_v40 = vmul.f32 1.442695, %v6341_v35  ;;  %v663_v41 = vmul.f32 1.442695, %v6343_v36  ;;  %v6347_v42 = vadd.f32 %v479_v38, %v349_v30  ;;  %v6349_v43 = vadd.f32 %v590_v39, %v349_v30 }
  0xf1   : > { %v483_v44 = vpop.f32.mrf.mxu0  ;;  %v5101_v45 = vpop.f32.mrf.mxu1  ;;  %vm629_vm1 = vcmp.gt.f32.partialorder %v6341_v35, 0.0  ;;  %vm634_vm2 = vcmp.gt.f32.partialorder %v6343_v36, 0.0 }
  0xf2   : > { %5807 = vpow2.f32 %v653_v40  ;;  %v6353_v46 = vadd.f32 %v483_v44, %v354_v32  ;;  %v655_v47 = vmul.f32 1.442695, %v6347_v42  ;;  %v657_v48 = vmul.f32 1.442695, %v6349_v43 }
  0xf3   : > { %5809 = vpow2.f32 %v663_v41  ;;  %v485_v49 = vpop.f32.mrf.mxu0  ;;  %v600_v50 = vpop.f32.mrf.mxu1  ;;  %v6357_v51 = vadd.f32 %v5101_v45, %v364_v37  ;;  %vm630_vm3 = vcmp.gt.f32.partialorder %v6347_v42, 0.0  ;;  %vm631_vm4 = vcmp.gt.f32.partialorder %v6349_v43, 0.0 }
  0xf4   : > { %v659_v53 = vmul.f32 1.442695, %v6353_v46  ;;  %v6360_v54 = vadd.f32 %v485_v49, %v354_v32  ;;  %v6362_v55 = vadd.f32 %v600_v50, %v359_v31  ;;  %5811 = vpow2.f32 %v655_v47 }
  0xf5   : > { %v489_v57 = vpop.f32.mrf.mxu0  ;;  %v5104_v58 = vpop.f32.mrf.mxu1  ;;  %5813 = vpow2.f32 %v657_v48  ;;  %v675_v2 = vmul.f32 1.442695, %v6357_v51  ;;  %vm632_vm5 = vcmp.gt.f32.partialorder %v6353_v46, 0.0  ;;  %vm640_vm7 = vcmp.gt.f32.partialorder %v6357_v51, 0.0 }
  0xf6   : > { %v661_v59 = vmul.f32 1.442695, %v6360_v54  ;;  %v669_v60 = vmul.f32 1.442695, %v6362_v55  ;;  %v6370_v61 = vadd.f32 %v489_v57, %v359_v31  ;;  %5815 = vpow2.f32 %v659_v53 }
  0xf7   : > { %v491_v62 = vpop.f32.mrf.mxu0  ;;  %v610_v63 = vpop.f32.mrf.mxu1  ;;  %v6373_v0 = vadd.f32 %v5104_v58, %v6364_v56  ;;  %vm633_vm6 = vcmp.gt.f32.partialorder %v6360_v54, 0.0  ;;  %vm637_vm8 = vcmp.gt.f32.partialorder %v6362_v55, 0.0 }
  0xf8   : > { %5817 = vpow2.f32 %v661_v59  ;;  %v665_v3 = vmul.f32 1.442695, %v6370_v61  ;;  %v6377_v4 = vadd.f32 %v491_v62, %v359_v31  ;;  %v6379_v5 = vadd.f32 %v610_v63, %v369_v52 }
  0xf9   : > { %5819 = vpow2.f32 %v669_v60  ;;  %v495_v7 = vpop.f32.mrf.mxu0  ;;  %v5107_v8 = vpop.f32.mrf.mxu1  ;;  %v687_v16 = vmul.f32 1.442695, %v6373_v0  ;;  %vm635_vm9 = vcmp.gt.f32.partialorder %v6370_v61, 0.0  ;;  %vm646_vm10 = vcmp.gt.f32.partialorder %v6373_v0, 0.0 }
  0xfa   : > { %5821 = vpow2.f32 %v665_v3  ;;  %v667_v10 = vmul.f32 1.442695, %v6377_v4  ;;  %v681_v11 = vmul.f32 1.442695, %v6379_v5  ;;  %v6389_v12 = vadd.f32 %v495_v7, %v364_v37 }
  0xfb   : > { %v497_v13 = vpop.f32.mrf.mxu0  ;;  %v620_v14 = vpop.f32.mrf.mxu1  ;;  %v6392_v15 = vadd.f32 %v5107_v8, %v6381_v6  ;;  %5823 = vpow2.f32 %v675_v2  ;;  %vm636_vm11 = vcmp.gt.f32.partialorder %v6377_v4, 0.0  ;;  %vm643_vm12 = vcmp.gt.f32.partialorder %v6379_v5, 0.0 }
  0xfc   : > { %5825 = vpow2.f32 %v667_v10  ;;  %v671_v17 = vmul.f32 1.442695, %v6389_v12  ;;  %v6396_v18 = vadd.f32 %v497_v13, %v364_v37  ;;  %v6399_v19 = vadd.f32 %v620_v14, %v6385_v9 }
  0xfd   : > { %5827 = vpow2.f32 %v681_v11  ;;  %v501_v20 = vpop.f32.mrf.mxu0  ;;  %v699_v26 = vmul.f32 1.442695, %v6392_v15  ;;  %vm638_vm13 = vcmp.gt.f32.partialorder %v6389_v12, 0.0  ;;  %vm652_vm15 = vcmp.gt.f32.partialorder %v6392_v15, 0.0 }
  0xfe   : > { %5829 = vpow2.f32 %v671_v17  ;;  %v673_v21 = vmul.f32 1.442695, %v6396_v18  ;;  %v693_v22 = vmul.f32 1.442695, %v6399_v19  ;;  %v6407_v23 = vadd.f32 %v501_v20, %v369_v52 }
  0xff   : > { %v5808_v24 = vpop.eup %5807  ;;  %v503_v25 = vpop.f32.mrf.mxu0  ;;  %5831 = vpow2.f32 %v687_v16  ;;  %vm639_vm14 = vcmp.gt.f32.partialorder %v6396_v18, 0.0  ;;  %vm649_vm0 = vcmp.gt.f32.partialorder %v6399_v19, 0.0 }
 0x100   : > { %v5810_v27 = vpop.eup %5809  ;;  %5833 = vpow2.f32 %v673_v21  ;;  %v677_v28 = vmul.f32 1.442695, %v6407_v23  ;;  %v6413_v29 = vadd.f32 %v503_v25, %v369_v52  ;;  %v4537_v30 = vadd.f32 -1.0, %v5808_v24 }
 0x101   : > { %5835 = vpow2.f32 %v693_v22  ;;  %v507_v31 = vpop.f32.mrf.mxu0  ;;  %v5812_v32 = vpop.eup %5811  ;;  %v4542_v38 = vadd.f32 -1.0, %v5810_v27 }
 0x102   : > { %5837 = vpow2.f32 %v677_v28  ;;  %v679_v33 = vmul.f32 1.442695, %v6413_v29  ;;  %v6422_v34 = vadd.f32 %v507_v31, %v6364_v56  ;;  %v5814_v37 = vpop.eup %5813  ;;  %v4538_v40 = vadd.f32 -1.0, %v5812_v32 }
 0x103   : > { %v509_v39 = vpop.f32.mrf.mxu0  ;;  %5839 = vpow2.f32 %v699_v26  ;;  %v5816_v41 = vpop.eup %5815  ;;  %v4539_v47 = vadd.f32 -1.0, %v5814_v37  ;;  %v725_v49 = vsel %vm629_vm1, %v6341_v35, %v4537_v30  ;;  %vm642_vm1 = vcmp.gt.f32.partialorder %v6413_v29, 0.0 }
 0x104   : > { %5841 = vpow2.f32 %v679_v33  ;;  %v683_v44 = vmul.f32 1.442695, %v6422_v34  ;;  %v6428_v45 = vadd.f32 %v509_v39, %v6364_v56  ;;  %v726_v52 = vsel %vm630_vm3, %v6347_v42, %v4538_v40 }
 0x105   : > { %v5818_v48 = vpop.eup %5817  ;;  %v513_v50 = vpop.f32.mrf.mxu0  ;;  %v4540_v53 = vadd.f32 -1.0, %v5816_v41  ;;  %917 = vmatprep.mubr.f32.mxu0 %v726_v52  ;;  %v727_v35 = vsel %vm631_vm4, %v6349_v43, %v4539_v47  ;;  %v730_v42 = vsel %vm634_vm2, %v6343_v36, %v4542_v38  ;;  %vm641_vm2 = vcmp.gt.f32.partialorder %v6407_v23, 0.0 }
 0x106   : > { %v5820_v56 = vpop.eup %5819  ;;  %5843 = vpow2.f32 %v683_v44  ;;  %v685_v57 = vmul.f32 1.442695, %v6428_v45  ;;  %v6442_v58 = vadd.f32 %v513_v50, %v6385_v9  ;;  %5140 = vmatprep.mubr.f32.mxu1 %v727_v35  ;;  %918 = vmatmul.mubr.f32.vlgmr.msra.gmra.mxu0 %v725_v49  ;;  %v4541_v62 = vadd.f32 -1.0, %v5818_v48 }
 0x107   : > { %v5822_v59 = vpop.eup %5821  ;;  %v515_v60 = vpop.f32.mrf.mxu0  ;;  %v4545_v63 = vadd.f32 -1.0, %v5820_v56  ;;  %5141 = vmatmul.mubr.f32.vlgmr.msra.gmra.mxu1 %v730_v42  ;;  %v728_v11 = vsel %vm632_vm5, %v6353_v46, %v4540_v53  ;;  %vm645_vm3 = vcmp.gt.f32.partialorder %v6428_v45, 0.0  ;;  %vm644_vm4 = vcmp.gt.f32.partialorder %v6422_v34, 0.0 }
 0x108   : > { %v5824_v2 = vpop.eup %5823  ;;  %5845 = vpow2.f32 %v685_v57  ;;  %v689_v3 = vmul.f32 1.442695, %v6442_v58  ;;  %v6453_v7 = vadd.f32 %v515_v60, %v6385_v9  ;;  %v4543_v43 = vadd.f32 -1.0, %v5822_v59 }
 0x109   : > { %v5826_v8 = vpop.eup %5825  ;;  %v519_v10 = vpop.f32.mrf.mxu0  ;;  %v729_v36 = vsel %vm633_vm6, %v6360_v54, %v4541_v62  ;;  %v733_v13 = vsel %vm637_vm8, %v6362_v55, %v4545_v63  ;;  %v4548_v14 = vadd.f32 -1.0, %v5824_v2  ;;  %vm647_vm6 = vcmp.gt.f32.partialorder %v6442_v58, 0.0 }
 0x10a   : > { %v5828_v9 = vpop.eup %5827  ;;  %5847 = vpow2.f32 %v689_v3  ;;  %v691_v16 = vmul.f32 1.442695, %v6453_v7  ;;  %922 = vmatprep.mubr.f32.mxu0 %v729_v36  ;;  %v6468_v17 = vadd.f32 %v519_v10, %v6381_v6  ;;  %5143 = vmatprep.mubr.f32.mxu1 %v733_v13  ;;  %v4544_v54 = vadd.f32 -1.0, %v5826_v8  ;;  %v6530_v2 = vpop.permute.xlu0 %5578  ;;  %v1079_v36 = vld [vmem:[%s7989_s4] sm:$0xff] }
 0x10b   : > { %v5830_v20 = vpop.eup %5829  ;;  %923 = vmatmul.mubr.f32.gmra.mxu0 %v728_v11  ;;  %v521_v46 = vpop.f32.mrf.mxu0  ;;  %v736_v55 = vsel %vm640_vm7, %v6357_v51, %v4548_v14  ;;  %v4551_v21 = vadd.f32 -1.0, %v5828_v9  ;;  %v731_v22 = vsel %vm635_vm9, %v6370_v61, %v4543_v43  ;;  %vm648_vm5 = vcmp.gt.f32.partialorder %v6453_v7, 0.0 }
 0x10c   : > { %v5832_v24 = vpop.eup %5831  ;;  %5849 = vpow2.f32 %v691_v16  ;;  %v6478_v25 = vadd.f32 %v521_v46, %v6381_v6  ;;  %5144 = vmatmul.mubr.f32.gmra.mxu1 %v736_v55  ;;  %v732_v26 = vsel %vm636_vm11, %v6377_v4, %v4544_v54  ;;  %v4546_v27 = vadd.f32 -1.0, %v5830_v20 }
 0x10d   : > { %v5834_v28 = vpop.eup %5833  ;;  %927 = vmatprep.mubr.f32.mxu0 %v732_v26  ;;  %v739_v51 = vsel %vm643_vm12, %v6379_v5, %v4551_v21  ;;  %v4554_v61 = vadd.f32 -1.0, %v5832_v24  ;;  %v695_v30 = vmul.f32 1.442695, %v6468_v17  ;;  %vm650_vm8 = vcmp.gt.f32.partialorder %v6468_v17, 0.0 }
 0x10e   : > { %v5836_v6 = vpop.eup %5835  ;;  %v697_v31 = vmul.f32 1.442695, %v6478_v25  ;;  %5146 = vmatprep.mubr.f32.mxu1 %v739_v51  ;;  %v4547_v4 = vadd.f32 -1.0, %v5834_v28  ;;  %v734_v39 = vsel %vm638_vm13, %v6389_v12, %v4546_v27  ;;  %vm651_vm7 = vcmp.gt.f32.partialorder %v6478_v25, 0.0  ;;  %v6532_v3 = vpop.permute.xlu0 %5583 }
 0x10f   : > { %v5838_v32 = vpop.eup %5837  ;;  %928 = vmatmul.mubr.f32.gmra.mxu0 %v731_v22  ;;  %v742_v33 = vsel %vm646_vm10, %v6373_v0, %v4554_v61  ;;  %v4557_v5 = vadd.f32 -1.0, %v5836_v6  ;;  %5851 = vpow2.f32 %v695_v30  ;;  %vm1095_vm9 = vcmask 523264  }
 0x110   : > { %v5840_v37 = vpop.eup %5839  ;;  %5853 = vpow2.f32 %v697_v31  ;;  %5147 = vmatmul.mubr.f32.gmra.mxu1 %v742_v33  ;;  %v735_v38 = vsel %vm639_vm14, %v6396_v18, %v4547_v4  ;;  %v4549_v47 = vadd.f32 -1.0, %v5838_v32  ;;  %vm1362_vm10 = vcmask 1039360  }
 0x111   : > { %v5842_v40 = vpop.eup %5841  ;;  %932 = vmatprep.mubr.f32.mxu0 %v735_v38  ;;  %v745_v0 = vsel %vm649_vm0, %v6399_v19, %v4557_v5  ;;  %v4560_v41 = vadd.f32 -1.0, %v5840_v37  ;;  %vm3306_vm11 = vcmask 973824   ;;  %vm1848_vm12 = vcmask 1022976  }
 0x112   : > { %5149 = vmatprep.mubr.f32.mxu1 %v745_v0  ;;  %v4550_v44 = vadd.f32 -1.0, %v5842_v40  ;;  %v737_v50 = vsel %vm641_vm2, %v6407_v23, %v4549_v47  ;;  %vm2334_vm13 = vcmask 1006592   ;;  %vm2820_vm14 = vcmask 990208  }
 0x113   : > { %v5844_v48 = vpop.eup %5843  ;;  %933 = vmatmul.mubr.f32.gmra.mxu0 %v734_v39  ;;  %v748_v18 = vsel %vm652_vm15, %v6392_v15, %v4560_v41  ;;  %vm1605_vm15 = vcmask 1031168   ;;  %vm3549_vm0 = vcmask 965632   ;;  %vm2577_vm2 = vcmask 998400  }
 0x114   : > { %v738_v12 = vsel %vm642_vm1, %v6413_v29, %v4550_v44  ;;  %v4552_v49 = vadd.f32 -1.0, %v5844_v48  ;;  %5150 = vmatmul.mubr.f32.gmra.mxu1 %v748_v18  ;;  %vm2091_vm1 = vcmask 1014784  }
 0x115   : > { %v5846_v19 = vpop.eup %5845  ;;  %937 = vmatprep.mubr.f32.mxu0 %v738_v12  ;;  %5168 = vmatprep.mubr.msk.f32.mxu1 %vm1095_vm9, %v1079_v36  ;;  %v1083_v36 = vld [vmem:[%s7989_s4 + $0x20] sm:$0xff] }
 0x116   : > { %v4553_v52 = vadd.f32 -1.0, %v5846_v19  ;;  %v740_v53 = vsel %vm644_vm4, %v6422_v34, %v4552_v49  ;;  %vm3063_vm4 = vcmask 982016  }
 0x117   : > { %v5848_v15 = vpop.eup %5847  ;;  %938 = vmatmul.mubr.f32.gmra.mxu0 %v737_v50 }
 0x118   : > { %v741_v29 = vsel %vm645_vm3, %v6428_v45, %v4553_v52  ;;  %v4555_v35 = vadd.f32 -1.0, %v5848_v15  ;;  %vm3792_vm3 = vcmask 957440  }
 0x119   : > { %v5850_v56 = vpop.eup %5849  ;;  %942 = vmatprep.mubr.f32.mxu0 %v741_v29 }
 0x11a   : > { %v4556_v57 = vadd.f32 -1.0, %v5850_v56  ;;  %v743_v34 = vsel %vm647_vm6, %v6442_v58, %v4555_v35  ;;  %v6534_v58 = vpop.permute.xlu0 %5588 }
 0x11b   : > { %943 = vmatmul.mubr.f32.gmra.mxu0 %v740_v53 }
 0x11c   : > { %v5852_v59 = vpop.eup %5851  ;;  %v744_v42 = vsel %vm648_vm5, %v6453_v7, %v4556_v57  ;;  %vm4035_vm5 = vcmask 949248  }
 0x11d   : > { %v5854_v60 = vpop.eup %5853  ;;  %947 = vmatprep.mubr.f32.mxu0 %v744_v42  ;;  %v4558_v23 = vadd.f32 -1.0, %v5852_v59 }
 0x11e   : > { %v4559_v45 = vadd.f32 -1.0, %v5854_v60  ;;  %v6536_v7 = vpop.permute.xlu0 %5593 }
 0x11f   : > { %948 = vmatmul.mubr.f32.gmra.mxu0 %v743_v34  ;;  %v746_v63 = vsel %vm650_vm8, %v6468_v17, %v4558_v23  ;;  %v1080_v34 = vld [vmem:[%s7989_s4 + $0x8] sm:$0xff] }
 0x120   : > { %v747_v62 = vsel %vm651_vm7, %v6478_v25, %v4559_v45 }
 0x121   : > { %952 = vmatprep.mubr.f32.mxu0 %v747_v62  ;;  %v1081_v62 = vld [vmem:[%s7989_s4 + $0x10] sm:$0xff] }
 0x122   : > { %v6538_v43 = vpop.permute.xlu0 %5598 }
 0x123   : > { %953 = vmatmul.mubr.f32.gmra.mxu0 %v746_v63  ;;  %v1082_v63 = vld [vmem:[%s7989_s4 + $0x18] sm:$0xff] }
 0x126   : > { %v6540_v8 = vpop.permute.xlu0 %5603 }
 0x12a   : > { %v6542_v10 = vpop.permute.xlu0 %5608 }
 0x12b   : > { %8022 = vst [vmem:[#allocation8_spill] sm:$0xff] %v6542_v10 }
 0x12e   : > { %v6548_v11 = vpop.permute.xlu0 %5618 }
 0x12f   : > { %8023 = vst [vmem:[#allocation9_spill] sm:$0xff] %v6548_v11 }
 0x132   : > { %v6550_v13 = vpop.permute.xlu0 %5623 }
 0x136   : > { %v6552_v14 = vpop.permute.xlu0 %5628 }
 0x137   : > { %8024 = vst [vmem:[#allocation10_spill] sm:$0xff] %v6552_v14 }
 0x13a   : > { %v6554_v17 = vpop.permute.xlu0 %5633 }
 0x13e   : > { %v6562_v24 = vpop.permute.xlu0 %5638 }
 0x13f   : > { %8025 = vst [vmem:[#allocation11_spill] sm:$0xff] %v6562_v24 }
 0x142   : > { %v6568_v28 = vpop.permute.xlu0 %5643 }
 0x146   : > { %v6580_v5 = vpop.permute.xlu0 %5648 }
 0x147   : > { %8026 = vst [vmem:[#allocation12_spill] sm:$0xff] %v6580_v5 }
 0x14a   : > { %v6588_v41 = vpop.permute.xlu0 %5658 }
 0x14b   : > { %8027 = vst [vmem:[#allocation13_spill] sm:$0xff] %v6588_v41 }
 0x14e   : > { %v6598_v50 = vpop.permute.xlu0 %5663 }
 0x152   : > { %v6613_v59 = vpop.permute.xlu0 %5668 }
 0x153   : > { %8028 = vst [vmem:[#allocation14_spill] sm:$0xff] %v6613_v59  ;;  %v4585_v59 = vld [vmem:[%s7989_s4 + $0x80] sm:$0xff] }
 0x156   : > { %v6631_v23 = vpop.permute.xlu0 %5673 }
 0x15a   : > { %v6648_v45 = vpop.permute.xlu0 %5678 }
 0x15b   : > { %8029 = vst [vmem:[#allocation15_spill] sm:$0xff] %v6648_v45 }
 0x1c6   : > { %v4822_v9 = vpop.f32.mrf.mxu0 }
 0x1c7   : > { %v5142_v16 = vpop.f32.mrf.mxu1 }
 0x1c8   : > { %v4823_v54 = vpop.f32.mrf.mxu0 }
 0x1c9   : > { %v4824_v20 = vadd.f32 %v4823_v54, %v4822_v9  ;;  %v1024_v46 = vpop.f32.mrf.mxu1  ;;  %v6668_v9 = vpop.permute.xlu0 %5683  ;;  %v1085_v54 = vld [vmem:[%s7989_s4 + $0x30] sm:$0xff] }
 0x1cb   : > { %v4825_v55 = vpop.f32.mrf.mxu0  ;;  %v6556_v21 = vadd.f32 %v4824_v20, %v1024_v46  ;;  %v1086_v20 = vld [vmem:[%s7989_s4 + $0x38] sm:$0xff] }
 0x1cc   : > { %v5145_v61 = vpop.f32.mrf.mxu1 }
 0x1cd   : > { %v4826_v22 = vpop.f32.mrf.mxu0  ;;  %1573 = vrot.lane.b32.xlu1 %v6556_v21, %s5935_s20  ;;  %1330 = vrot.lane.b32.xlu0 %v6556_v21, %s5936_s21  ;;  %v6689_v46 = vpop.permute.xlu0 %5688 }
 0x1ce   : > { %v4827_v31 = vadd.f32 %v4826_v22, %v4825_v55  ;;  %v1034_v4 = vpop.f32.mrf.mxu1  ;;  %8030 = vst [vmem:[#allocation16_spill] sm:$0xff] %v6689_v46  ;;  %v1072_v46 = vld [vmem:[%s7990_s5 + $0x8] sm:$0xff] }
 0x1cf   : > { %v4828_v25 = vpop.f32.mrf.mxu0 }
 0x1d0   : > { %v6582_v38 = vadd.f32 %v5142_v16, %v4827_v31  ;;  %v5148_v39 = vpop.f32.mrf.mxu1  ;;  %v1084_v16 = vld [vmem:[%s7989_s4 + $0x28] sm:$0xff] }
 0x1d1   : > { %v4829_v26 = vpop.f32.mrf.mxu0  ;;  %2059 = vrot.lane.b32.xlu1 %v6556_v21, %s5940_s25  ;;  %1816 = vrot.lane.b32.xlu0 %v6556_v21, %s7998_s22  ;;  %v6698_v55 = vpop.permute.xlu0 %5698 }
 0x1d2   : > { %v4830_v30 = vadd.f32 %v4829_v26, %v4828_v25  ;;  %v1044_v44 = vpop.f32.mrf.mxu1  ;;  %8032 = vst [vmem:[#allocation17_spill] sm:$0xff] %v6698_v55 }
 0x1d3   : > { %v4831_v27 = vpop.f32.mrf.mxu0 }
 0x1d4   : > { %v6574_v33 = vadd.f32 %v4830_v30, %v1034_v4  ;;  %v5151_v48 = vpop.f32.mrf.mxu1 }
 0x1d5   : > { %v4832_v51 = vpop.f32.mrf.mxu0  ;;  %2545 = vrot.lane.b32.xlu1 %v6556_v21, %s5941_s26  ;;  %2302 = vrot.lane.b32.xlu0 %v6556_v21, %s7996_s23  ;;  %v6706_v22 = vpop.permute.xlu0 %5703 }
 0x1d6   : > { %v1054_v52 = vpop.f32.mrf.mxu1  ;;  %v4833_v57 = vadd.f32 %v4832_v51, %v4831_v27  ;;  %v6730_v27 = vpop.permute.xlu1 %5573 }
 0x1d7   : > { %v4834_v6 = vpop.f32.mrf.mxu0 }
 0x1d8   : > { %v6624_v60 = vadd.f32 %v5145_v61, %v4833_v57 }
 0x1d9   : > { %v4835_v32 = vpop.f32.mrf.mxu0  ;;  %3031 = vrot.lane.b32.xlu1 %v6556_v21, %s8000_s10  ;;  %2788 = vrot.lane.b32.xlu0 %v6556_v21, %s5939_s24  ;;  %v6714_v25 = vpop.permute.xlu0 %5708 }
 0x1da   : > { %v4836_v53 = vadd.f32 %v4835_v32, %v4834_v6  ;;  %8034 = vst [vmem:[#allocation18_spill] sm:$0xff] %v6714_v25  ;;  %v6740_v61 = vpop.permute.xlu1 %5613 }
 0x1db   : > { %v4837_v37 = vpop.f32.mrf.mxu0 }
 0x1dc   : > { %v6615_v42 = vadd.f32 %v4836_v53, %v1044_v44 }
 0x1dd   : > { %v4838_v40 = vpop.f32.mrf.mxu0  ;;  %1334 = vrot.lane.b32.xlu1 %v6582_v38, %s5936_s21  ;;  %1338 = vrot.lane.b32.xlu0 %v6574_v33, %s5936_s21  ;;  %v6722_v26 = vpop.permute.xlu0 %5713 }
 0x1de   : > { %v4839_v15 = vadd.f32 %v4838_v40, %v4837_v37  ;;  %v6750_v6 = vpop.permute.xlu1 %5653  ;;  %v4569_v40 = vld [vmem:[%s7989_s4 + $0x40] sm:$0xff] }
 0x1df   : > { %v4840_v0 = vpop.f32.mrf.mxu0  ;;  %5196 = vmatprep.mubr.msk.f32.mxu0 %vm1095_vm9, %v4569_v40 }
 0x1e0   : > { %v6610_v35 = vadd.f32 %v5148_v39, %v4839_v15 }
 0x1e1   : > { %v4841_v47 = vpop.f32.mrf.mxu0  ;;  %1577 = vrot.lane.b32.xlu1 %v6582_v38, %s5935_s20  ;;  %1824 = vrot.lane.b32.xlu0 %v6574_v33, %s7998_s22  ;;  %v6732_v51 = vpop.permute.xlu0 %5718 }
 0x1e2   : > { %v4842_v49 = vadd.f32 %v4841_v47, %v4840_v0  ;;  %8036 = vst [vmem:[#allocation19_spill] sm:$0xff] %v6732_v51  ;;  %v6760_v4 = vpop.permute.xlu1 %5693 }
 0x1e3   : > { %v4843_v18 = vpop.f32.mrf.mxu0 }
 0x1e4   : > { %v6602_v56 = vadd.f32 %v4842_v49, %v1054_v52 }
 0x1e5   : > { %v4844_v12 = vpop.f32.mrf.mxu0  ;;  %1820 = vrot.lane.b32.xlu1 %v6582_v38, %s7998_s22  ;;  %2310 = vrot.lane.b32.xlu0 %v6574_v33, %s7996_s23  ;;  %v6742_v30 = vpop.permute.xlu0 %5723 }
 0x1e6   : > { %v4845_v19 = vadd.f32 %v4844_v12, %v4843_v18  ;;  %v6770_v37 = vpop.permute.xlu1 %5733 }
 0x1e8   : > { %v6600_v29 = vadd.f32 %v5151_v48, %v4845_v19 }
 0x1e9   : > { %2063 = vrot.lane.b32.xlu1 %v6582_v38, %s5940_s25  ;;  %2796 = vrot.lane.b32.xlu0 %v6574_v33, %s5939_s24  ;;  %v6752_v31 = vpop.permute.xlu0 %5728 }
 0x1ea   : > { %5152 = vmatprep.subr.mxu1 %v6600_v29  ;;  %8037 = vst [vmem:[#allocation20_spill] sm:$0xff] %v6752_v31 }
 0x1eb   : > { %5153 = vmatpush3.msra.mxu1 %v6600_v29 }
 0x1ec   : > { %5154 = vmatprep.subr.mxu1 %v6602_v56 }
 0x1ed   : > { %5155 = vmatpush3.msra.mxu1 %v6602_v56  ;;  %2306 = vrot.lane.b32.xlu1 %v6582_v38, %s7996_s23  ;;  %v6762_v32 = vpop.permute.xlu0 %5738 }
 0x1ee   : > { %5156 = vmatprep.subr.mxu1 %v6610_v35  ;;  %1346 = vrot.lane.b32.xlu0 %v6615_v42, %s5936_s21  ;;  %8038 = vst [vmem:[#allocation21_spill] sm:$0xff] %v6762_v32 }
 0x1ef   : > { %5157 = vmatpush3.msra.mxu1 %v6610_v35 }
 0x1f0   : > { %5158 = vmatprep.subr.mxu1 %v6615_v42 }
 0x1f1   : > { %5159 = vmatpush3.msra.mxu1 %v6615_v42  ;;  %2549 = vrot.lane.b32.xlu1 %v6582_v38, %s5941_s26  ;;  %v6772_v39 = vpop.permute.xlu0 %5743 }
 0x1f2   : > { %5160 = vmatprep.subr.mxu1 %v6624_v60  ;;  %1832 = vrot.lane.b32.xlu0 %v6615_v42, %s7998_s22  ;;  %s4449_s22 = scalar_lea.sflag [#allocation6], %s296_s17 }
 0x1f3   : > { %5161 = vmatpush3.msra.mxu1 %v6624_v60 }
 0x1f4   : > { %5162 = vmatprep.subr.mxu1 %v6574_v33 }
 0x1f5   : > { %5163 = vmatpush3.msra.mxu1 %v6574_v33  ;;  %2792 = vrot.lane.b32.xlu1 %v6582_v38, %s5939_s24 }
 0x1f6   : > { %5164 = vmatprep.subr.mxu1 %v6582_v38  ;;  %2318 = vrot.lane.b32.xlu0 %v6615_v42, %s7996_s23  ;;  %s5945_s23 = smov 117  }
 0x1f7   : > { %5165 = vmatpush3.msra.mxu1 %v6582_v38 }
 0x1f8   : > { %5166 = vmatprep.subr.mxu1 %v6556_v21 }
 0x1f9   : > { %5167 = vmatpush3.msra.mxu1 %v6556_v21  ;;  %3035 = vrot.lane.b32.xlu1 %v6582_v38, %s8000_s10 }
 0x1fa   : > { %5169 = vmatmul.mubr.msk.f32.vlgmr.msra.gmra.mxu1 %vm1095_vm9, %v1080_v34  ;;  %2804 = vrot.lane.b32.xlu0 %v6615_v42, %s5939_s24 }
 0x1fb   : > { %5171 = vmatprep.mubr.msk.f32.mxu1 %vm1095_vm9, %v1081_v62 }
 0x1fd   : > { %1581 = vrot.lane.b32.xlu1 %v6574_v33, %s5935_s20 }
 0x1fe   : > { %5172 = vmatmul.mubr.msk.f32.gmra.mxu1 %vm1095_vm9, %v1082_v63  ;;  %3290 = vrot.lane.b32.xlu0 %v6615_v42, %s5944_s13 }
 0x1ff   : > { %5174 = vmatprep.mubr.msk.f32.mxu1 %vm1095_vm9, %v1083_v36 }
 0x201   : > { %2067 = vrot.lane.b32.xlu1 %v6574_v33, %s5940_s25 }
 0x202   : > { %5175 = vmatmul.mubr.msk.f32.gmra.mxu1 %vm1095_vm9, %v1084_v16  ;;  %1354 = vrot.lane.b32.xlu0 %v6602_v56, %s5936_s21 }
 0x203   : > { %5177 = vmatprep.mubr.msk.f32.mxu1 %vm1095_vm9, %v1085_v54 }
 0x205   : > { %2553 = vrot.lane.b32.xlu1 %v6574_v33, %s5941_s26 }
 0x206   : > { %5178 = vmatmul.mubr.msk.f32.gmra.mxu1 %vm1095_vm9, %v1086_v20  ;;  %1840 = vrot.lane.b32.xlu0 %v6602_v56, %s8031_s12 }
 0x207   : > { %5224 = vmatprep.mubr.msk.f32.mxu1 %vm1095_vm9, %v4585_v59  ;;  %v1078_v59 = vld [vmem:[%s7990_s5 + $0x38] sm:$0xff] }
 0x209   : > { %3039 = vrot.lane.b32.xlu1 %v6574_v33, %s8000_s10 }
 0x20a   : > { %2326 = vrot.lane.b32.xlu0 %v6602_v56, %s8033_s18 }
 0x20d   : > { %1342 = vrot.lane.b32.xlu1 %v6624_v60, %s5936_s21 }
 0x20e   : > { %2812 = vrot.lane.b32.xlu0 %v6602_v56, %s5939_s24 }
 0x211   : > { %1585 = vrot.lane.b32.xlu1 %v6624_v60, %s5935_s20 }
 0x212   : > { %3298 = vrot.lane.b32.xlu0 %v6602_v56, %s5944_s13 }
 0x215   : > { %1828 = vrot.lane.b32.xlu1 %v6624_v60, %s8031_s12 }
 0x216   : > { %1358 = vrot.lane.b32.xlu0 %v6600_v29, %s5936_s21 }
 0x219   : > { %2071 = vrot.lane.b32.xlu1 %v6624_v60, %s5940_s25 }
 0x21a   : > { %5748 = vrot.lane.b32.xlu0 %v8010_v1, %s8035_s19 }
 0x21d   : > { %2314 = vrot.lane.b32.xlu1 %v6624_v60, %s8033_s18 }
 0x21e   : > { %5753 = vrot.lane.b32.xlu0 %v8010_v1, %s5944_s13 }
 0x221   : > { %2557 = vrot.lane.b32.xlu1 %v6624_v60, %s5941_s26 }
 0x222   : > { %3282 = vrot.lane.b32.xlu0 %v6574_v33, %s5944_s13 }
 0x225   : > { %2800 = vrot.lane.b32.xlu1 %v6624_v60, %s5939_s24 }
 0x226   : > { %1844 = vrot.lane.b32.xlu0 %v6600_v29, %s8031_s12 }
 0x229   : > { %3043 = vrot.lane.b32.xlu1 %v6624_v60, %s8000_s10 }
 0x22a   : > { %5758 = vrot.lane.b32.xlu0 %v8010_v1, %s8035_s19 }
 0x22d   : > { %1589 = vrot.lane.b32.xlu1 %v6615_v42, %s5935_s20 }
 0x22e   : > { %5763 = vrot.lane.b32.xlu0 %v8010_v1, %s5944_s13 }
 0x231   : > { %2075 = vrot.lane.b32.xlu1 %v6615_v42, %s5940_s25 }
 0x232   : > { %3274 = vrot.lane.b32.xlu0 %v6556_v21, %s5944_s13 }
 0x235   : > { %2561 = vrot.lane.b32.xlu1 %v6615_v42, %s5941_s26 }
 0x236   : > { %2330 = vrot.lane.b32.xlu0 %v6600_v29, %s8033_s18 }
 0x239   : > { %3047 = vrot.lane.b32.xlu1 %v6615_v42, %s8000_s10  ;;  %s5946_s10 = smov 116  }
 0x23a   : > { %5768 = vrot.lane.b32.xlu0 %v8010_v1, %s8035_s19 }
 0x23d   : > { %1350 = vrot.lane.b32.xlu1 %v6610_v35, %s5936_s21  ;;  %s8044_s21 = smov 120  }
 0x23e   : > { %3784 = vrot.lane.b32.xlu0 %v6602_v56, %s5945_s23 }
 0x23f   : > { %v6784_v0 = vpop.permute.xlu1 %1573  ;;  %v6786_v44 = vpop.permute.xlu0 %1330 }
 0x240   : > { %8039 = vst [vmem:[#allocation22_spill] sm:$0xff] %v6784_v0 }
 0x241   : > { %1593 = vrot.lane.b32.xlu1 %v6610_v35, %s5935_s20 }
 0x242   : > { %5778 = vrot.lane.b32.xlu0 %v8010_v1, %s5946_s10 }
 0x243   : > { %v6792_v47 = vpop.permute.xlu1 %2059  ;;  %v6794_v48 = vpop.permute.xlu0 %1816 }
 0x244   : > { %8040 = vst [vmem:[#allocation23_spill] sm:$0xff] %v6792_v47 }
 0x245   : > { %1836 = vrot.lane.b32.xlu1 %v6610_v35, %s8031_s12 }
 0x246   : > { %2816 = vrot.lane.b32.xlu0 %v6600_v29, %s5939_s24 }
 0x247   : > { %v6800_v18 = vpop.permute.xlu1 %2545  ;;  %v6802_v12 = vpop.permute.xlu0 %2302 }
 0x248   : > { %8041 = vst [vmem:[#allocation24_spill] sm:$0xff] %v6800_v18 }
 0x249   : > { %2079 = vrot.lane.b32.xlu1 %v6610_v35, %s5940_s25 }
 0x24a   : > { %5783 = vrot.lane.b32.xlu0 %v8010_v1, %s5945_s23 }
 0x24b   : > { %v6808_v49 = vpop.permute.xlu1 %3031  ;;  %v6810_v19 = vpop.permute.xlu0 %2788 }
 0x24c   : > { %8042 = vst [vmem:[#allocation25_spill] sm:$0xff] %v6808_v49 }
 0x24d   : > { %2322 = vrot.lane.b32.xlu1 %v6610_v35, %s8033_s18 }
 0x24e   : > { %3776 = vrot.lane.b32.xlu0 %v6615_v42, %s5945_s23 }
 0x24f   : > { %v6816_v52 = vpop.permute.xlu1 %1334  ;;  %v6818_v15 = vpop.permute.xlu0 %1338 }
 0x251   : > { %2565 = vrot.lane.b32.xlu1 %v6610_v35, %s5941_s26 }
 0x252   : > { %5788 = vrot.lane.b32.xlu0 %v8010_v1, %s5946_s10 }
 0x253   : > { %v6824_v53 = vpop.permute.xlu1 %1577  ;;  %v6826_v57 = vpop.permute.xlu0 %1824 }
 0x254   : > { %8043 = vst [vmem:[#allocation26_spill] sm:$0xff] %v6824_v53 }
 0x255   : > { %2808 = vrot.lane.b32.xlu1 %v6610_v35, %s5939_s24 }
 0x256   : > { %3302 = vrot.lane.b32.xlu0 %v6600_v29, %s5944_s13 }
 0x257   : > { %v6832_v34 = vpop.permute.xlu1 %1820  ;;  %v6834_v62 = vpop.permute.xlu0 %2310 }
 0x259   : > { %3051 = vrot.lane.b32.xlu1 %v6610_v35, %s8044_s21 }
 0x25a   : > { %5793 = vrot.lane.b32.xlu0 %v8010_v1, %s5945_s23 }
 0x25b   : > { %v6840_v63 = vpop.permute.xlu1 %2063  ;;  %v6842_v36 = vpop.permute.xlu0 %2796 }
 0x25c   : > { %8045 = vst [vmem:[#allocation27_spill] sm:$0xff] %v6840_v63 }
 0x25d   : > { %3294 = vrot.lane.b32.xlu1 %v6610_v35, %s5944_s13 }
 0x25e   : > { %3768 = vrot.lane.b32.xlu0 %v6574_v33, %s5945_s23 }
 0x25f   : > { %v6848_v16 = vpop.permute.xlu1 %2306 }
 0x260   : > { %v6850_v54 = vpop.permute.xlu0 %1346 }
 0x261   : > { %1597 = vrot.lane.b32.xlu1 %v6602_v56, %s5935_s20 }
 0x262   : > { %5798 = vrot.lane.b32.xlu0 %v8010_v1, %s5946_s10 }
 0x263   : > { %v6856_v20 = vpop.permute.xlu1 %2549 }
 0x264   : > { %8046 = vst [vmem:[#allocation28_spill] sm:$0xff] %v6856_v20  ;;  %v6858_v40 = vpop.permute.xlu0 %1832 }
 0x265   : > { %2083 = vrot.lane.b32.xlu1 %v6602_v56, %s5940_s25 }
 0x266   : > { %3788 = vrot.lane.b32.xlu0 %v6600_v29, %s5945_s23 }
 0x267   : > { %v6864_v49 = vpop.permute.xlu1 %2792 }
 0x268   : > { %v6866_v32 = vpop.permute.xlu0 %2318 }
 0x269   : > { %2569 = vrot.lane.b32.xlu1 %v6602_v56, %s5941_s26 }
 0x26a   : > { %5803 = vrot.lane.b32.xlu0 %v8010_v1, %s5945_s23 }
 0x26b   : > { %v6872_v31 = vpop.permute.xlu1 %3035 }
 0x26c   : > { %8047 = vst [vmem:[#allocation29_spill] sm:$0xff] %v6872_v31  ;;  %v6874_v51 = vpop.permute.xlu0 %2804 }
 0x26d   : > { %3055 = vrot.lane.b32.xlu1 %v6602_v56, %s8044_s21 }
 0x26e   : > { %3760 = vrot.lane.b32.xlu0 %v6556_v21, %s5945_s23 }
 0x26f   : > { %v6880_v25 = vpop.permute.xlu1 %1581 }
 0x270   : > { %8048 = vst [vmem:[#allocation30_spill] sm:$0xff] %v6880_v25  ;;  %v6882_v18 = vpop.permute.xlu0 %3290 }
 0x271   : > { %8049 = vst [vmem:[#allocation31_spill] sm:$0xff] %v6882_v18  ;;  %3541 = vrot.lane.b32.xlu1 %v6602_v56, %s8035_s19 }
 0x272   : > { %4009 = vrot.lane.b32.xlu0 %v8010_v1, %s5946_s10 }
 0x273   : > { %v6888_v20 = vpop.permute.xlu1 %2067 }
 0x274   : > { %8050 = vst [vmem:[#allocation32_spill] sm:$0xff] %v6888_v20  ;;  %v1355_v31 = vpop.permute.xlu0 %1354 }
 0x275   : > { %1601 = vrot.lane.b32.xlu1 %v6600_v29, %s5935_s20 }
 0x276   : > { %4005 = vrot.lane.b32.xlu0 %v8010_v1, %s5946_s10  ;;  %v1074_v1 = vld [vmem:[%s7990_s5 + $0x18] sm:$0xff] }
 0x277   : > { %v6894_v55 = vpop.permute.xlu1 %2553 }
 0x278   : > { %8051 = vst [vmem:[#allocation33_spill] sm:$0xff] %v6894_v55  ;;  %v6899_v45 = vpop.permute.xlu0 %1840 }
 0x279   : > { %3537 = vrot.lane.b32.xlu1 %v6610_v35, %s8035_s19 }
 0x27a   : > { %1232 = vperm.xlu0 %5570, %v1072_v46   ;;  %v1076_v46 = vld [vmem:[%s7990_s5 + $0x28] sm:$0xff] }
 0x27b   : > { %v6906_v47 = vpop.permute.xlu1 %3039 }
 0x27c   : > { %8052 = vst [vmem:[#allocation34_spill] sm:$0xff] %v6906_v47  ;;  %v6912_v55 = vpop.permute.xlu0 %2326 }
 0x27d   : > { %3286 = vrot.lane.b32.xlu1 %v6624_v60, %s5944_s13 }
 0x27e   : > { %1242 = vperm.xlu0 %5570, %v1074_v1   ;;  %v5575_v1 = vunpack.i.l.bf16 %v6730_v27 }
 0x27f   : > { %v6916_v63 = vpop.permute.xlu1 %1342 }
 0x280   : > { %v6921_v41 = vpop.permute.xlu0 %2812 }
 0x281   : > { %3533 = vrot.lane.b32.xlu1 %v6615_v42, %s8035_s19 }
 0x282   : > { %1252 = vperm.xlu0 %5570, %v1076_v46   ;;  %v5576_v46 = vunpack.i.h.bf16 %v6730_v27 }
 0x283   : > { %v6925_v47 = vpop.permute.xlu1 %1585 }
 0x284   : > { %v6930_v20 = vpop.permute.xlu0 %3298  ;;  %v1369_v11 = vsel %vm1362_vm10, %v1355_v31, %v5576_v46 }
 0x285   : > { %2087 = vrot.lane.b32.xlu1 %v6600_v29, %s5940_s25  ;;  %s4770_s25 = sshll.u32 %s6014_s9, 4 }
 0x286   : > { %1262 = vperm.xlu0 %5570, %v1078_v59   ;;  %s4459_s20 = scalar_lea.hbm %s7993_s8, %s4770_s25 }
 0x287   : > { %v6935_v5 = vpop.permute.xlu1 %1828 }
 0x288   : > { %v1359_v24 = vpop.permute.xlu0 %1358 }
 0x289   : > { %3529 = vrot.lane.b32.xlu1 %v6624_v60, %s8035_s19  ;;  %v1370_v14 = vsel %vm1362_vm10, %v1359_v24, %v5575_v1 }
 0x28a   : > { %5180 = vmatprep.subr.mxu0 %v1370_v14 }
 0x28b   : > { %5181 = vmatpush3.msra.mxu0 %v1370_v14  ;;  %v6941_v0 = vpop.permute.xlu1 %2071 }
 0x28c   : > { %8053 = vst [vmem:[#allocation35_spill] sm:$0xff] %v6941_v0  ;;  %5182 = vmatprep.subr.mxu0 %v1369_v11  ;;  %v6944_v59 = vpop.permute.xlu0 %5748 }
 0x28d   : > { %5183 = vmatpush3.msra.mxu0 %v1369_v11  ;;  %3278 = vrot.lane.b32.xlu1 %v6582_v38, %s5944_s13 }
 0x28f   : > { %v6948_v53 = vpop.permute.xlu1 %2314 }
 0x290   : > { %v6950_v27 = vpop.permute.xlu0 %5753 }
 0x291   : > { %8054 = vst [vmem:[#allocation36_spill] sm:$0xff] %v6950_v27  ;;  %v5756_v18 = vunpack.i.h.bf16 %v6950_v27  ;;  %3525 = vrot.lane.b32.xlu1 %v6574_v33, %s8035_s19  ;;  %v5586_v27 = vunpack.i.h.bf16 %v6532_v3 }
 0x293   : > { %v6955_v14 = vpop.permute.xlu1 %2557 }
 0x294   : > { %8055 = vst [vmem:[#allocation37_spill] sm:$0xff] %v6955_v14  ;;  %v3283_v24 = vpop.permute.xlu0 %3282  ;;  %v8058_v14 = vmov 0.0  }
 0x295   : > { %2573 = vrot.lane.b32.xlu1 %v6600_v29, %s5941_s26  ;;  %v6960_v11 = vsel %vm3306_vm11, %v3283_v24, %v5756_v18  ;;  %s297_s26 = scalar_lea.vmem [#allocation5], %s296_s17 }
 0x296   : > { %8056 = vst [vmem:[#allocation38_spill] sm:$0xff] %v6960_v11  ;;  %s4461_s13 = sshll.u32 %s297_s26, 4  ;;  %s4462_s13 = int_to_ptr.vmem [resolvable:$true] %s4461_s13 }
 0x297   : > { %v6962_v31 = vpop.permute.xlu1 %2800 }
 0x298   : > { %v1845_v0 = vpop.permute.xlu0 %1844 }
 0x299   : > { %3521 = vrot.lane.b32.xlu1 %v6582_v38, %s8035_s19 }
 0x29b   : > { %v6966_v1 = vpop.permute.xlu1 %3043 }
 0x29c   : > { %8057 = vst [vmem:[#allocation39_spill] sm:$0xff] %v6966_v1  ;;  %v6980_v24 = vpop.permute.xlu0 %5758 }
 0x29d   : > { %3517 = vrot.lane.b32.xlu1 %v6556_v21, %s8035_s19  ;;  %8061 = vst [vmem:[#allocation42_spill] sm:$0xff] %v6980_v24  ;;  %v5595_v24 = vunpack.i.l.bf16 %v6536_v7 }
 0x29f   : > { %v6970_v46 = vpop.permute.xlu1 %1589 }
 0x2a0   : > { %v6989_v11 = vpop.permute.xlu0 %5763 }
 0x2a1   : > { %5773 = vrot.lane.b32.xlu1 %v8058_v14, %s5945_s23  ;;  %v5585_v14 = vunpack.i.l.bf16 %v6532_v3  ;;  %v1366_v3 = vsel %vm1362_vm10, %v6916_v63, %v5595_v24  ;;  %v5616_v24 = vunpack.i.h.bf16 %v6740_v61 }
 0x2a3   : > { %v6974_v25 = vpop.permute.xlu1 %2075 }
 0x2a4   : > { %8059 = vst [vmem:[#allocation40_spill] sm:$0xff] %v6974_v25 }
 0x2a5   : > { %3059 = vrot.lane.b32.xlu1 %v6600_v29, %s8044_s21 }
 0x2a7   : > { %v6978_v18 = vpop.permute.xlu1 %2561 }
 0x2a8   : > { %8060 = vst [vmem:[#allocation41_spill] sm:$0xff] %v6978_v18  ;;  %v5596_v18 = vunpack.i.h.bf16 %v6536_v7  ;;  %v5606_v7 = vunpack.i.h.bf16 %v6540_v8 }
 0x2a9   : > { %3780 = vrot.lane.b32.xlu1 %v6610_v35, %s5945_s23 }
 0x2ab   : > { %v6984_v1 = vpop.permute.xlu1 %3047 }
 0x2ac   : > { %8062 = vst [vmem:[#allocation43_spill] sm:$0xff] %v6984_v1  ;;  %v1367_v1 = vsel %vm1362_vm10, %v6850_v54, %v5586_v27  ;;  %v1363_v27 = vsel %vm1362_vm10, %v6786_v44, %v5606_v7 }
 0x2ad   : > { %4027 = vrot.lane.b32.xlu1 %v6602_v56, %s5946_s10 }
 0x2af   : > { %v1351_v25 = vpop.permute.xlu1 %1350 }
 0x2b0   : > { %v1368_v10 = vsel %vm1362_vm10, %v1351_v25, %v5585_v14  ;;  %v7003_v25 = vpop.permute.xlu0 %3274  ;;  %v5625_v14 = vunpack.i.l.bf16 %v6550_v13 }
 0x2b1   : > { %4023 = vrot.lane.b32.xlu1 %v6610_v35, %s5946_s10  ;;  %5184 = vmatprep.subr.mxu0 %v1368_v10  ;;  %v1365_v35 = vsel %vm1362_vm10, %v6818_v15, %v5596_v18  ;;  %v4570_v15 = vld [vmem:[%s7989_s4 + $0x48] sm:$0xff] }
 0x2b2   : > { %5185 = vmatpush3.msra.mxu0 %v1368_v10  ;;  %v5605_v10 = vunpack.i.l.bf16 %v6540_v8 }
 0x2b3   : > { %v6998_v56 = vpop.permute.xlu1 %1593  ;;  %5186 = vmatprep.subr.mxu0 %v1367_v1 }
 0x2b4   : > { %5187 = vmatpush3.msra.mxu0 %v1367_v1  ;;  %v1364_v63 = vsel %vm1362_vm10, %v6816_v52, %v5605_v10  ;;  %v5615_v1 = vunpack.i.l.bf16 %v6740_v61  ;;  %v7021_v18 = vpop.permute.xlu0 %2330  ;;  %v4571_v52 = vld [vmem:[%s7989_s4 + $0x50] sm:$0xff]  ;;  %v1855_v10 = vsel %vm1848_vm12, %v6899_v45, %v5616_v24  ;;  %v4572_v61 = vld [vmem:[%s7989_s4 + $0x58] sm:$0xff]  ;;  %v5635_v45 = vunpack.i.l.bf16 %v6554_v17 }
 0x2b5   : > { %3545 = vrot.lane.b32.xlu1 %v6600_v29, %s8035_s19  ;;  %5188 = vmatprep.subr.mxu0 %v1366_v3 }
 0x2b6   : > { %5189 = vmatpush3.msra.mxu0 %v1366_v3  ;;  %v1856_v44 = vsel %vm1848_vm12, %v1845_v0, %v5615_v1  ;;  %v5626_v0 = vunpack.i.h.bf16 %v6550_v13  ;;  %v4574_v13 = vld [vmem:[%s7989_s4 + $0x68] sm:$0xff]  ;;  %v5646_v1 = vunpack.i.h.bf16 %v6568_v28 }
 0x2b7   : > { %v1837_v54 = vpop.permute.xlu1 %1836  ;;  %5190 = vmatprep.subr.mxu0 %v1365_v35 }
 0x2b8   : > { %5191 = vmatpush3.msra.mxu0 %v1365_v35  ;;  %v7046_v35 = vpop.permute.xlu0 %5768  ;;  %v1854_v7 = vsel %vm1848_vm12, %v1837_v54, %v5625_v14  ;;  %v5636_v54 = vunpack.i.h.bf16 %v6554_v17  ;;  %v1849_v14 = vsel %vm1848_vm12, %v6794_v48, %v5646_v1 }
 0x2b9   : > { %3772 = vrot.lane.b32.xlu1 %v6624_v60, %s5945_s23  ;;  %5192 = vmatprep.subr.mxu0 %v1364_v63 }
 0x2ba   : > { %5193 = vmatpush3.msra.mxu0 %v1364_v63  ;;  %v1851_v17 = vsel %vm1848_vm12, %v6826_v57, %v5636_v54  ;;  %v5655_v57 = vunpack.i.l.bf16 %v6750_v6 }
 0x2bb   : > { %v7023_v8 = vpop.permute.xlu1 %2079  ;;  %5194 = vmatprep.subr.mxu0 %v1363_v27 }
 0x2bc   : > { %5195 = vmatpush3.msra.mxu0 %v1363_v27  ;;  %v1853_v27 = vsel %vm1848_vm12, %v6858_v40, %v5626_v0  ;;  %v1852_v40 = vsel %vm1848_vm12, %v6935_v5, %v5635_v45  ;;  %v4601_v5 = vld [vmem:[%s7989_s4 + $0xc0] sm:$0xff]  ;;  %v2342_v48 = vsel %vm2334_vm13, %v7021_v18, %v5655_v57  ;;  %v5665_v0 = vunpack.i.l.bf16 %v6598_v50 }
 0x2bd   : > { %4019 = vrot.lane.b32.xlu1 %v6615_v42, %s5946_s10  ;;  %5197 = vmatmul.mubr.msk.f32.vlgmr.msra.gmra.mxu0 %vm1095_vm9, %v4570_v15  ;;  %v4573_v42 = vld [vmem:[%s7989_s4 + $0x60] sm:$0xff]  ;;  %v5645_v15 = vunpack.i.l.bf16 %v6568_v28  ;;  %v5666_v45 = vunpack.i.h.bf16 %v6598_v50 }
 0x2be   : > { %5236 = vmatprep.subr.mxu0 %v1856_v44  ;;  %5199 = vmatprep.mubr.msk.f32.mxu0 %vm1095_vm9, %v4571_v52  ;;  %v7072_v52 = vpop.permute.xlu0 %3784  ;;  %v4605_v18 = vld [vmem:[%s7989_s4 + $0xe0] sm:$0xff] }
 0x2bf   : > { %5237 = vmatpush3.msra.mxu0 %v1856_v44  ;;  %v7035_v3 = vpop.permute.xlu1 %2322  ;;  %v1850_v28 = vsel %vm1848_vm12, %v6832_v34, %v5645_v15  ;;  %v4603_v34 = vld [vmem:[%s7989_s4 + $0xd0] sm:$0xff]  ;;  %v2339_v50 = vsel %vm2334_vm13, %v6866_v32, %v5666_v45  ;;  %v1071_v15 = vld [vmem:[%s7990_s5] sm:$0xff]  ;;  %v5716_v45 = vunpack.i.h.bf16 %v6722_v26 }
 0x2c0   : > { %5238 = vmatprep.subr.mxu0 %v1855_v10 }
 0x2c1   : > { %5239 = vmatpush3.msra.mxu0 %v1855_v10  ;;  %4015 = vrot.lane.b32.xlu1 %v6624_v60, %s5946_s10  ;;  %v4575_v60 = vld [vmem:[%s7989_s4 + $0x70] sm:$0xff]  ;;  %v4602_v10 = vld [vmem:[%s7989_s4 + $0xc8] sm:$0xff] }
 0x2c2   : > { %5200 = vmatmul.mubr.msk.f32.gmra.mxu0 %vm1095_vm9, %v4572_v61  ;;  %5240 = vmatprep.subr.mxu0 %v1854_v7  ;;  %v5656_v61 = vunpack.i.h.bf16 %v6750_v6 }
 0x2c3   : > { %5241 = vmatpush3.msra.mxu0 %v1854_v7  ;;  %v7053_v63 = vpop.permute.xlu1 %2565  ;;  %5202 = vmatprep.mubr.msk.f32.mxu0 %vm1095_vm9, %v4573_v42  ;;  %v7103_v42 = vpop.permute.xlu0 %5778 }
 0x2c4   : > { %5242 = vmatprep.subr.mxu0 %v1853_v27  ;;  %v2341_v6 = vsel %vm2334_vm13, %v6912_v55, %v5656_v61  ;;  %v2340_v55 = vsel %vm2334_vm13, %v7035_v3, %v5665_v0  ;;  %v4607_v3 = vld [vmem:[%s7989_s4 + $0xf0] sm:$0xff]  ;;  %v5706_v61 = vunpack.i.h.bf16 %v6706_v22 }
 0x2c5   : > { %5243 = vmatpush3.msra.mxu0 %v1853_v27  ;;  %4031 = vrot.lane.b32.xlu1 %v6600_v29, %s5946_s10  ;;  %v4576_v29 = vld [vmem:[%s7989_s4 + $0x78] sm:$0xff]  ;;  %v5676_v27 = vunpack.i.h.bf16 %v6631_v23 }
 0x2c6   : > { %5203 = vmatmul.mubr.msk.f32.gmra.mxu0 %vm1095_vm9, %v4574_v13  ;;  %5244 = vmatprep.subr.mxu0 %v1852_v40  ;;  %v5675_v13 = vunpack.i.l.bf16 %v6631_v23  ;;  %v5685_v23 = vunpack.i.l.bf16 %v6668_v9 }
 0x2c7   : > { %5245 = vmatpush3.msra.mxu0 %v1852_v40  ;;  %v7074_v24 = vpop.permute.xlu1 %2808  ;;  %5205 = vmatprep.mubr.msk.f32.mxu0 %vm1095_vm9, %v4575_v60  ;;  %v2817_v60 = vpop.permute.xlu0 %2816  ;;  %v5686_v40 = vunpack.i.h.bf16 %v6668_v9 }
 0x2c8   : > { %5246 = vmatprep.subr.mxu0 %v1851_v17  ;;  %v2338_v32 = vsel %vm2334_vm13, %v6948_v53, %v5675_v13  ;;  %v4633_v53 = vld [vmem:[%s7989_s4 + $0x140] sm:$0xff]  ;;  %v2336_v9 = vsel %vm2334_vm13, %v6848_v16, %v5685_v23  ;;  %v4634_v16 = vld [vmem:[%s7989_s4 + $0x148] sm:$0xff]  ;;  %v2825_v13 = vsel %vm2820_vm14, %v6874_v51, %v5706_v61  ;;  %v2823_v23 = vsel %vm2820_vm14, %v6842_v36, %v5716_v45 }
 0x2c9   : > { %5247 = vmatpush3.msra.mxu0 %v1851_v17  ;;  %3764 = vrot.lane.b32.xlu1 %v6582_v38, %s5945_s23  ;;  %v2337_v17 = vsel %vm2334_vm13, %v6834_v62, %v5676_v27  ;;  %v1073_v62 = vld [vmem:[%s7990_s5 + $0x10] sm:$0xff]  ;;  %v2335_v57 = vsel %vm2334_vm13, %v6802_v12, %v5686_v40  ;;  %v1075_v12 = vld [vmem:[%s7990_s5 + $0x20] sm:$0xff]  ;;  %v5750_v40 = vunpack.i.l.bf16 %v6944_v59  ;;  %v5745_v61 = vunpack.i.l.bf16 %v6772_v39  ;;  %s5947_s23 = smov [#allocation5]  }
 0x2ca   : > { %5206 = vmatmul.mubr.msk.f32.gmra.mxu0 %vm1095_vm9, %v4576_v29  ;;  %5248 = vmatprep.subr.mxu0 %v1850_v28  ;;  %s5875_s9 = sshll.u32 %s5947_s23, 4  ;;  %s5876_s9 = int_to_ptr.vmem [resolvable:$false] %s5875_s9 }
 0x2cb   : > { %5249 = vmatpush3.msra.mxu0 %v1850_v28  ;;  %v7091_v44 = vpop.permute.xlu1 %3051  ;;  %5252 = vmatprep.mubr.msk.f32.mxu0 %vm1095_vm9, %v4601_v5  ;;  %v7162_v29 = vpop.permute.xlu0 %5783  ;;  %v5695_v5 = vunpack.i.l.bf16 %v6760_v4  ;;  %s5877_s24 = scalar_lea.vmem %s5876_s9, 32  ;;  %p5878_p0 = scmp.lt.s32.totalorder %s4462_s13, %s5876_s9 }
 0x2cc   : > { %5250 = vmatprep.subr.mxu0 %v1849_v14 }
 0x2cd   : > { %5251 = vmatpush3.msra.mxu0 %v1849_v14  ;;  %4011 = vrot.lane.b32.xlu1 %v6574_v33, %s5946_s10  ;;  %v4604_v33 = vld [vmem:[%s7989_s4 + $0xd8] sm:$0xff]  ;;  %v4635_v14 = vld [vmem:[%s7989_s4 + $0x150] sm:$0xff] }
 0x2ce   : > { %5292 = vmatprep.subr.mxu0 %v2342_v48  ;;  %5253 = vmatmul.mubr.msk.f32.vlgmr.msra.gmra.mxu0 %vm1095_vm9, %v4602_v10  ;;  %v5696_v10 = vunpack.i.h.bf16 %v6760_v4 }
 0x2cf   : > { %5293 = vmatpush3.msra.mxu0 %v2342_v48  ;;  %v7111_v7 = vpop.permute.xlu1 %3294  ;;  %5255 = vmatprep.mubr.msk.f32.mxu0 %vm1095_vm9, %v4603_v34  ;;  %v2828_v34 = vsel %vm2820_vm14, %v2817_v60, %v5695_v5  ;;  %v5705_v48 = vunpack.i.l.bf16 %v6706_v22  ;;  %v7190_v0 = vpop.permute.xlu0 %3776  ;;  %v4639_v60 = vld [vmem:[%s7989_s4 + $0x170] sm:$0xff] }
 0x2d0   : > { %5294 = vmatprep.subr.mxu0 %v2341_v6  ;;  %v2827_v4 = vsel %vm2820_vm14, %v6921_v41, %v5696_v10  ;;  %v1077_v41 = vld [vmem:[%s7990_s5 + $0x30] sm:$0xff] }
 0x2d1   : > { %5295 = vmatpush3.msra.mxu0 %v2341_v6  ;;  %4007 = vrot.lane.b32.xlu1 %v6582_v38, %s5946_s10  ;;  %v4606_v38 = vld [vmem:[%s7989_s4 + $0xe8] sm:$0xff]  ;;  %v2826_v22 = vsel %vm2820_vm14, %v7074_v24, %v5705_v48 }
 0x2d2   : > { %5296 = vmatprep.subr.mxu0 %v2340_v55  ;;  %5256 = vmatmul.mubr.msk.f32.gmra.mxu0 %vm1095_vm9, %v4604_v33  ;;  %v4636_v33 = vld [vmem:[%s7989_s4 + $0x158] sm:$0xff]  ;;  %v4638_v24 = vld [vmem:[%s7989_s4 + $0x168] sm:$0xff] }
 0x2d3   : > { %5297 = vmatpush3.msra.mxu0 %v2340_v55  ;;  %v7130_v54 = vpop.permute.xlu1 %1597  ;;  %5258 = vmatprep.mubr.msk.f32.mxu0 %vm1095_vm9, %v4605_v18  ;;  %v4637_v18 = vld [vmem:[%s7989_s4 + $0x160] sm:$0xff]  ;;  %v5715_v55 = vunpack.i.l.bf16 %v6722_v26  ;;  %v7223_v26 = vpop.permute.xlu0 %5788 }
 0x2d4   : > { %5298 = vmatprep.subr.mxu0 %v2339_v50 }
 0x2d5   : > { %5299 = vmatpush3.msra.mxu0 %v2339_v50  ;;  %4003 = vrot.lane.b32.xlu1 %v6556_v21, %s5946_s10  ;;  %v4608_v21 = vld [vmem:[%s7989_s4 + $0xf8] sm:$0xff]  ;;  %v5725_v50 = vunpack.i.l.bf16 %v6742_v30  ;;  %v2824_v51 = vsel %vm2820_vm14, %v6962_v31, %v5715_v55  ;;  %s5871_s10 = scalar_lea.vmem %s4462_s13, 16 }
 0x2d6   : > { %5300 = vmatprep.subr.mxu0 %v2338_v32  ;;  %5259 = vmatmul.mubr.msk.f32.gmra.mxu0 %vm1095_vm9, %v4606_v38  ;;  %v5580_v38 = vunpack.i.l.bf16 %v6530_v2  ;;  %v8067_v55 = vld [vmem:[#allocation26_spill] sm:$0xff]  ;;  %p5872_p11 = scmp.ne.s32.totalorder %s4462_s13, %s5871_s10  ;;  %p5879_p1 = scmp.lt.s32.totalorder %s5877_s24, %s5871_s10 }
 0x2d7   : > { %5301 = vmatpush3.msra.mxu0 %v2338_v32  ;;  %v7151_v1 = vpop.permute.xlu1 %2083  ;;  %5261 = vmatprep.mubr.msk.f32.mxu0 %vm1095_vm9, %v4607_v3  ;;  %v5581_v32 = vunpack.i.h.bf16 %v6530_v2  ;;  %v2822_v36 = vsel %vm2820_vm14, %v6864_v49, %v5725_v50 }
 0x2d8   : > { %5302 = vmatprep.subr.mxu0 %v2337_v17  ;;  %p5873_p12 = pnand %p5872_p11, %p6031_p5  ;;  %p5880_p2 = por %p5879_p1, %p5878_p0 }
 0x2d9   : > { %5303 = vmatpush3.msra.mxu0 %v2337_v17  ;;  %1227 = vperm.xlu1 %5571, %v1071_v15   ;;  %v5726_v15 = vunpack.i.h.bf16 %v6742_v30  ;;  %v4640_v17 = vld [vmem:[%s7989_s4 + $0x178] sm:$0xff]  ;;  %v1612_v2 = vsel %vm1605_vm15, %v7130_v54, %v5581_v32  ;;  %v3303_v30 = vpop.permute.xlu0 %3302  ;;  %v4587_v32 = vld [vmem:[%s7989_s4 + $0x90] sm:$0xff] }
 0x2da   : > { %5304 = vmatprep.subr.mxu0 %v2336_v9  ;;  %5262 = vmatmul.mubr.msk.f32.gmra.mxu0 %vm1095_vm9, %v4608_v21  ;;  %v5590_v21 = vunpack.i.l.bf16 %v6534_v58  ;;  %p5874_p13 = pneg %p5873_p12 }
 0x2db   : > { %5305 = vmatpush3.msra.mxu0 %v2336_v9  ;;  %v7171_v28 = vpop.permute.xlu1 %2569  ;;  %5308 = vmatprep.mubr.msk.f32.mxu0 %vm1095_vm9, %v4633_v53  ;;  %v4665_v9 = vld [vmem:[%s7989_s4 + $0x1c0] sm:$0xff]  ;;  %v2821_v49 = vsel %vm2820_vm14, %v6810_v19, %v5726_v15  ;;  %vm4336_vm14 = vcmask 130112  }
 0x2dc   : > { %5306 = vmatprep.subr.mxu0 %v2335_v57  ;;  %v1611_v54 = vsel %vm1605_vm15, %v6998_v56, %v5590_v21  ;;  %v5736_v56 = vunpack.i.h.bf16 %v6770_v37  ;;  %v8071_v21 = vld [vmem:[#allocation10_spill] sm:$0xff]  ;;  %p5881_p3 = pnand %p5880_p2, %p5874_p13 }
 0x2dd   : > { %5307 = vmatpush3.msra.mxu0 %v2335_v57  ;;  %1237 = vperm.xlu1 %5571, %v1073_v62   ;;  %v5735_v62 = vunpack.i.l.bf16 %v6770_v37  ;;  %v5591_v57 = vunpack.i.h.bf16 %v6534_v58 }
 0x2de   : > { %5348 = vmatprep.subr.mxu0 %v2828_v34  ;;  %5309 = vmatmul.mubr.msk.f32.vlgmr.msra.gmra.mxu0 %vm1095_vm9, %v4634_v16  ;;  %v4666_v16 = vld [vmem:[%s7989_s4 + $0x1c8] sm:$0xff]  ;;  %v3313_v48 = vsel %vm3306_vm11, %v6930_v20, %v5736_v56  ;;  %v8065_v20 = vld [vmem:[#allocation30_spill] sm:$0xff] }
 0x2df   : > { %5349 = vmatpush3.msra.mxu0 %v2828_v34  ;;  %v7192_v6 = vpop.permute.xlu1 %3055  ;;  %5311 = vmatprep.mubr.msk.f32.mxu0 %vm1095_vm9, %v4635_v14  ;;  %v3314_v19 = vsel %vm3306_vm11, %v3303_v30, %v5735_v62  ;;  %v5600_v14 = vunpack.i.l.bf16 %v6538_v43  ;;  %v1610_v58 = vsel %vm1605_vm15, %v6970_v46, %v5591_v57  ;;  %v5601_v34 = vunpack.i.h.bf16 %v6538_v43  ;;  %v8064_v46 = vld [vmem:[#allocation36_spill] sm:$0xff] }
 0x2e0   : > { %5350 = vmatprep.subr.mxu0 %v2827_v4  ;;  %v5765_v30 = vunpack.i.l.bf16 %v6989_v11  ;;  %v4589_v62 = vld [vmem:[%s7989_s4 + $0xa0] sm:$0xff] }
 0x2e1   : > { %5351 = vmatpush3.msra.mxu0 %v2827_v4  ;;  %1247 = vperm.xlu1 %5571, %v1075_v12   ;;  %v5746_v12 = vunpack.i.h.bf16 %v6772_v39  ;;  %v1609_v37 = vsel %vm1605_vm15, %v6925_v47, %v5600_v14  ;;  %v8063_v4 = vld [vmem:[#allocation8_spill] sm:$0xff]  ;;  %v3312_v39 = vsel %vm3306_vm11, %v7111_v7, %v5745_v61  ;;  %v8066_v47 = vld [vmem:[#allocation31_spill] sm:$0xff] }
 0x2e2   : > { %5352 = vmatprep.subr.mxu0 %v2826_v22  ;;  %5312 = vmatmul.mubr.msk.f32.gmra.mxu0 %vm1095_vm9, %v4636_v33  ;;  %v5611_v33 = vunpack.i.h.bf16 %v8063_v4  ;;  %v5610_v43 = vunpack.i.l.bf16 %v8063_v4  ;;  %v8073_v14 = vld [vmem:[#allocation40_spill] sm:$0xff] }
 0x2e3   : > { %5353 = vmatpush3.msra.mxu0 %v2826_v22  ;;  %v7211_v27 = vpop.permute.xlu1 %3541  ;;  %5314 = vmatprep.mubr.msk.f32.mxu0 %vm1095_vm9, %v4637_v18  ;;  %v5755_v18 = vunpack.i.l.bf16 %v8064_v46  ;;  %v3311_v45 = vsel %vm3306_vm11, %v8066_v47, %v5746_v12  ;;  %v8075_v12 = vld [vmem:[#allocation35_spill] sm:$0xff]  ;;  %v8076_v46 = vld [vmem:[#allocation32_spill] sm:$0xff] }
 0x2e4   : > { %5354 = vmatprep.subr.mxu0 %v2825_v13  ;;  %v8078_v47 = vld [vmem:[#allocation27_spill] sm:$0xff] }
 0x2e5   : > { %5355 = vmatpush3.msra.mxu0 %v2825_v13  ;;  %1257 = vperm.xlu1 %5571, %v1077_v41   ;;  %v1608_v41 = vsel %vm1605_vm15, %v8065_v20, %v5601_v34  ;;  %v1607_v13 = vsel %vm1605_vm15, %v8067_v55, %v5610_v43  ;;  %v4617_v20 = vld [vmem:[%s7989_s4 + $0x100] sm:$0xff] }
 0x2e6   : > { %5356 = vmatprep.subr.mxu0 %v2824_v51  ;;  %5315 = vmatmul.mubr.msk.f32.gmra.mxu0 %vm1095_vm9, %v4638_v24  ;;  %v8068_v24 = vld [vmem:[#allocation9_spill] sm:$0xff]  ;;  %v4669_v55 = vld [vmem:[%s7989_s4 + $0x1e0] sm:$0xff] }
 0x2e7   : > { %5357 = vmatpush3.msra.mxu0 %v2824_v51  ;;  %v1602_v3 = vpop.permute.xlu1 %1601  ;;  %5317 = vmatprep.mubr.msk.f32.mxu0 %vm1095_vm9, %v4639_v60  ;;  %v5620_v60 = vunpack.i.l.bf16 %v8068_v24  ;;  %v8069_v51 = vld [vmem:[#allocation22_spill] sm:$0xff]  ;;  %v5621_v15 = vunpack.i.h.bf16 %v8068_v24  ;;  %v4670_v24 = vld [vmem:[%s7989_s4 + $0x1e8] sm:$0xff] }
 0x2e8   : > { %5358 = vmatprep.subr.mxu0 %v2823_v23  ;;  %v1613_v31 = vsel %vm1605_vm15, %v1602_v3, %v5580_v38  ;;  %v1606_v38 = vsel %vm1605_vm15, %v8069_v51, %v5611_v33  ;;  %v4586_v3 = vld [vmem:[%s7989_s4 + $0x88] sm:$0xff]  ;;  %vm4343_vm15 = vcmask 195712  }
 0x2e9   : > { %5359 = vmatpush3.msra.mxu0 %v2823_v23  ;;  %5208 = vmatprep.subr.mxu1 %v1613_v31 }
 0x2ea   : > { %5360 = vmatprep.subr.mxu0 %v2822_v36  ;;  %5209 = vmatpush3.msra.mxu1 %v1613_v31  ;;  %v4667_v31 = vld [vmem:[%s7989_s4 + $0x1d0] sm:$0xff] }
 0x2eb   : > { %5318 = vmatmul.mubr.msk.f32.gmra.mxu0 %vm1095_vm9, %v4640_v17  ;;  %v3538_v53 = vpop.permute.xlu1 %3537  ;;  %5210 = vmatprep.subr.mxu1 %v1612_v2 }
 0x2ec   : > { %5361 = vmatpush3.msra.mxu0 %v2822_v36  ;;  %5211 = vmatpush3.msra.mxu1 %v1612_v2  ;;  %v7254_v5 = vsel %vm3549_vm0, %v3538_v53, %v5750_v40  ;;  %v8070_v40 = vld [vmem:[#allocation38_spill] sm:$0xff]  ;;  %v5630_v2 = vunpack.i.l.bf16 %v8071_v21  ;;  %v2098_v53 = vsel %vm2091_vm1, %v7151_v1, %v5621_v15  ;;  %v5766_v1 = vunpack.i.h.bf16 %v6989_v11 }
 0x2ed   : > { %5362 = vmatprep.subr.mxu0 %v2821_v49  ;;  %5212 = vmatprep.subr.mxu1 %v1611_v54  ;;  %v4668_v36 = vld [vmem:[%s7989_s4 + $0x1d8] sm:$0xff] }
 0x2ee   : > { %5363 = vmatpush3.msra.mxu0 %v2821_v49  ;;  %5364 = vmatprep.mubr.msk.f32.mxu0 %vm1095_vm9, %v4665_v9  ;;  %v4588_v9 = vld [vmem:[%s7989_s4 + $0x98] sm:$0xff]  ;;  %v5631_v49 = vunpack.i.h.bf16 %v8071_v21  ;;  %v3307_v33 = vsel %vm3306_vm11, %v7003_v25, %v5766_v1 }
 0x2ef   : > { %5404 = vmatprep.subr.mxu0 %v3314_v19  ;;  %5213 = vmatpush3.msra.mxu1 %v1611_v54  ;;  %v3287_v10 = vpop.permute.xlu1 %3286  ;;  %v2097_v54 = vsel %vm2091_vm1, %v7023_v8, %v5630_v2  ;;  %v4590_v8 = vld [vmem:[%s7989_s4 + $0xa8] sm:$0xff]  ;;  %v4620_v2 = vld [vmem:[%s7989_s4 + $0x118] sm:$0xff] }
 0x2f0   : > { %5365 = vmatmul.mubr.msk.f32.vlgmr.msra.gmra.mxu0 %vm1095_vm9, %v4666_v16  ;;  %5214 = vmatprep.subr.mxu1 %v1610_v58  ;;  %v3310_v7 = vsel %vm3306_vm11, %v3287_v10, %v5755_v18  ;;  %v8072_v16 = vld [vmem:[#allocation11_spill] sm:$0xff]  ;;  %v2096_v56 = vsel %vm2091_vm1, %v8073_v14, %v5631_v49  ;;  %v4623_v14 = vld [vmem:[%s7989_s4 + $0x130] sm:$0xff] }
 0x2f1   : > { %5405 = vmatpush3.msra.mxu0 %v3314_v19  ;;  %5215 = vmatpush3.msra.mxu1 %v1610_v58  ;;  %v5640_v19 = vunpack.i.l.bf16 %v8072_v16  ;;  %v5641_v11 = vunpack.i.h.bf16 %v8072_v16  ;;  %v8074_v58 = vld [vmem:[#allocation12_spill] sm:$0xff]  ;;  %v8081_v1 = vld [vmem:[#allocation15_spill] sm:$0xff] }
 0x2f2   : > { %5406 = vmatprep.subr.mxu0 %v3313_v48  ;;  %5216 = vmatprep.subr.mxu1 %v1609_v37  ;;  %v5650_v34 = vunpack.i.l.bf16 %v8074_v58  ;;  %v5651_v43 = vunpack.i.h.bf16 %v8074_v58 }
 0x2f3   : > { %5407 = vmatpush3.msra.mxu0 %v3313_v48  ;;  %5217 = vmatpush3.msra.mxu1 %v1609_v37  ;;  %v7279_v22 = vpop.permute.xlu1 %3533  ;;  %v2095_v61 = vsel %vm2091_vm1, %v8075_v12, %v5640_v19  ;;  %v4591_v48 = vld [vmem:[%s7989_s4 + $0xb0] sm:$0xff]  ;;  %v7343_v37 = vpop.permute.xlu0 %5793  ;;  %v2094_v18 = vsel %vm2091_vm1, %v8076_v46, %v5641_v11  ;;  %v4622_v19 = vld [vmem:[%s7989_s4 + $0x128] sm:$0xff] }
 0x2f4   : > { %5408 = vmatprep.subr.mxu0 %v3312_v39  ;;  %5218 = vmatprep.subr.mxu1 %v1608_v41  ;;  %v8084_v11 = vld [vmem:[#allocation37_spill] sm:$0xff] }
 0x2f5   : > { %5409 = vmatpush3.msra.mxu0 %v3312_v39  ;;  %5219 = vmatpush3.msra.mxu1 %v1608_v41  ;;  %v4592_v39 = vld [vmem:[%s7989_s4 + $0xb8] sm:$0xff]  ;;  %v8077_v41 = vld [vmem:[#allocation13_spill] sm:$0xff] }
 0x2f6   : > { %5410 = vmatprep.subr.mxu0 %v3311_v45  ;;  %5220 = vmatprep.subr.mxu1 %v1607_v13  ;;  %v5660_v25 = vunpack.i.l.bf16 %v8077_v41 }
 0x2f7   : > { %5411 = vmatpush3.msra.mxu0 %v3311_v45  ;;  %5221 = vmatpush3.msra.mxu1 %v1607_v13  ;;  %v2088_v50 = vpop.permute.xlu1 %2087  ;;  %v2093_v45 = vsel %vm2091_vm1, %v8078_v47, %v5650_v34  ;;  %v4699_v34 = vld [vmem:[%s7989_s4 + $0x250] sm:$0xff] }
 0x2f8   : > { %5412 = vmatprep.subr.mxu0 %v3310_v7  ;;  %5222 = vmatprep.subr.mxu1 %v1606_v38  ;;  %v2099_v23 = vsel %vm2091_vm1, %v2088_v50, %v5620_v60  ;;  %v8079_v60 = vld [vmem:[#allocation23_spill] sm:$0xff]  ;;  %v4618_v50 = vld [vmem:[%s7989_s4 + $0x108] sm:$0xff] }
 0x2f9   : > { %5413 = vmatpush3.msra.mxu0 %v3310_v7  ;;  %5223 = vmatpush3.msra.mxu1 %v1606_v38  ;;  %v2092_v7 = vsel %vm2091_vm1, %v8079_v60, %v5651_v43  ;;  %v7377_v38 = vpop.permute.xlu0 %3768  ;;  %v8085_v43 = vld [vmem:[#allocation33_spill] sm:$0xff]  ;;  %v8088_v60 = vld [vmem:[#allocation24_spill] sm:$0xff]  ;;  %vm4357_vm1 = vcmask 326912  }
 0x2fa   : > { %5414 = vmatprep.subr.mxu0 %v8070_v40  ;;  %5225 = vmatmul.mubr.msk.f32.vlgmr.msra.gmra.mxu1 %vm1095_vm9, %v4586_v3  ;;  %v4619_v3 = vld [vmem:[%s7989_s4 + $0x110] sm:$0xff] }
 0x2fb   : > { %5415 = vmatpush3.msra.mxu0 %v8070_v40  ;;  %5264 = vmatprep.subr.mxu1 %v2099_v23  ;;  %v7305_v17 = vpop.permute.xlu1 %3529  ;;  %v4672_v40 = vld [vmem:[%s7989_s4 + $0x1f8] sm:$0xff] }
 0x2fc   : > { %5265 = vmatpush3.msra.mxu1 %v2099_v23  ;;  %5227 = vmatprep.mubr.msk.f32.mxu1 %vm1095_vm9, %v4587_v32  ;;  %v5661_v23 = vunpack.i.h.bf16 %v8077_v41  ;;  %v4671_v32 = vld [vmem:[%s7989_s4 + $0x1f0] sm:$0xff] }
 0x2fd   : > { %5266 = vmatprep.subr.mxu1 %v2098_v53  ;;  %5367 = vmatprep.mubr.msk.f32.mxu0 %vm1095_vm9, %v4667_v31  ;;  %v8080_v31 = vld [vmem:[#allocation14_spill] sm:$0xff] }
 0x2fe   : > { %5267 = vmatpush3.msra.mxu1 %v2098_v53  ;;  %5368 = vmatmul.mubr.msk.f32.gmra.mxu0 %vm1095_vm9, %v4668_v36  ;;  %v5670_v36 = vunpack.i.l.bf16 %v8080_v31  ;;  %v2584_v21 = vsel %vm2577_vm2, %v7171_v28, %v5661_v23  ;;  %v5671_v53 = vunpack.i.h.bf16 %v8080_v31  ;;  %v4697_v28 = vld [vmem:[%s7989_s4 + $0x240] sm:$0xff]  ;;  %v4651_v31 = vld [vmem:[%s7989_s4 + $0x190] sm:$0xff] }
 0x2ff   : > { %5228 = vmatmul.mubr.msk.f32.gmra.mxu1 %vm1095_vm9, %v4588_v9  ;;  %5268 = vmatprep.subr.mxu1 %v2097_v54  ;;  %v3279_v57 = vpop.permute.xlu1 %3278 }
 0x300   : > { %5269 = vmatpush3.msra.mxu1 %v2097_v54  ;;  %5230 = vmatprep.mubr.msk.f32.mxu1 %vm1095_vm9, %v4589_v62  ;;  %v3308_v10 = vsel %vm3306_vm11, %v3279_v57, %v5765_v30  ;;  %v4621_v30 = vld [vmem:[%s7989_s4 + $0x120] sm:$0xff]  ;;  %v2583_v9 = vsel %vm2577_vm2, %v7053_v63, %v5670_v36  ;;  %v7412_v62 = vpop.permute.xlu0 %5798  ;;  %v4698_v54 = vld [vmem:[%s7989_s4 + $0x248] sm:$0xff]  ;;  %v5680_v57 = vunpack.i.l.bf16 %v8081_v1  ;;  %v8089_v36 = vld [vmem:[#allocation18_spill] sm:$0xff] }
 0x301   : > { %5270 = vmatprep.subr.mxu1 %v2096_v56  ;;  %5416 = vmatprep.subr.mxu0 %v3308_v10  ;;  %v8082_v63 = vld [vmem:[#allocation41_spill] sm:$0xff] }
 0x302   : > { %5271 = vmatpush3.msra.mxu1 %v2096_v56  ;;  %5417 = vmatpush3.msra.mxu0 %v3308_v10  ;;  %v2582_v16 = vsel %vm2577_vm2, %v8082_v63, %v5671_v53  ;;  %v5681_v56 = vunpack.i.h.bf16 %v8081_v1  ;;  %v2581_v58 = vsel %vm2577_vm2, %v8084_v11, %v5680_v57  ;;  %v5786_v53 = vunpack.i.h.bf16 %v7162_v29  ;;  %v8091_v57 = vld [vmem:[#allocation19_spill] sm:$0xff] }
 0x303   : > { %5231 = vmatmul.mubr.msk.f32.gmra.mxu1 %vm1095_vm9, %v4590_v8  ;;  %5272 = vmatprep.subr.mxu1 %v2095_v61  ;;  %v7346_v4 = vpop.permute.xlu1 %3525  ;;  %v8083_v8 = vld [vmem:[#allocation16_spill] sm:$0xff]  ;;  %v5721_v63 = vunpack.i.h.bf16 %v8091_v57 }
 0x304   : > { %5273 = vmatpush3.msra.mxu1 %v2095_v61  ;;  %5418 = vmatprep.subr.mxu0 %v3307_v33  ;;  %v5690_v10 = vunpack.i.l.bf16 %v8083_v8  ;;  %v4700_v61 = vld [vmem:[%s7989_s4 + $0x258] sm:$0xff]  ;;  %v2580_v46 = vsel %vm2577_vm2, %v8085_v43, %v5681_v56  ;;  %v8092_v56 = vld [vmem:[#allocation20_spill] sm:$0xff] }
 0x305   : > { %5274 = vmatprep.subr.mxu1 %v2094_v18  ;;  %5233 = vmatprep.mubr.msk.f32.mxu1 %vm1095_vm9, %v4591_v48  ;;  %v5691_v48 = vunpack.i.h.bf16 %v8083_v8  ;;  %v5730_v8 = vunpack.i.l.bf16 %v8092_v56  ;;  %v4681_v43 = vld [vmem:[%s7989_s4 + $0x200] sm:$0xff] }
 0x306   : > { %5275 = vmatpush3.msra.mxu1 %v2094_v18  ;;  %5419 = vmatpush3.msra.mxu0 %v3307_v33  ;;  %v4624_v18 = vld [vmem:[%s7989_s4 + $0x138] sm:$0xff] }
 0x307   : > { %5234 = vmatmul.mubr.msk.f32.gmra.mxu1 %vm1095_vm9, %v4592_v39  ;;  %5276 = vmatprep.subr.mxu1 %v2093_v45  ;;  %v2574_v13 = vpop.permute.xlu1 %2573  ;;  %v3789_v39 = vpop.permute.xlu0 %3788 }
 0x308   : > { %5277 = vmatpush3.msra.mxu1 %v2093_v45  ;;  %5280 = vmatprep.mubr.msk.f32.mxu1 %vm1095_vm9, %v4617_v20  ;;  %v2585_v51 = vsel %vm2577_vm2, %v2574_v13, %v5660_v25  ;;  %v8086_v20 = vld [vmem:[#allocation17_spill] sm:$0xff]  ;;  %v8087_v25 = vld [vmem:[#allocation28_spill] sm:$0xff] }
 0x309   : > { %5278 = vmatprep.subr.mxu1 %v2092_v7  ;;  %5370 = vmatprep.mubr.msk.f32.mxu0 %vm1095_vm9, %v4669_v55  ;;  %v5700_v41 = vunpack.i.l.bf16 %v8086_v20  ;;  %v2579_v47 = vsel %vm2577_vm2, %v8087_v25, %v5690_v10  ;;  %v4649_v55 = vld [vmem:[%s7989_s4 + $0x180] sm:$0xff]  ;;  %v5701_v23 = vunpack.i.h.bf16 %v8086_v20  ;;  %v4703_v25 = vld [vmem:[%s7989_s4 + $0x270] sm:$0xff] }
 0x30a   : > { %5279 = vmatpush3.msra.mxu1 %v2092_v7  ;;  %5371 = vmatmul.mubr.msk.f32.gmra.mxu0 %vm1095_vm9, %v4670_v24  ;;  %v2578_v7 = vsel %vm2577_vm2, %v8088_v60, %v5691_v48  ;;  %v8093_v10 = vld [vmem:[#allocation39_spill] sm:$0xff]  ;;  %vm4364_vm2 = vcmask 392512  }
 0x30b   : > { %5281 = vmatmul.mubr.msk.f32.vlgmr.msra.gmra.mxu1 %vm1095_vm9, %v4618_v50  ;;  %5320 = vmatprep.subr.mxu1 %v2585_v51  ;;  %v7389_v15 = vpop.permute.xlu1 %3521  ;;  %v4650_v50 = vld [vmem:[%s7989_s4 + $0x188] sm:$0xff] }
 0x30c   : > { %5321 = vmatpush3.msra.mxu1 %v2585_v51  ;;  %5283 = vmatprep.mubr.msk.f32.mxu1 %vm1095_vm9, %v4619_v3  ;;  %v5785_v3 = vunpack.i.l.bf16 %v7162_v29  ;;  %v4653_v29 = vld [vmem:[%s7989_s4 + $0x1a0] sm:$0xff] }
 0x30d   : > { %5322 = vmatprep.subr.mxu1 %v2584_v21  ;;  %5373 = vmatprep.mubr.msk.f32.mxu0 %vm1095_vm9, %v4671_v32 }
 0x30e   : > { %5323 = vmatpush3.msra.mxu1 %v2584_v21  ;;  %5374 = vmatmul.mubr.msk.f32.gmra.mxu0 %vm1095_vm9, %v4672_v40  ;;  %v5710_v21 = vunpack.i.l.bf16 %v8089_v36 }
 0x30f   : > { %5284 = vmatmul.mubr.msk.f32.gmra.mxu1 %vm1095_vm9, %v4620_v2  ;;  %5324 = vmatprep.subr.mxu1 %v2583_v9  ;;  %v7415_v49 = vpop.permute.xlu1 %3517  ;;  %v3070_v2 = vsel %vm3063_vm4, %v7192_v6, %v5701_v23 }
 0x310   : > { %5325 = vmatpush3.msra.mxu1 %v2583_v9  ;;  %5286 = vmatprep.mubr.msk.f32.mxu1 %vm1095_vm9, %v4621_v30  ;;  %v4652_v30 = vld [vmem:[%s7989_s4 + $0x198] sm:$0xff]  ;;  %v5711_v9 = vunpack.i.h.bf16 %v8089_v36 }
 0x311   : > { %5326 = vmatprep.subr.mxu1 %v2582_v16  ;;  %5420 = vmatprep.mubr.msk.f32.mxu0 %vm1095_vm9, %v4697_v28  ;;  %v3069_v28 = vsel %vm3063_vm4, %v7091_v44, %v5710_v21  ;;  %v3797_v44 = vsel %vm3792_vm3, %v7190_v0, %v5786_v53  ;;  %v4701_v0 = vld [vmem:[%s7989_s4 + $0x260] sm:$0xff]  ;;  %v4687_v53 = vld [vmem:[%s7989_s4 + $0x230] sm:$0xff] }
 0x312   : > { %5327 = vmatpush3.msra.mxu1 %v2582_v16  ;;  %5421 = vmatmul.mubr.msk.f32.vlgmr.msra.gmra.mxu0 %vm1095_vm9, %v4698_v54  ;;  %v8090_v54 = vld [vmem:[#allocation43_spill] sm:$0xff]  ;;  %v5720_v16 = vunpack.i.l.bf16 %v8091_v57  ;;  %v5804_v57 = vpop.permute.xlu0 %5803 }
 0x313   : > { %5287 = vmatmul.mubr.msk.f32.gmra.mxu1 %vm1095_vm9, %v4622_v19  ;;  %5328 = vmatprep.subr.mxu1 %v2581_v58  ;;  %v5774_v12 = vpop.permute.xlu1 %5773  ;;  %v3068_v1 = vsel %vm3063_vm4, %v8090_v54, %v5711_v9  ;;  %v4654_v19 = vld [vmem:[%s7989_s4 + $0x1a8] sm:$0xff]  ;;  %v4729_v9 = vld [vmem:[%s7989_s4 + $0x2c0] sm:$0xff]  ;;  %v5771_v54 = vunpack.i.h.bf16 %v7046_v35 }
 0x314   : > { %5329 = vmatpush3.msra.mxu1 %v2581_v58  ;;  %v5775_v33 = vunpack.i.l.bf16 %v5774_v12  ;;  %5289 = vmatprep.mubr.msk.f32.mxu1 %vm1095_vm9, %v4623_v14  ;;  %v5776_v13 = vunpack.i.h.bf16 %v5774_v12  ;;  %v4655_v14 = vld [vmem:[%s7989_s4 + $0x1b0] sm:$0xff]  ;;  %v3067_v11 = vsel %vm3063_vm4, %v8093_v10, %v5720_v16  ;;  %v5731_v12 = vunpack.i.h.bf16 %v8092_v56 }
 0x315   : > { %5330 = vmatprep.subr.mxu1 %v2580_v46  ;;  %5423 = vmatprep.mubr.msk.f32.mxu0 %vm1095_vm9, %v4699_v34  ;;  %v4702_v34 = vld [vmem:[%s7989_s4 + $0x268] sm:$0xff]  ;;  %v5805_v16 = vunpack.i.l.bf16 %v5804_v57  ;;  %v5790_v56 = vunpack.i.l.bf16 %v7223_v26 }
 0x316   : > { %5331 = vmatpush3.msra.mxu1 %v2580_v46  ;;  %v3800_v45 = vsel %vm3792_vm3, %v3789_v39, %v5775_v33  ;;  %5424 = vmatmul.mubr.msk.f32.gmra.mxu0 %vm1095_vm9, %v4700_v61  ;;  %v3799_v32 = vsel %vm3792_vm3, %v7072_v52, %v5776_v13  ;;  %v8094_v61 = vld [vmem:[#allocation34_spill] sm:$0xff]  ;;  %v8095_v46 = vld [vmem:[#allocation21_spill] sm:$0xff] }
 0x317   : > { %5290 = vmatmul.mubr.msk.f32.gmra.mxu1 %vm1095_vm9, %v4624_v18  ;;  %5332 = vmatprep.subr.mxu1 %v2579_v47  ;;  %v3060_v24 = vpop.permute.xlu1 %3059  ;;  %v3066_v48 = vsel %vm3063_vm4, %v8094_v61, %v5721_v63  ;;  %v4656_v33 = vld [vmem:[%s7989_s4 + $0x1b8] sm:$0xff]  ;;  %v5740_v18 = vunpack.i.l.bf16 %v8095_v46  ;;  %v8096_v39 = vld [vmem:[#allocation29_spill] sm:$0xff] }
 0x318   : > { %5333 = vmatpush3.msra.mxu1 %v2579_v47  ;;  %5460 = vmatprep.subr.mxu0 %v3800_v45  ;;  %v3071_v51 = vsel %vm3063_vm4, %v3060_v24, %v5700_v41  ;;  %v3065_v20 = vsel %vm3063_vm4, %v8096_v39, %v5730_v8  ;;  %v5795_v47 = vunpack.i.l.bf16 %v7343_v37  ;;  %v4682_v24 = vld [vmem:[%s7989_s4 + $0x208] sm:$0xff] }
 0x319   : > { %5334 = vmatprep.subr.mxu1 %v2578_v7  ;;  %5336 = vmatprep.mubr.msk.f32.mxu1 %vm1095_vm9, %v4649_v55  ;;  %v8097_v55 = vld [vmem:[#allocation25_spill] sm:$0xff] }
 0x31a   : > { %5335 = vmatpush3.msra.mxu1 %v2578_v7  ;;  %5461 = vmatpush3.msra.mxu0 %v3800_v45  ;;  %v4704_v45 = vld [vmem:[%s7989_s4 + $0x278] sm:$0xff]  ;;  %v3064_v13 = vsel %vm3063_vm4, %v8097_v55, %v5731_v12  ;;  %v4683_v7 = vld [vmem:[%s7989_s4 + $0x210] sm:$0xff]  ;;  %vm4378_vm4 = vcmask 523712  }
 0x31b   : > { %5337 = vmatmul.mubr.msk.f32.vlgmr.msra.gmra.mxu1 %vm1095_vm9, %v4650_v50  ;;  %5376 = vmatprep.subr.mxu1 %v3071_v51  ;;  %v3781_v40 = vpop.permute.xlu1 %3780  ;;  %v5741_v50 = vunpack.i.h.bf16 %v8095_v46  ;;  %v4730_v46 = vld [vmem:[%s7989_s4 + $0x2c8] sm:$0xff] }
 0x31c   : > { %5462 = vmatprep.subr.mxu0 %v3799_v32  ;;  %5377 = vmatpush3.msra.mxu1 %v3071_v51  ;;  %v3798_v52 = vsel %vm3792_vm3, %v3781_v40, %v5785_v3  ;;  %v5796_v3 = vunpack.i.h.bf16 %v7343_v37  ;;  %v4684_v40 = vld [vmem:[%s7989_s4 + $0x218] sm:$0xff] }
 0x31d   : > { %5463 = vmatpush3.msra.mxu0 %v3799_v32  ;;  %5378 = vmatprep.subr.mxu1 %v3070_v2  ;;  %v3556_v32 = vsel %vm3549_vm0, %v7211_v27, %v5741_v50  ;;  %v8098_v37 = vld [vmem:[#allocation42_spill] sm:$0xff]  ;;  %v4685_v27 = vld [vmem:[%s7989_s4 + $0x220] sm:$0xff] }
 0x31e   : > { %5339 = vmatprep.mubr.msk.f32.mxu1 %vm1095_vm9, %v4651_v31  ;;  %5379 = vmatpush3.msra.mxu1 %v3070_v2  ;;  %v5751_v31 = vunpack.i.h.bf16 %v6944_v59  ;;  %v5760_v36 = vunpack.i.l.bf16 %v8098_v37  ;;  %v3795_v2 = vsel %vm3792_vm3, %v7377_v38, %v5796_v3  ;;  %v5770_v38 = vunpack.i.l.bf16 %v7046_v35  ;;  %v4714_v35 = vld [vmem:[%s7989_s4 + $0x288] sm:$0xff]  ;;  %v4745_v50 = vld [vmem:[%s7989_s4 + $0x300] sm:$0xff] }
 0x31f   : > { %5340 = vmatmul.mubr.msk.f32.gmra.mxu1 %vm1095_vm9, %v4652_v30  ;;  %5380 = vmatprep.subr.mxu1 %v3069_v28  ;;  %v7488_v6 = vpop.permute.xlu1 %4027  ;;  %v4686_v30 = vld [vmem:[%s7989_s4 + $0x228] sm:$0xff] }
 0x320   : > { %5464 = vmatprep.subr.mxu0 %v3798_v52  ;;  %5381 = vmatpush3.msra.mxu1 %v3069_v28  ;;  %v3554_v59 = vsel %vm3549_vm0, %v7279_v22, %v5751_v31  ;;  %v4746_v3 = vld [vmem:[%s7989_s4 + $0x308] sm:$0xff]  ;;  %v4748_v31 = vld [vmem:[%s7989_s4 + $0x318] sm:$0xff] }
 0x321   : > { %5465 = vmatpush3.msra.mxu0 %v3798_v52  ;;  %5382 = vmatprep.subr.mxu1 %v3068_v1  ;;  %v5761_v52 = vunpack.i.h.bf16 %v8098_v37  ;;  %v4749_v37 = vld [vmem:[%s7989_s4 + $0x320] sm:$0xff] }
 0x322   : > { %5466 = vmatprep.subr.mxu0 %v3797_v44  ;;  %5342 = vmatprep.mubr.msk.f32.mxu1 %vm1095_vm9, %v4653_v29  ;;  %v4688_v29 = vld [vmem:[%s7989_s4 + $0x238] sm:$0xff] }
 0x323   : > { %5383 = vmatpush3.msra.mxu1 %v3068_v1  ;;  %5467 = vmatpush3.msra.mxu0 %v3797_v44  ;;  %v7509_v58 = vpop.permute.xlu1 %4023  ;;  %v3552_v28 = vsel %vm3549_vm0, %v7346_v4, %v5761_v52  ;;  %v5780_v1 = vunpack.i.l.bf16 %v7103_v42  ;;  %v3551_v4 = vsel %vm3549_vm0, %v7389_v15, %v5770_v38  ;;  %v3550_v44 = vsel %vm3549_vm0, %v7415_v49, %v5771_v54  ;;  %v4715_v15 = vld [vmem:[%s7989_s4 + $0x290] sm:$0xff] }
 0x324   : > { %5343 = vmatmul.mubr.msk.f32.gmra.mxu1 %vm1095_vm9, %v4654_v19  ;;  %5384 = vmatprep.subr.mxu1 %v3067_v11  ;;  %v5806_v49 = vunpack.i.h.bf16 %v5804_v57  ;;  %v4041_v12 = vsel %vm4035_vm5, %v7509_v58, %v5790_v56  ;;  %v4718_v58 = vld [vmem:[%s7989_s4 + $0x2a8] sm:$0xff] }
 0x325   : > { %5385 = vmatpush3.msra.mxu1 %v3067_v11  ;;  %5345 = vmatprep.mubr.msk.f32.mxu1 %vm1095_vm9, %v4655_v14  ;;  %v5781_v14 = vunpack.i.h.bf16 %v7103_v42  ;;  %v3761_v11 = vpop.permute.xlu0 %3760  ;;  %v4716_v42 = vld [vmem:[%s7989_s4 + $0x298] sm:$0xff] }
 0x326   : > { %5386 = vmatprep.subr.mxu1 %v3066_v48  ;;  %5426 = vmatprep.mubr.msk.f32.mxu0 %vm1095_vm9, %v4701_v0 }
 0x327   : > { %5387 = vmatpush3.msra.mxu1 %v3066_v48  ;;  %v3546_v41 = vpop.permute.xlu1 %3545  ;;  %5427 = vmatmul.mubr.msk.f32.gmra.mxu0 %vm1095_vm9, %v4702_v34  ;;  %v4042_v0 = vsel %vm4035_vm5, %v7488_v6, %v5781_v14  ;;  %v5791_v34 = vunpack.i.h.bf16 %v7223_v26  ;;  %v4717_v6 = vld [vmem:[%s7989_s4 + $0x2a0] sm:$0xff]  ;;  %v5800_v48 = vunpack.i.l.bf16 %v7412_v62 }
 0x328   : > { %5346 = vmatmul.mubr.msk.f32.gmra.mxu1 %vm1095_vm9, %v4656_v33  ;;  %5388 = vmatprep.subr.mxu1 %v3065_v20  ;;  %v3557_v60 = vsel %vm3549_vm0, %v3546_v41, %v5740_v18  ;;  %v3793_v33 = vsel %vm3792_vm3, %v3761_v11, %v5806_v49  ;;  %v4719_v18 = vld [vmem:[%s7989_s4 + $0x2b0] sm:$0xff]  ;;  %v5801_v41 = vunpack.i.h.bf16 %v7412_v62  ;;  %v4720_v62 = vld [vmem:[%s7989_s4 + $0x2b8] sm:$0xff] }
 0x329   : > { %5389 = vmatpush3.msra.mxu1 %v3065_v20  ;;  %5392 = vmatprep.mubr.msk.f32.mxu1 %vm1095_vm9, %v4681_v43  ;;  %v4010_v43 = vpop.permute.xlu0 %4009  ;;  %v4731_v20 = vld [vmem:[%s7989_s4 + $0x2d0] sm:$0xff] }
 0x32a   : > { %5390 = vmatprep.subr.mxu1 %v3064_v13  ;;  %5429 = vmatprep.mubr.msk.f32.mxu0 %vm1095_vm9, %v4703_v25 }
 0x32b   : > { %5391 = vmatpush3.msra.mxu1 %v3064_v13  ;;  %v3773_v51 = vpop.permute.xlu1 %3772  ;;  %5430 = vmatmul.mubr.msk.f32.gmra.mxu0 %vm1095_vm9, %v4704_v45 }
 0x32c   : > { %5393 = vmatmul.mubr.msk.f32.vlgmr.msra.gmra.mxu1 %vm1095_vm9, %v4682_v24  ;;  %5432 = vmatprep.subr.mxu1 %v3557_v60  ;;  %v3796_v23 = vsel %vm3792_vm3, %v3773_v51, %v5795_v47  ;;  %v4732_v47 = vld [vmem:[%s7989_s4 + $0x2d8] sm:$0xff]  ;;  %v4734_v51 = vld [vmem:[%s7989_s4 + $0x2e8] sm:$0xff] }
 0x32d   : > { %5433 = vmatpush3.msra.mxu1 %v3557_v60  ;;  %5395 = vmatprep.mubr.msk.f32.mxu1 %vm1095_vm9, %v4683_v7  ;;  %v4006_v13 = vpop.permute.xlu0 %4005  ;;  %v4733_v60 = vld [vmem:[%s7989_s4 + $0x2e0] sm:$0xff] }
 0x32e   : > { %5434 = vmatprep.subr.mxu1 %v3556_v32  ;;  %5468 = vmatprep.subr.mxu0 %v3796_v23 }
 0x32f   : > { %5435 = vmatpush3.msra.mxu1 %v3556_v32  ;;  %5469 = vmatpush3.msra.mxu0 %v3796_v23  ;;  %v7565_v21 = vpop.permute.xlu1 %4019  ;;  %v4735_v23 = vld [vmem:[%s7989_s4 + $0x2f0] sm:$0xff] }
 0x330   : > { %5396 = vmatmul.mubr.msk.f32.gmra.mxu1 %vm1095_vm9, %v4684_v40  ;;  %5436 = vmatprep.subr.mxu1 %v7254_v5  ;;  %v4040_v26 = vsel %vm4035_vm5, %v7565_v21, %v5791_v34  ;;  %v4747_v32 = vld [vmem:[%s7989_s4 + $0x310] sm:$0xff]  ;;  %v4736_v40 = vld [vmem:[%s7989_s4 + $0x2f8] sm:$0xff] }
 0x331   : > { %5437 = vmatpush3.msra.mxu1 %v7254_v5  ;;  %5470 = vmatprep.subr.mxu0 %v3795_v2  ;;  %v3553_v5 = vsel %vm3549_vm0, %v7305_v17, %v5760_v36  ;;  %v4713_v17 = vld [vmem:[%s7989_s4 + $0x280] sm:$0xff]  ;;  %v4750_v36 = vld [vmem:[%s7989_s4 + $0x328] sm:$0xff]  ;;  %v4751_v21 = vld [vmem:[%s7989_s4 + $0x330] sm:$0xff]  ;;  %vm4350_vm0 = vcmask 261312  }
 0x332   : > { %5438 = vmatprep.subr.mxu1 %v3554_v59  ;;  %5398 = vmatprep.mubr.msk.f32.mxu1 %vm1095_vm9, %v4685_v27  ;;  %v4752_v27 = vld [vmem:[%s7989_s4 + $0x338] sm:$0xff] }
 0x333   : > { %5439 = vmatpush3.msra.mxu1 %v3554_v59  ;;  %5471 = vmatpush3.msra.mxu0 %v3795_v2  ;;  %v7588_v22 = vpop.permute.xlu1 %4015  ;;  %v7719_v2 = vpop.f32.mrf.mxu1 }
 0x334   : > { %5399 = vmatmul.mubr.msk.f32.gmra.mxu1 %vm1095_vm9, %v4686_v30  ;;  %5440 = vmatprep.subr.mxu1 %v3553_v5  ;;  %v4039_v25 = vsel %vm4035_vm5, %v7588_v22, %v5800_v48  ;;  %v7723_v30 = vpop.permute.xlu0 %1232 }
 0x335   : > { %5441 = vmatpush3.msra.mxu1 %v3553_v5  ;;  %5401 = vmatprep.mubr.msk.f32.mxu1 %vm1095_vm9, %v4687_v53  ;;  %v7721_v59 = vpop.f32.mrf.mxu1 }
 0x336   : > { %5442 = vmatprep.subr.mxu1 %v3552_v28  ;;  %5476 = vmatprep.mubr.msk.f32.mxu0 %vm1095_vm9, %v4729_v9 }
 0x337   : > { %5443 = vmatpush3.msra.mxu1 %v3552_v28  ;;  %v4032_v63 = vpop.permute.xlu1 %4031  ;;  %v5173_v53 = vpop.f32.mrf.mxu1 }
 0x338   : > { %5402 = vmatmul.mubr.msk.f32.gmra.mxu1 %vm1095_vm9, %v4688_v29  ;;  %5444 = vmatprep.subr.mxu1 %v3551_v4  ;;  %v4043_v19 = vsel %vm4035_vm5, %v4032_v63, %v5780_v1  ;;  %v1243_v38 = vpop.permute.xlu0 %1242 }
 0x339   : > { %5445 = vmatpush3.msra.mxu1 %v3551_v4  ;;  %5448 = vmatprep.mubr.msk.f32.mxu1 %vm1095_vm9, %v4713_v17  ;;  %v1196_v52 = vpop.f32.mrf.mxu1  ;;  %v1268_v29 = vadd.f32 %v5173_v53, %v1243_v38 }
 0x33a   : > { %5446 = vmatprep.subr.mxu1 %v3550_v44 }
 0x33b   : > { %5447 = vmatpush3.msra.mxu1 %v3550_v44  ;;  %v3765_v8 = vpop.permute.xlu1 %3764  ;;  %v5176_v5 = vpop.f32.mrf.mxu1 }
 0x33c   : > { %5449 = vmatmul.mubr.msk.f32.vlgmr.msra.gmra.mxu1 %vm1095_vm9, %v4714_v35  ;;  %5488 = vmatprep.subr.mxu1 %v4043_v19  ;;  %v3794_v10 = vsel %vm3792_vm3, %v3765_v8, %v5805_v16  ;;  %v1253_v28 = vpop.permute.xlu0 %1252  ;;  %vm4371_vm3 = vcmask 458112  }
 0x33d   : > { %5489 = vmatpush3.msra.mxu1 %v4043_v19  ;;  %5451 = vmatprep.mubr.msk.f32.mxu1 %vm1095_vm9, %v4715_v15  ;;  %v1206_v17 = vpop.f32.mrf.mxu1  ;;  %v1270_v4 = vadd.f32 %v5176_v5, %v1253_v28 }
 0x33e   : > { %5490 = vmatprep.subr.mxu1 %v4042_v0  ;;  %5472 = vmatprep.subr.mxu0 %v3794_v10 }
 0x33f   : > { %5491 = vmatpush3.msra.mxu1 %v4042_v0  ;;  %5473 = vmatpush3.msra.mxu0 %v3794_v10  ;;  %v4012_v61 = vpop.permute.xlu1 %4011  ;;  %v5179_v63 = vpop.f32.mrf.mxu1 }
 0x340   : > { %5452 = vmatmul.mubr.msk.f32.gmra.mxu1 %vm1095_vm9, %v4716_v42  ;;  %5492 = vmatprep.subr.mxu1 %v4041_v12  ;;  %v4038_v45 = vsel %vm4035_vm5, %v4012_v61, %v5801_v41  ;;  %v1263_v16 = vpop.permute.xlu0 %1262 }
 0x341   : > { %5493 = vmatpush3.msra.mxu1 %v4041_v12  ;;  %5474 = vmatprep.subr.mxu0 %v3793_v33  ;;  %v1272_v15 = vadd.f32 %v5179_v63, %v1263_v16 }
 0x342   : > { %5494 = vmatprep.subr.mxu1 %v4040_v26  ;;  %5454 = vmatprep.mubr.msk.f32.mxu1 %vm1095_vm9, %v4717_v6 }
 0x343   : > { %5475 = vmatpush3.msra.mxu0 %v3793_v33  ;;  %5495 = vmatpush3.msra.mxu1 %v4040_v26  ;;  %v4008_v39 = vpop.permute.xlu1 %4007 }
 0x344   : > { %5455 = vmatmul.mubr.msk.f32.gmra.mxu1 %vm1095_vm9, %v4718_v58  ;;  %5477 = vmatmul.mubr.msk.f32.vlgmr.msra.gmra.mxu0 %vm1095_vm9, %v4730_v46  ;;  %v4037_v55 = vsel %vm4035_vm5, %v4008_v39, %v4010_v43 }
 0x345   : > { %5496 = vmatprep.subr.mxu1 %v4039_v25  ;;  %5457 = vmatprep.mubr.msk.f32.mxu1 %vm1095_vm9, %v4719_v18  ;;  %v1216_v18 = vpop.f32.mrf.mxu1 }
 0x346   : > { %5497 = vmatpush3.msra.mxu1 %v4039_v25  ;;  %5479 = vmatprep.mubr.msk.f32.mxu0 %vm1095_vm9, %v4731_v20 }
 0x347   : > { %5498 = vmatprep.subr.mxu1 %v4038_v45  ;;  %v4004_v24 = vpop.permute.xlu1 %4003 }
 0x348   : > { %5499 = vmatpush3.msra.mxu1 %v4038_v45  ;;  %5480 = vmatmul.mubr.msk.f32.gmra.mxu0 %vm1095_vm9, %v4732_v47  ;;  %v4036_v7 = vsel %vm4035_vm5, %v4004_v24, %v4006_v13  ;;  %vm4419_vm5 = vcmask 1041409  }
 0x349   : > { %5458 = vmatmul.mubr.msk.f32.gmra.mxu1 %vm1095_vm9, %v4720_v62  ;;  %5500 = vmatprep.subr.mxu1 %v4037_v55 }
 0x34a   : > { %5501 = vmatpush3.msra.mxu1 %v4037_v55  ;;  %5482 = vmatprep.mubr.msk.f32.mxu0 %vm1095_vm9, %v4733_v60 }
 0x34b   : > { %5502 = vmatprep.subr.mxu1 %v4036_v7  ;;  %5504 = vmatprep.mubr.msk.f32.mxu1 %vm1095_vm9, %v4745_v50 }
 0x34c   : > { %5483 = vmatmul.mubr.msk.f32.gmra.mxu0 %vm1095_vm9, %v4734_v51  ;;  %5503 = vmatpush3.msra.mxu1 %v4036_v7 }
 0x34d   : > { %5505 = vmatmul.mubr.msk.f32.vlgmr.msra.gmra.mxu1 %vm1095_vm9, %v4746_v3  ;;  %5485 = vmatprep.mubr.msk.f32.mxu0 %vm1095_vm9, %v4735_v23 }
 0x34e   : > { %5507 = vmatprep.mubr.msk.f32.mxu1 %vm1095_vm9, %v4747_v32 }
 0x350   : > { %5486 = vmatmul.mubr.msk.f32.gmra.mxu0 %vm1095_vm9, %v4736_v40 }
 0x351   : > { %5508 = vmatmul.mubr.msk.f32.gmra.mxu1 %vm1095_vm9, %v4748_v31 }
 0x352   : > { %5510 = vmatprep.mubr.msk.f32.mxu1 %vm1095_vm9, %v4749_v37 }
 0x354   : > { %v1228_v43 = vpop.permute.xlu1 %1227 }
 0x355   : > { %5511 = vmatmul.mubr.msk.f32.gmra.mxu1 %vm1095_vm9, %v4750_v36 }
 0x356   : > { %5513 = vmatprep.mubr.msk.f32.mxu1 %vm1095_vm9, %v4751_v21 }
 0x358   : > { %v1238_v46 = vpop.permute.xlu1 %1237 }
 0x359   : > { %5514 = vmatmul.mubr.msk.f32.gmra.mxu1 %vm1095_vm9, %v4752_v27  ;;  %v1267_v47 = vadd.f32 %v1238_v46, %v1196_v52 }
 0x35c   : > { %v1248_v25 = vpop.permute.xlu1 %1247 }
 0x35d   : > { %v1269_v60 = vadd.f32 %v1248_v25, %v1206_v17 }
 0x360   : > { %v1258_v51 = vpop.permute.xlu1 %1257 }
 0x361   : > { %v1271_v31 = vadd.f32 %v1258_v51, %v1216_v18 }
 0x37d   : > { %v7725_v22 = vpop.f32.mrf.mxu0 }
 0x37f   : > { %v7727_v9 = vpop.f32.mrf.mxu0 }
 0x382   : > { %v5201_v54 = vpop.f32.mrf.mxu0 }
 0x383   : > { %v1511_v1 = vadd.f32 %v5201_v54, %v1268_v29 }
 0x384   : > { %v1479_v57 = vpop.f32.mrf.mxu0 }
 0x385   : > { %v1510_v55 = vadd.f32 %v1479_v57, %v1267_v47 }
 0x386   : > { %v5204_v44 = vpop.f32.mrf.mxu0 }
 0x387   : > { %v1513_v35 = vadd.f32 %v5204_v44, %v1270_v4 }
 0x388   : > { %v1489_v19 = vpop.f32.mrf.mxu0 }
 0x389   : > { %v1512_v23 = vadd.f32 %v1489_v19, %v1269_v60 }
 0x38a   : > { %v5207_v14 = vpop.f32.mrf.mxu0 }
 0x38b   : > { %v1515_v56 = vadd.f32 %v5207_v14, %v1272_v15 }
 0x38c   : > { %v1499_v8 = vpop.f32.mrf.mxu0 }
 0x38d   : > { %v1514_v27 = vadd.f32 %v1499_v8, %v1271_v31 }
 0x38e   : > { %v7729_v49 = vpop.f32.mrf.mxu0 }
 0x390   : > { %v7731_v10 = vpop.f32.mrf.mxu0 }
 0x392   : > { %v7733_v11 = vpop.f32.mrf.mxu0 }
 0x394   : > { %v7735_v0 = vpop.f32.mrf.mxu0 }
 0x396   : > { %v7737_v42 = vpop.f32.mrf.mxu0 }
 0x398   : > { %v7739_v34 = vpop.f32.mrf.mxu0 }
 0x39a   : > { %v5263_v12 = vpop.f32.mrf.mxu0 }
 0x39c   : > { %v7741_v61 = vpop.f32.mrf.mxu0 }
 0x39e   : > { %v7743_v6 = vpop.f32.mrf.mxu0 }
 0x3a0   : > { %v7745_v48 = vpop.f32.mrf.mxu0 }
 0x3a2   : > { %v7747_v33 = vpop.f32.mrf.mxu0 }
 0x3a4   : > { %v7749_v26 = vpop.f32.mrf.mxu0 }
 0x3a6   : > { %v7751_v58 = vpop.f32.mrf.mxu0 }
 0x3a8   : > { %v7753_v20 = vpop.f32.mrf.mxu0 }
 0x3ab   : > { %v7755_v45 = vpop.f32.mrf.mxu0 }
 0x3ac   : > { %8099 = vst [vmem:[#allocation8_spill] sm:$0xff] %v7755_v45 }
 0x3ad   : > { %v7761_v50 = vpop.f32.mrf.mxu0 }
 0x3b0   : > { %v7767_v36 = vpop.f32.mrf.mxu0 }
 0x3b2   : > { %v7771_v28 = vpop.f32.mrf.mxu0 }
 0x3ba   : > { %v5226_v39 = vpop.f32.mrf.mxu1 }
 0x3bc   : > { %v1712_v41 = vpop.f32.mrf.mxu1 }
 0x3be   : > { %v7773_v54 = vpop.f32.mrf.mxu0 }
 0x3bf   : > { %v5229_v62 = vpop.f32.mrf.mxu1 }
 0x3c0   : > { %v7757_v13 = vadd.f32 %v5229_v62, %v1511_v1  ;;  %v7775_v4 = vpop.f32.mrf.mxu0 }
 0x3c1   : > { %v1722_v24 = vpop.f32.mrf.mxu1 }
 0x3c2   : > { %v7759_v7 = vadd.f32 %v1722_v24, %v1510_v55 }
 0x3c3   : > { %v5232_v3 = vpop.f32.mrf.mxu1 }
 0x3c4   : > { %v7763_v32 = vadd.f32 %v5232_v3, %v1513_v35 }
 0x3c5   : > { %v1732_v40 = vpop.f32.mrf.mxu1 }
 0x3c6   : > { %v7765_v37 = vadd.f32 %v1732_v40, %v1512_v23  ;;  %v1266_v23 = vadd.f32 %v7719_v2, %v7723_v30 }
 0x3c7   : > { %v5235_v21 = vpop.f32.mrf.mxu1 }
 0x3c8   : > { %v1758_v53 = vadd.f32 %v5235_v21, %v1515_v56  ;;  %v1265_v21 = vadd.f32 %v1228_v43, %v7721_v59 }
 0x3c9   : > { %v1742_v52 = vpop.f32.mrf.mxu1 }
 0x3ca   : > { %v7769_v38 = vadd.f32 %v1742_v52, %v1514_v27  ;;  %v2001_v5 = vadd.f32 %v5263_v12, %v1758_v53  ;;  %v7777_v44 = vpop.f32.mrf.mxu0  ;;  %v1509_v27 = vadd.f32 %v7725_v22, %v1266_v23  ;;  %v1508_v52 = vadd.f32 %v7727_v9, %v1265_v21 }
 0x3cb   : > { %v5282_v29 = vpop.f32.mrf.mxu1  ;;  %v1997_v22 = vadd.f32 %v7733_v11, %v7757_v13 }
 0x3cc   : > { %v7783_v14 = vpop.f32.mrf.mxu0 }
 0x3cd   : > { %v2198_v17 = vpop.f32.mrf.mxu1 }
 0x3ce   : > { %v7785_v12 = vpop.f32.mrf.mxu0 }
 0x3cf   : > { %v5285_v1 = vpop.f32.mrf.mxu1  ;;  %8101 = vst [vmem:[#allocation30_spill] sm:$0xff] %v7785_v12 }
 0x3d0   : > { %v7787_v25 = vpop.f32.mrf.mxu0  ;;  %v2240_v21 = vadd.f32 %v5285_v1, %v1997_v22 }
 0x3d1   : > { %v2208_v57 = vpop.f32.mrf.mxu1  ;;  %8102 = vst [vmem:[#allocation31_spill] sm:$0xff] %v7787_v25  ;;  %v1751_v25 = vadd.f32 %v1712_v41, %v1508_v52 }
 0x3d2   : > { %v7791_v55 = vpop.f32.mrf.mxu0 }
 0x3d3   : > { %v5288_v63 = vpop.f32.mrf.mxu1  ;;  %v1994_v30 = vadd.f32 %v7731_v10, %v1751_v25  ;;  %v1999_v10 = vadd.f32 %v7737_v42, %v7763_v32 }
 0x3d4   : > { %v7797_v51 = vpop.f32.mrf.mxu0 }
 0x3d5   : > { %v2218_v16 = vpop.f32.mrf.mxu1  ;;  %v2237_v9 = vadd.f32 %v2198_v17, %v1994_v30  ;;  %v1998_v17 = vadd.f32 %v7739_v34, %v7765_v37  ;;  %v2242_v52 = vadd.f32 %v5288_v63, %v1999_v10 }
 0x3d6   : > { %v7801_v31 = vpop.f32.mrf.mxu0 }
 0x3d7   : > { %v5291_v35 = vpop.f32.mrf.mxu1  ;;  %v2241_v1 = vadd.f32 %v2218_v16, %v1998_v17  ;;  %v2485_v30 = vadd.f32 %v7751_v58, %v2242_v52 }
 0x3d8   : > { %v7779_v19 = vadd.f32 %v5291_v35, %v2001_v5  ;;  %v1752_v5 = vadd.f32 %v5226_v39, %v1509_v27  ;;  %v7806_v12 = vpop.f32.mrf.mxu0 }
 0x3d9   : > { %v7781_v15 = vpop.f32.mrf.mxu1  ;;  %v2484_v16 = vadd.f32 %v7753_v20, %v2241_v1 }
 0x3da   : > { %8100 = vst [vmem:[#allocation36_spill] sm:$0xff] %v7779_v19  ;;  %v1995_v45 = vadd.f32 %v7729_v49, %v1752_v5  ;;  %v1996_v49 = vadd.f32 %v7735_v0, %v7759_v7  ;;  %v2483_v0 = vadd.f32 %v7747_v33, %v2240_v21 }
 0x3db   : > { %v5338_v56 = vpop.f32.mrf.mxu1 }
 0x3dc   : > { %v2238_v59 = vadd.f32 %v5282_v29, %v1995_v45  ;;  %v2480_v45 = vadd.f32 %v7745_v48, %v2237_v9  ;;  %v2239_v29 = vadd.f32 %v2208_v57, %v1996_v49 }
 0x3dd   : > { %v2684_v8 = vpop.f32.mrf.mxu1 }
 0x3de   : > { %v2481_v41 = vadd.f32 %v7743_v6, %v2238_v59  ;;  %v2723_v7 = vadd.f32 %v2684_v8, %v2480_v45  ;;  %v2482_v5 = vadd.f32 %v7749_v26, %v2239_v29  ;;  %v8105_v29 = vld [vmem:[#allocation8_spill] sm:$0xff] }
 0x3df   : > { %v5341_v46 = vpop.f32.mrf.mxu1 }
 0x3e0   : > { %v2724_v25 = vadd.f32 %v5338_v56, %v2481_v41  ;;  %v2726_v32 = vadd.f32 %v5341_v46, %v2483_v0  ;;  %v2000_v56 = vadd.f32 %v7741_v61, %v7769_v38  ;;  %v2966_v34 = vadd.f32 %v7771_v28, %v2723_v7 }
 0x3e1   : > { %v2694_v18 = vpop.f32.mrf.mxu1 }
 0x3e2   : > { %v2967_v42 = vadd.f32 %v7767_v36, %v2724_v25  ;;  %v2725_v37 = vadd.f32 %v2694_v18, %v2482_v5  ;;  %v2243_v26 = vadd.f32 %v7781_v15, %v2000_v56  ;;  %v2969_v46 = vadd.f32 %v7773_v54, %v2726_v32 }
 0x3e4   : > { %v5344_v47 = vpop.f32.mrf.mxu1  ;;  %v2968_v58 = vadd.f32 %v7775_v4, %v2725_v37 }
 0x3e5   : > { %v2728_v36 = vadd.f32 %v5344_v47, %v2485_v30 }
 0x3e6   : > { %v7789_v62 = vpop.f32.mrf.mxu1 }
 0x3e7   : > { %v7811_v2 = vpop.f32.mrf.mxu0  ;;  %v2727_v61 = vadd.f32 %v7789_v62, %v2484_v16  ;;  %v2971_v20 = vadd.f32 %v7777_v44, %v2728_v36 }
 0x3e8   : > { %v7793_v24 = vpop.f32.mrf.mxu1 }
 0x3e9   : > { %8103 = vst [vmem:[#allocation26_spill] sm:$0xff] %v7793_v24  ;;  %v7818_v39 = vpop.f32.mrf.mxu0  ;;  %v2970_v41 = vadd.f32 %v7783_v14, %v2727_v61 }
 0x3ea   : > { %v7795_v60 = vpop.f32.mrf.mxu1 }
 0x3eb   : > { %v7828_v11 = vpop.f32.mrf.mxu0 }
 0x3ec   : > { %v5394_v3 = vpop.f32.mrf.mxu1 }
 0x3ed   : > { %v7835_v48 = vpop.f32.mrf.mxu0  ;;  %v3210_v33 = vadd.f32 %v5394_v3, %v2967_v42  ;;  %v2486_v3 = vadd.f32 %v7761_v50, %v2243_v26  ;;  %v8104_v50 = vld [vmem:[#allocation36_spill] sm:$0xff] }
 0x3ee   : > { %v3170_v40 = vpop.f32.mrf.mxu1  ;;  %v2487_v44 = vadd.f32 %v8105_v29, %v8104_v50 }
 0x3ef   : > { %v3209_v59 = vadd.f32 %v3170_v40, %v2966_v34  ;;  %v3453_v38 = vadd.f32 %v7791_v55, %v3210_v33  ;;  %v2729_v62 = vadd.f32 %v7795_v60, %v2486_v3  ;;  %v8108_v33 = vld [vmem:[#allocation30_spill] sm:$0xff] }
 0x3f0   : > { %v5397_v53 = vpop.f32.mrf.mxu1  ;;  %v8106_v52 = vld [vmem:[#allocation26_spill] sm:$0xff] }
 0x3f1   : > { %v3212_v28 = vadd.f32 %v5397_v53, %v2969_v46  ;;  %v3452_v15 = vadd.f32 %v7797_v51, %v3209_v59  ;;  %v2730_v60 = vadd.f32 %v8106_v52, %v2487_v44 }
 0x3f2   : > { %v3180_v35 = vpop.f32.mrf.mxu1 }
 0x3f3   : > { %v3211_v47 = vadd.f32 %v3180_v35, %v2968_v58  ;;  %v3455_v55 = vadd.f32 %v7801_v31, %v3212_v28 }
 0x3f4   : > { %v5400_v24 = vpop.f32.mrf.mxu1 }
 0x3f5   : > { %v3214_v21 = vadd.f32 %v5400_v24, %v2971_v20  ;;  %v3454_v35 = vadd.f32 %v7806_v12, %v3211_v47  ;;  %v8107_v24 = vld [vmem:[#allocation31_spill] sm:$0xff] }
 0x3f6   : > { %v7809_v19 = vpop.f32.mrf.mxu1  ;;  %v2972_v0 = vadd.f32 %v8107_v24, %v2729_v62 }
 0x3f7   : > { %v3213_v25 = vadd.f32 %v7809_v19, %v2970_v41  ;;  %v3457_v31 = vadd.f32 %v7811_v2, %v3214_v21 }
 0x3f8   : > { %v7814_v43 = vpop.f32.mrf.mxu1 }
 0x3f9   : > { %v3456_v19 = vadd.f32 %v7818_v39, %v3213_v25 }
 0x3fa   : > { %v7820_v23 = vpop.f32.mrf.mxu1 }
 0x3fb   : > { %v3215_v56 = vadd.f32 %v7820_v23, %v2972_v0  ;;  %v4256_v0 = vld [vmem:[%s7991_s6 + $0x58] sm:$0xff] }
 0x3fc   : > { %v5450_v27 = vpop.f32.mrf.mxu1 }
 0x3fd   : > { %v3696_v54 = vadd.f32 %v5450_v27, %v3453_v38  ;;  %v3458_v23 = vadd.f32 %v7835_v48, %v3215_v56 }
 0x3fe   : > { %v3656_v13 = vpop.f32.mrf.mxu1 }
 0x3ff   : > { %v3695_v53 = vadd.f32 %v3656_v13, %v3452_v15 }
 0x400   : > { %v5453_v6 = vpop.f32.mrf.mxu1 }
 0x401   : > { %v3698_v27 = vadd.f32 %v5453_v6, %v3455_v55 }
 0x402   : > { %v3666_v57 = vpop.f32.mrf.mxu1 }
 0x403   : > { %v3697_v1 = vadd.f32 %v3666_v57, %v3454_v35  ;;  %v4253_v35 = vld [vmem:[%s7991_s6 + $0x40] sm:$0xff] }
 0x404   : > { %v5456_v63 = vpop.f32.mrf.mxu1  ;;  %v5478_v8 = vpop.f32.mrf.mxu0 }
 0x405   : > { %v3939_v10 = vadd.f32 %v5478_v8, %v3696_v54  ;;  %v3700_v12 = vadd.f32 %v5456_v63, %v3457_v31  ;;  %v2973_v8 = vadd.f32 %v8108_v33, %v2730_v60  ;;  %v4248_v31 = vld [vmem:[%s7991_s6 + $0x18] sm:$0xff]  ;;  %v4250_v33 = vld [vmem:[%s7991_s6 + $0x28] sm:$0xff] }
 0x406   : > { %v3676_v22 = vpop.f32.mrf.mxu1  ;;  %v3899_v9 = vpop.f32.mrf.mxu0 }
 0x407   : > { %v3938_v17 = vadd.f32 %v3899_v9, %v3695_v53  ;;  %v3699_v16 = vadd.f32 %v3676_v22, %v3456_v19  ;;  %v3216_v39 = vadd.f32 %v7814_v43, %v2973_v8  ;;  %v4247_v19 = vld [vmem:[%s7991_s6 + $0x10] sm:$0xff] }
 0x408   : > { %v5481_v18 = vpop.f32.mrf.mxu0 }
 0x409   : > { %v5459_v49 = vpop.f32.mrf.mxu1  ;;  %v3941_v5 = vadd.f32 %v5481_v18, %v3698_v27  ;;  %v3459_v43 = vadd.f32 %v7828_v11, %v3216_v39  ;;  %v4254_v11 = vld [vmem:[%s7991_s6 + $0x48] sm:$0xff]  ;;  %v4245_v27 = vld [vmem:[%s7991_s6] sm:$0xff] }
 0x40a   : > { %v3909_v40 = vpop.f32.mrf.mxu0 }
 0x40b   : > { %v3686_v4 = vpop.f32.mrf.mxu1  ;;  %v3940_v30 = vadd.f32 %v3909_v40, %v3697_v1  ;;  %v3702_v15 = vadd.f32 %v5459_v49, %v3459_v43  ;;  %v4246_v49 = vld [vmem:[%s7991_s6 + $0x8] sm:$0xff] }
 0x40c   : > { %v5484_v45 = vpop.f32.mrf.mxu0  ;;  %v3701_v38 = vadd.f32 %v3686_v4, %v3458_v23 }
 0x40d   : > { %v5506_v51 = vpop.f32.mrf.mxu1  ;;  %v3943_v36 = vadd.f32 %v5484_v45, %v3700_v12 }
 0x40e   : > { %v4182_v14 = vadd.f32 %v5506_v51, %v3939_v10  ;;  %v3919_v13 = vpop.f32.mrf.mxu0 }
 0x40f   : > { %v4142_v7 = vpop.f32.mrf.mxu1  ;;  %v3942_v59 = vadd.f32 %v3919_v13, %v3699_v16 }
 0x410   : > { %v4215_v42 = vmul.f32 1.442695, %v4182_v14  ;;  %v4181_v32 = vadd.f32 %v4142_v7, %v3938_v17  ;;  %v5487_v2 = vpop.f32.mrf.mxu0  ;;  %vm4206_vm6 = vcmp.gt.f32.partialorder %v4182_v14, 0.0 }
 0x411   : > { %v5509_v6 = vpop.f32.mrf.mxu1  ;;  %v3945_v40 = vadd.f32 %v5487_v2, %v3702_v15 }
 0x412   : > { %5855 = vpow2.f32 %v4215_v42  ;;  %v4213_v34 = vmul.f32 1.442695, %v4181_v32  ;;  %v4184_v37 = vadd.f32 %v5509_v6, %v3941_v5  ;;  %v3929_v58 = vpop.f32.mrf.mxu0  ;;  %vm4205_vm7 = vcmp.gt.f32.partialorder %v4181_v32, 0.0 }
 0x413   : > { %v4152_v26 = vpop.f32.mrf.mxu1  ;;  %v3944_v20 = vadd.f32 %v3929_v58, %v3701_v38  ;;  %v4251_v58 = vld [vmem:[%s7991_s6 + $0x30] sm:$0xff] }
 0x414   : > { %5857 = vpow2.f32 %v4213_v34  ;;  %v4219_v57 = vmul.f32 1.442695, %v4184_v37  ;;  %v7863_v46 = vadd.f32 %v4152_v26, %v3940_v30  ;;  %vm4208_vm8 = vcmp.gt.f32.partialorder %v4184_v37, 0.0 }
 0x415   : > { %v5512_v63 = vpop.f32.mrf.mxu1 }
 0x416   : > { %5859 = vpow2.f32 %v4219_v57  ;;  %v4217_v9 = vmul.f32 1.442695, %v7863_v46  ;;  %v7868_v61 = vadd.f32 %v5512_v63, %v3943_v36  ;;  %vm4207_vm9 = vcmp.gt.f32.partialorder %v7863_v46, 0.0  ;;  %v4257_v57 = vld [vmem:[%s7991_s6 + $0x60] sm:$0xff] }
 0x417   : > { %v4162_v22 = vpop.f32.mrf.mxu1 }
 0x418   : > { %5861 = vpow2.f32 %v4217_v9  ;;  %v4223_v28 = vmul.f32 1.442695, %v7868_v61  ;;  %v7871_v18 = vadd.f32 %v4162_v22, %v3942_v59  ;;  %vm4210_vm10 = vcmp.gt.f32.partialorder %v7868_v61, 0.0 }
 0x419   : > { %v5515_v3 = vpop.f32.mrf.mxu1 }
 0x41a   : > { %5863 = vpow2.f32 %v4223_v28  ;;  %v4221_v47 = vmul.f32 1.442695, %v7871_v18  ;;  %v7877_v21 = vadd.f32 %v5515_v3, %v3945_v40  ;;  %vm4209_vm11 = vcmp.gt.f32.partialorder %v7871_v18, 0.0  ;;  %v4252_v3 = vld [vmem:[%s7991_s6 + $0x38] sm:$0xff] }
 0x41b   : > { %v4172_v48 = vpop.f32.mrf.mxu1 }
 0x41c   : > { %v7875_v54 = vadd.f32 %v4172_v48, %v3944_v20  ;;  %5865 = vpow2.f32 %v4221_v47  ;;  %v4227_v25 = vmul.f32 1.442695, %v7877_v21  ;;  %vm4212_vm13 = vcmp.gt.f32.partialorder %v7877_v21, 0.0  ;;  %v4769_v48 = vld [vmem:[%s7992_s7] ss:$0 sm:$0xff] }
 0x41e   : > { %v4225_v4 = vmul.f32 1.442695, %v7875_v54  ;;  %vm4211_vm12 = vcmp.gt.f32.partialorder %v7875_v54, 0.0 }
 0x41f   : > { %v5856_v41 = vpop.eup %5855 }
 0x420   : > { %v4762_v62 = vadd.f32 -1.0, %v5856_v41  ;;  %5867 = vpow2.f32 %v4225_v4 }
 0x421   : > { %v5858_v55 = vpop.eup %5857  ;;  %5869 = vpow2.f32 %v4227_v25 }
 0x422   : > { %v4761_v53 = vadd.f32 -1.0, %v5858_v55  ;;  %v4238_v10 = vsel %vm4206_vm6, %v4182_v14, %v4762_v62  ;;  %vm4422_vm6 = vcmask 517120  }
 0x423   : > { %v5860_v45 = vpop.eup %5859  ;;  %v4270_v50 = vmul.f32 %v4254_v11, %v4238_v10  ;;  %v4262_v29 = vmul.f32 %v4246_v49, %v4238_v10 }
 0x424   : > { %v4764_v44 = vadd.f32 -1.0, %v5860_v45  ;;  %v4237_v51 = vsel %vm4205_vm7, %v4181_v32, %v4761_v53  ;;  %v4255_v32 = vld [vmem:[%s7991_s6 + $0x50] sm:$0xff]  ;;  %vm4446_vm7 = vcmask 8192  }
 0x425   : > { %v5862_v17 = vpop.eup %5861  ;;  %4295 = vadd.xlane.f32.xlu1 %v4270_v50  ;;  %4279 = vadd.xlane.f32.xlu0 %v4262_v29  ;;  %v4269_v14 = vmul.f32 %v4253_v35, %v4237_v51  ;;  %v4261_v52 = vmul.f32 %v4245_v27, %v4237_v51 }
 0x426   : > { %v4763_v60 = vadd.f32 -1.0, %v5862_v17  ;;  %v4240_v24 = vsel %vm4208_vm8, %v4184_v37, %v4764_v44  ;;  %v4258_v37 = vld [vmem:[%s7991_s6 + $0x68] sm:$0xff] }
 0x427   : > { %v5864_v13 = vpop.eup %5863  ;;  %v4272_v7 = vmul.f32 %v4256_v0, %v4240_v24  ;;  %v4264_v1 = vmul.f32 %v4248_v31, %v4240_v24 }
 0x428   : > { %v4766_v5 = vadd.f32 -1.0, %v5864_v13  ;;  %v4239_v42 = vsel %vm4207_vm9, %v7863_v46, %v4763_v60  ;;  %v4249_v46 = vld [vmem:[%s7991_s6 + $0x20] sm:$0xff] }
 0x429   : > { %4293 = vadd.xlane.f32.xlu0 %v4269_v14  ;;  %4277 = vadd.xlane.f32.xlu1 %v4261_v52  ;;  %v5866_v56 = vpop.eup %5865  ;;  %v4271_v12 = vmul.f32 %v4255_v32, %v4239_v42  ;;  %v4263_v6 = vmul.f32 %v4247_v19, %v4239_v42 }
 0x42a   : > { %v4765_v30 = vadd.f32 -1.0, %v5866_v56  ;;  %v4242_v34 = vsel %vm4210_vm10, %v7868_v61, %v4766_v5  ;;  %v4259_v61 = vld [vmem:[%s7991_s6 + $0x70] sm:$0xff] }
 0x42b   : > { %v4274_v16 = vmul.f32 %v4258_v37, %v4242_v34  ;;  %v4266_v2 = vmul.f32 %v4250_v33, %v4242_v34 }
 0x42c   : > { %v4241_v36 = vsel %vm4209_vm11, %v7871_v18, %v4765_v30  ;;  %v4260_v18 = vld [vmem:[%s7991_s6 + $0x78] sm:$0xff] }
 0x42d   : > { %4299 = vadd.xlane.f32.xlu1 %v4272_v7  ;;  %4283 = vadd.xlane.f32.xlu0 %v4264_v1  ;;  %v5868_v8 = vpop.eup %5867  ;;  %v4273_v23 = vmul.f32 %v4257_v57, %v4241_v36  ;;  %v4265_v63 = vmul.f32 %v4249_v46, %v4241_v36 }
 0x42e   : > { %v4767_v26 = vadd.f32 -1.0, %v5868_v8  ;;  %v5870_v39 = vpop.eup %5869 }
 0x42f   : > { %v4768_v59 = vadd.f32 -1.0, %v5870_v39 }
 0x430   : > { %v4243_v9 = vsel %vm4211_vm12, %v7875_v54, %v4767_v26  ;;  %v4325_v54 = vlaneseq }
 0x431   : > { %4297 = vadd.xlane.f32.xlu1 %v4271_v12  ;;  %4281 = vadd.xlane.f32.xlu0 %v4263_v6  ;;  %v4275_v22 = vmul.f32 %v4259_v61, %v4243_v9  ;;  %v4267_v38 = vmul.f32 %v4251_v58, %v4243_v9  ;;  %v4244_v28 = vsel %vm4212_vm13, %v7877_v21, %v4768_v59 }
 0x432   : > { %v4276_v43 = vmul.f32 %v4260_v18, %v4244_v28  ;;  %v4268_v20 = vmul.f32 %v4252_v3, %v4244_v28  ;;  %v4326_v62 = vand.u32 127, %v4325_v54  ;;  %v4328_v49 = vshrl.u32 %v4325_v54, 7 }
 0x434   : > { %v4338_v11 = vadd.s32 4294967280, %v4326_v62  ;;  %v4331_v55 = vadd.s32 4294967288, %v4326_v62  ;;  %v7942_v45 = vsub.s32 %v4326_v62, %v4328_v49  ;;  %v4345_v50 = vadd.s32 4294967272, %v4326_v62 }
 0x435   : > { %4303 = vadd.xlane.f32.xlu1 %v4274_v16  ;;  %4287 = vadd.xlane.f32.xlu0 %v4266_v2  ;;  %v4352_v44 = vadd.s32 4294967264, %v4326_v62  ;;  %v4366_v14 = vadd.s32 4294967248, %v4326_v62  ;;  %v4359_v7 = vadd.s32 4294967256, %v4326_v62  ;;  %v4373_v56 = vadd.s32 4294967240, %v4326_v62 }
 0x436   : > { %v4341_v29 = vsub.s32 %v4338_v11, %v4328_v49  ;;  %v4334_v25 = vsub.s32 %v4331_v55, %v4328_v49  ;;  %v4348_v52 = vsub.s32 %v4345_v50, %v4328_v49 }
 0x437   : > { %v4355_v0 = vsub.s32 %v4352_v44, %v4328_v49  ;;  %v4369_v19 = vsub.s32 %v4366_v14, %v4328_v49  ;;  %v4362_v8 = vsub.s32 %v4359_v7, %v4328_v49  ;;  %v4376_v57 = vsub.s32 %v4373_v56, %v4328_v49 }
 0x439   : > { %4301 = vadd.xlane.f32.xlu1 %v4273_v23  ;;  %4285 = vadd.xlane.f32.xlu0 %v4265_v63 }
 0x43d   : > { %4305 = vadd.xlane.f32.xlu1 %v4275_v22  ;;  %4289 = vadd.xlane.f32.xlu0 %v4267_v38 }
 0x441   : > { %4307 = vadd.xlane.f32.xlu1 %v4276_v43  ;;  %4291 = vadd.xlane.f32.xlu0 %v4268_v20 }
 0x452   : > { %4433 = vbcast.lane.b32.xlu1 %v4769_v48, 256 }
 0x4ae   : > { %v4296_v15 = vpop.xlane.xlu1 %4295  ;;  %v4280_v47 = vpop.xlane.xlu0 %4279 }
 0x4af   : > { %v4387_v31 = vrot.slane %v4296_v15, %v4334_v25  ;;  %v4335_v13 = vrot.slane %v4280_v47, %v4334_v25 }
 0x4b2   : > { %v4294_v40 = vpop.xlane.xlu0 %4293  ;;  %v4278_v41 = vpop.xlane.xlu1 %4277 }
 0x4b3   : > { %v4383_v27 = vrot.slane %v4294_v40, %v7942_v45  ;;  %v4330_v17 = vrot.slane %v4278_v41, %v7942_v45 }
 0x4b5   : > { %v4388_v42 = vsel %vm4336_vm14, %v4387_v31, %v4383_v27  ;;  %v4337_v32 = vsel %vm4336_vm14, %v4335_v13, %v4330_v17 }
 0x4b6   : > { %v4300_v21 = vpop.xlane.xlu1 %4299  ;;  %v4284_v4 = vpop.xlane.xlu0 %4283 }
 0x4b7   : > { %v4397_v37 = vrot.slane %v4300_v21, %v4348_v52  ;;  %v4349_v33 = vrot.slane %v4284_v4, %v4348_v52 }
 0x4ba   : > { %v4298_v53 = vpop.xlane.xlu1 %4297  ;;  %v4282_v10 = vpop.xlane.xlu0 %4281 }
 0x4bb   : > { %v4392_v60 = vrot.slane %v4298_v53, %v4341_v29  ;;  %v4342_v24 = vrot.slane %v4282_v10, %v4341_v29 }
 0x4bd   : > { %v4393_v12 = vsel %vm4343_vm15, %v4392_v60, %v4388_v42  ;;  %v4344_v6 = vsel %vm4343_vm15, %v4342_v24, %v4337_v32 }
 0x4be   : > { %v4304_v51 = vpop.xlane.xlu1 %4303  ;;  %v4288_v35 = vpop.xlane.xlu0 %4287  ;;  %v4398_v26 = vsel %vm4350_vm0, %v4397_v37, %v4393_v12  ;;  %v4351_v36 = vsel %vm4350_vm0, %v4349_v33, %v4344_v6 }
 0x4bf   : > { %v4407_v59 = vrot.slane %v4304_v51, %v4362_v8  ;;  %v4363_v9 = vrot.slane %v4288_v35, %v4362_v8 }
 0x4c2   : > { %v4302_v1 = vpop.xlane.xlu1 %4301  ;;  %v4286_v5 = vpop.xlane.xlu0 %4285 }
 0x4c3   : > { %v4402_v30 = vrot.slane %v4302_v1, %v4355_v0  ;;  %v4356_v34 = vrot.slane %v4286_v5, %v4355_v0 }
 0x4c5   : > { %v4403_v46 = vsel %vm4357_vm1, %v4402_v30, %v4398_v26  ;;  %v4358_v39 = vsel %vm4357_vm1, %v4356_v34, %v4351_v36 }
 0x4c6   : > { %v4306_v16 = vpop.xlane.xlu1 %4305  ;;  %v4290_v2 = vpop.xlane.xlu0 %4289  ;;  %v4408_v22 = vsel %vm4364_vm2, %v4407_v59, %v4403_v46  ;;  %v4365_v38 = vsel %vm4364_vm2, %v4363_v9, %v4358_v39 }
 0x4c7   : > { %v4412_v23 = vrot.slane %v4306_v16, %v4369_v19  ;;  %v4370_v63 = vrot.slane %v4290_v2, %v4369_v19 }
 0x4c9   : > { %v4413_v3 = vsel %vm4371_vm3, %v4412_v23, %v4408_v22  ;;  %v4372_v43 = vsel %vm4371_vm3, %v4370_v63, %v4365_v38 }
 0x4ca   : > { %v4308_v61 = vpop.xlane.xlu1 %4307  ;;  %v4292_v58 = vpop.xlane.xlu0 %4291 }
 0x4cb   : > { %v4417_v28 = vrot.slane %v4308_v61, %v4376_v57  ;;  %v4377_v18 = vrot.slane %v4292_v58, %v4376_v57 }
 0x4cd   : > { %v4379_v20 = vsel %vm4378_vm4, %v4377_v18, %v4372_v43  ;;  %v4418_v48 = vsel %vm4378_vm4, %v4417_v28, %v4413_v3 }
 0x4ce   : > { %v4420_v15 = vsel %vm4419_vm5, %v4418_v48, %v4379_v20  ;;  %v4434_v54 = vpop.permute.xlu1 %4433 }
 0x4cf   : > { %v4423_v47 = vsel %vm4422_vm6, %v4420_v15, 0.0 }
 0x4d0   : > { %4424 = vadd.xlane.f32.xlu0 %v4423_v47 }
 0x559   : > { %v4425_v40 = vpop.xlane.xlu0 %4424 }
 0x55a   : > { %v4436_v41 = vadd.f32 %v4434_v54, %v4425_v40 }
 0x55c   : > { %4439 = vperm.xlu0 %5570, %v4436_v41  }
 0x5d7   : > { %v4440_v62 = vpop.permute.xlu0 %4439 }
 0x5d8   : > { %v4444_v21 = vrot.slane %v4440_v62, %v7942_v45 }
 0x5da   : > { %4447 = vst.msk [vmem:[%s297_s26] sm:$0x1] %vm4446_vm7, %v4444_v21 }
 0x5db   : > { %5884 = shalt.err (!%p5881_p3)
}
 0x5dc   : > { %s5885_s12 = scalar_lea.hbm %s4459_s20, 16  ;;  %s5889_s25 = scalar_lea.hbm %s7993_s8, 32 }
 0x5dd   : > { %p5886_p4 = scmp.ne.s32.totalorder %s4459_s20, %s5885_s12  ;;  %p5890_p9 = scmp.lt.s32.totalorder %s4459_s20, %s7993_s8 }
 0x5de   : > { %p5891_p10 = scmp.lt.s32.totalorder %s5889_s25, %s5885_s12 }
 0x5df   : > { %p5887_p7 = pnand %p5886_p4, %p6031_p5 }
 0x5e0   : > { %p5892_p11 = por %p5891_p10, %p5890_p9 }
 0x5e1   : > { %p5888_p8 = pneg %p5887_p7 }
 0x5e3   : > { %p5893_p12 = pnand %p5892_p11, %p5888_p8 }
 0x5e5   : > { %5896 = shalt.err (!%p5893_p12)
}
 0x5e6   : > { %5517 = dma.vmem_to_hbm [thread:$0]  (%p6031_p5), %s4462_s13, 16, %s4459_s20, %s4449_s22  }
 0x5e7 PF: > { %p5523_p13 = scmp.ge.s32.totalorder %s5931_s30, 2  ;;  %s4473_s21 = sand.u32 1, %s5919_s27  }
 0x5e8   : > { %s4474_s10 = scalar_lea.sflag [#allocation6], %s4473_s21 }
 0x5e9   : > { %p5520_p0 = pnand %p5523_p13, %p6035_p6 }
 0x5eb   : > { %p5521_p1 = pneg %p5520_p0 }
 0x5ed   : > { %5914 = dma.done.wait (%p5521_p1), %s4474_s10, 16  }
 0x5ee   : > { %5916 = vsyncadd (%p5521_p1), %s4474_s10, 4294967280  ;;  %p18_p2 = scmp.ge.s32.totalorder %s6018_s11, 4   ;;  %s8109_s27 = smov %s5923_s28 }
 0x5ef   : > { %s8110_s28 = smov %s5927_s29  ;;  %s8111_s29 = smov %s6029_s14 }
 0x5f0   : > { %s8112_s30 = smov %s6018_s11  ;;  %20 = sbr.rel (!%p18_p2) target bundleno = 3 (0x3), region = 99 }
 0x5f5   :  { %4478 = vsyncpa [#allocation6], 1 }
 0x5f6   :  { %4480 = vsyncpa [#allocation6 + $0x1], 1 }

</bundles_post_ra>
